<compile_context>
chip_gen: v7x
topology: tpu7x:2x2x1
jax: 0.10.0
libtpu: 0.0.40
codegen_flags: <defaults>
</compile_context>

<pallas_src>
import jax
import jax.numpy as jnp
from jax.experimental import pallas as pl
from jax.experimental.pallas import tpu as pltpu

num_node_features = 7
hidden_channels = 9
num_classes = 5
NUM_NODES = 64            # chess board squares

BLOCK_B = 64              # boards per grid step (lane-stacked)
OUT_LANES = 128           # lane-dense padded output width
BF = BLOCK_B * num_node_features    # 448 stacked input lanes
BH = BLOCK_B * hidden_channels      # 576 stacked hidden lanes


# --------------------------------------------------------------------------
# Pallas kernel: BLOCK_B boards end-to-end, boards stacked on the lane axis.
# --------------------------------------------------------------------------
def chess_gnn_kernel(a_ref, x_ref, w1_ref, w2_ref, wfc_ref, bias_ref, out_ref):
    H, C = hidden_channels, num_classes

    a = a_ref[...]            # (64, 64) bf16, resident (constant index_map)
    x = x_ref[...]            # (64, BF) bf16; column b*F+f = board b, feature f

    # --- GCNConv 1:  relu( (A @ X) @ W1 + b1 )  (block-diag W1 keeps boards on lanes)
    ax = jnp.dot(a, x, preferred_element_type=jnp.float32)               # (64, BF) f32
    h = jnp.dot(ax.astype(jnp.bfloat16), w1_ref[...],
                preferred_element_type=jnp.float32)                      # (64, BH) f32
    h = jnp.maximum(h + bias_ref[0:1, :], 0.0)

    # --- GCNConv 2:  relu( (A @ H) @ W2 + b2 )
    ah = jnp.dot(a, h.astype(jnp.bfloat16),
                 preferred_element_type=jnp.float32)                     # (64, BH) f32
    h2 = jnp.dot(ah.astype(jnp.bfloat16), w2_ref[...],
                 preferred_element_type=jnp.float32)                     # (64, BH) f32
    h2 = jnp.maximum(h2 + bias_ref[1:2, :], 0.0)

    # --- global_max_pool: max over nodes (sublane axis), boards stay on lanes
    pooled = jnp.max(h2, axis=0, keepdims=True)                          # (1, BH) f32

    # --- fc: one tiny masked f32 matmul moves boards lanes->sublanes AND applies Wfc
    #     logits[b, c] = sum_h pooled[b*H + h] * Wfc[h, c]
    sub = jax.lax.broadcasted_iota(jnp.int32, (BLOCK_B, BH), 0)
    lane = jax.lax.broadcasted_iota(jnp.int32, (BLOCK_B, BH), 1)
    band = (lane >= sub * H) & (lane < sub * H + H)                      # board band mask
    p_big = jnp.where(band, pooled, 0.0)                                 # (BLOCK_B, BH) f32
    logits = jnp.dot(p_big, wfc_ref[...],
                     preferred_element_type=jnp.float32)                 # (BLOCK_B, 128) f32
    logits = logits + bias_ref[2:3, 0:OUT_LANES]

    # --- masked log_softmax over the first C lanes, lane-dense (BLOCK_B, 128) store
    out_lane = jax.lax.broadcasted_iota(jnp.int32, (BLOCK_B, OUT_LANES), 1)
    logits = jnp.where(out_lane < C, logits, jnp.float32(-1e30))
    m = jnp.max(logits, axis=1, keepdims=True)
    z = logits - m
    lse = jnp.log(jnp.sum(jnp.exp(z), axis=1, keepdims=True))
    out_ref[...] = z - lse


# --------------------------------------------------------------------------
# One-time glue (outside the hot path).
# --------------------------------------------------------------------------
def build_normalized_adjacency(edge_index, num_nodes):
    """Dense A_hat = D^-1/2 (A + I) D^-1/2 with PyG add_remaining_self_loops
    semantics. Built ONCE for the static chess graph (one-hot matmul, no scatter)."""
    src, dst = edge_index[0], edge_index[1]
    e_dst = jax.nn.one_hot(dst, num_nodes, dtype=jnp.float32)     # (E, N)
    e_src = jax.nn.one_hot(src, num_nodes, dtype=jnp.float32)     # (E, N)
    not_self = (src != dst).astype(jnp.float32)[:, None]
    A = (e_dst * not_self).T @ e_src                              # A[dst, src]
    A = A + jnp.eye(num_nodes, dtype=jnp.float32)                 # exactly one self loop
    deg = jnp.sum(A, axis=1)
    dinv = jax.lax.rsqrt(deg)
    return dinv[:, None] * A * dinv[None, :]


def prepare_params(params):
    """Pre-pack parameters ONCE: bf16 block-diagonal conv weights (boards on lanes),
    tiled f32 Wfc (lane-padded to 128), and an f32 bias slab."""
    w1, b1, w2, b2, wfc, bfc = params
    eye = jnp.eye(BLOCK_B, dtype=jnp.float32)
    w1_big = jnp.kron(eye, w1).astype(jnp.bfloat16)               # (BF, BH)
    w2_big = jnp.kron(eye, w2).astype(jnp.bfloat16)               # (BH, BH)
    wfc_pad = jnp.zeros((hidden_channels, OUT_LANES), jnp.float32)
    wfc_pad = wfc_pad.at[:, :num_classes].set(wfc)
    wfc_tall = jnp.tile(wfc_pad, (BLOCK_B, 1))                    # (BH, 128) f32
    bias = jnp.zeros((8, BH), jnp.float32)
    bias = bias.at[0, :].set(jnp.tile(b1.reshape(-1), BLOCK_B))   # b1 tiled per board
    bias = bias.at[1, :].set(jnp.tile(b2.reshape(-1), BLOCK_B))   # b2 tiled per board
    bias = bias.at[2, :num_classes].set(bfc.reshape(-1))          # bfc (first 128 lanes)
    return w1_big, w2_big, wfc_tall, bias


# --------------------------------------------------------------------------
# Batched forward wrapper (jitted).
# --------------------------------------------------------------------------
@jax.jit
def chess_gnn_forward(x_batch, a_hat, prepared):
    w1_big, w2_big, wfc_tall, bias = prepared
    B, N, F = x_batch.shape
    G = (B + BLOCK_B - 1) // BLOCK_B
    Bpad = G * BLOCK_B
    if Bpad != B:
        x_batch = jnp.pad(x_batch, ((0, Bpad - B), (0, 0), (0, 0)))

    # Lane-stack boards once in the wrapper (layout plumbing, cheap XLA transpose):
    # row g*N + n, column b*F + f  <-  x_batch[g*BLOCK_B + b, n, f]
    x2d = (x_batch.reshape(G, BLOCK_B, N, F)
                  .transpose(0, 2, 1, 3)
                  .reshape(G * N, BLOCK_B * F)
                  .astype(jnp.bfloat16))
    a_bf16 = a_hat.astype(jnp.bfloat16)

    out = pl.pallas_call(
        chess_gnn_kernel,
        out_shape=jax.ShapeDtypeStruct((Bpad, OUT_LANES), jnp.float32),
        grid=(G,),
        in_specs=[
            pl.BlockSpec((N, N), lambda g: (0, 0)),                  # A_hat: resident
            pl.BlockSpec((N, BF), lambda g: (g, 0)),                 # lane-stacked boards
            pl.BlockSpec((BF, BH), lambda g: (0, 0)),                # block-diag W1 (bf16)
            pl.BlockSpec((BH, BH), lambda g: (0, 0)),                # block-diag W2 (bf16)
            pl.BlockSpec((BH, OUT_LANES), lambda g: (0, 0)),         # tiled Wfc (f32)
            pl.BlockSpec((8, BH), lambda g: (0, 0)),                 # bias slab (f32)
        ],
        out_specs=pl.BlockSpec((BLOCK_B, OUT_LANES), lambda g: (g, 0)),
        compiler_params=pltpu.CompilerParams(
            dimension_semantics=("parallel",),
            vmem_limit_bytes=32 * 1024 * 1024),
    )(a_bf16, x2d, w1_big, w2_big, wfc_tall, bias)
    return out[:B, :num_classes]


def init_params(key):
    k1, k2, k3, k4, k5, k6 = jax.random.split(key, 6)
    w1 = jax.random.normal(k1, (num_node_features, hidden_channels), jnp.float32) * 0.1
    b1 = jax.random.normal(k4, (hidden_channels,), jnp.float32) * 0.1
    w2 = jax.random.normal(k2, (hidden_channels, hidden_channels), jnp.float32) * 0.1
    b2 = jax.random.normal(k5, (hidden_channels,), jnp.float32) * 0.1
    wfc = jax.random.normal(k3, (hidden_channels, num_classes), jnp.float32) * 0.1
    bfc = jax.random.normal(k6, (num_classes,), jnp.float32) * 0.1
    return (w1, b1, w2, b2, wfc, bfc)


def reference_forward(x_batch, a_hat, params):
    """Pure-JAX f32 reference with identical semantics (per-board)."""
    w1, b1, w2, b2, wfc, bfc = params

    def one(x):
        h = jnp.maximum(a_hat @ (x @ w1) + b1, 0.0)
        h = jnp.maximum(a_hat @ (h @ w2) + b2, 0.0)
        pooled = jnp.max(h, axis=0)
        logits = pooled @ wfc + bfc
        return jax.nn.log_softmax(logits, axis=-1)

    return jax.vmap(one)(x_batch)


if __name__ == "__main__":
    key = jax.random.PRNGKey(0)
    k_x, k_src, k_dst, k_p = jax.random.split(key, 4)

    num_nodes = NUM_NODES     # 64 squares
    num_edges = 128
    batch = 256               # 4 grid steps of 64 boards (even -> both v7x TCs busy)

    x = jax.random.normal(k_x, (batch, num_nodes, num_node_features), jnp.float32)
    src = jax.random.randint(k_src, (num_edges,), 0, num_nodes, dtype=jnp.int32)
    dst = jax.random.randint(k_dst, (num_edges,), 0, num_nodes, dtype=jnp.int32)
    edge_index = jnp.stack([src, dst], axis=0)                    # (2, E)

    params = init_params(k_p)
    prepared = prepare_params(params)                             # built once
    a_hat = build_normalized_adjacency(edge_index, num_nodes)     # built once

    out = chess_gnn_forward(x, a_hat, prepared)                   # (batch, num_classes)
    jax.block_until_ready(out)
    assert out.shape == (batch, num_classes)

    ref = reference_forward(x, a_hat, params)
    err = float(jnp.max(jnp.abs(out - ref)))
    assert err < 0.15, f"max |kernel - reference| too large: {err}"

    print("KERNEL_OK")
</pallas_src>

<mosaic_0001>
module attributes {stable_mosaic.version = 11 : i64} {
  func.func @chess_gnn_kernel(%arg0: i32, %arg1: memref<64x64xbf16, #tpu.memory_space<vmem>>, %arg2: memref<64x448xbf16, #tpu.memory_space<vmem>>, %arg3: memref<448x576xbf16, #tpu.memory_space<vmem>>, %arg4: memref<576x576xbf16, #tpu.memory_space<vmem>>, %arg5: memref<576x128xf32, #tpu.memory_space<vmem>>, %arg6: memref<8x576xf32, #tpu.memory_space<vmem>>, %arg7: memref<64x128xf32, #tpu.memory_space<vmem>>) attributes {dimension_semantics = [#tpu.dimension_semantics<parallel>], iteration_bounds = array<i64: 4>, scalar_prefetch = 0 : i64, scratch_operands = 0 : i64, tpu.core_type = #tpu.core_type<tc>, window_params = [{pipeline_mode = #tpu.pipeline_mode<synchronous>, transform_indices = @transform_0, window_bounds = array<i64: 64, 64>}, {transform_indices = @transform_1, window_bounds = array<i64: 64, 448>}, {pipeline_mode = #tpu.pipeline_mode<synchronous>, transform_indices = @transform_2, window_bounds = array<i64: 448, 576>}, {pipeline_mode = #tpu.pipeline_mode<synchronous>, transform_indices = @transform_3, window_bounds = array<i64: 576, 576>}, {pipeline_mode = #tpu.pipeline_mode<synchronous>, transform_indices = @transform_4, window_bounds = array<i64: 576, 128>}, {pipeline_mode = #tpu.pipeline_mode<synchronous>, transform_indices = @transform_5, window_bounds = array<i64: 8, 576>}, {transform_indices = @transform_6, window_bounds = array<i64: 64, 128>}]} {
    %c0 = arith.constant 0 : index
    %c0_0 = arith.constant 0 : index
    %0 = vector.load %arg1[%c0, %c0_0] : memref<64x64xbf16, #tpu.memory_space<vmem>>, vector<64x64xbf16>
    %c0_1 = arith.constant 0 : index
    %c0_2 = arith.constant 0 : index
    %1 = vector.load %arg2[%c0_1, %c0_2] : memref<64x448xbf16, #tpu.memory_space<vmem>>, vector<64x448xbf16>
    %cst = arith.constant dense<0.000000e+00> : vector<64x448xf32>
    %2 = tpu.matmul %0, %1, %cst {dimension_numbers = #tpu.dot_dimension_numbers<[1], [0], [0], [1], [0, 0, 1, 1], [], []>} : vector<64x64xbf16>, vector<64x448xbf16>, vector<64x448xf32> -> vector<64x448xf32>
    %3 = arith.truncf %2 : vector<64x448xf32> to vector<64x448xbf16>
    %c0_3 = arith.constant 0 : index
    %c0_4 = arith.constant 0 : index
    %4 = vector.load %arg3[%c0_3, %c0_4] : memref<448x576xbf16, #tpu.memory_space<vmem>>, vector<448x576xbf16>
    %cst_5 = arith.constant dense<0.000000e+00> : vector<64x576xf32>
    %5 = tpu.matmul %3, %4, %cst_5 {dimension_numbers = #tpu.dot_dimension_numbers<[1], [0], [0], [1], [0, 0, 1, 1], [], []>} : vector<64x448xbf16>, vector<448x576xbf16>, vector<64x576xf32> -> vector<64x576xf32>
    %c0_6 = arith.constant 0 : index
    %c0_7 = arith.constant 0 : index
    %6 = vector.load %arg6[%c0_6, %c0_7] : memref<8x576xf32, #tpu.memory_space<vmem>>, vector<1x576xf32>
    %7 = vector.broadcast %6 : vector<1x576xf32> to vector<64x576xf32>
    %8 = arith.addf %5, %7 : vector<64x576xf32>
    %cst_8 = arith.constant 0.000000e+00 : f32
    %9 = vector.broadcast %cst_8 : f32 to vector<64x576xf32>
    %10 = arith.maximumf %8, %9 : vector<64x576xf32>
    %11 = arith.truncf %10 : vector<64x576xf32> to vector<64x576xbf16>
    %cst_9 = arith.constant dense<0.000000e+00> : vector<64x576xf32>
    %12 = tpu.matmul %0, %11, %cst_9 {dimension_numbers = #tpu.dot_dimension_numbers<[1], [0], [0], [1], [0, 0, 1, 1], [], []>} : vector<64x64xbf16>, vector<64x576xbf16>, vector<64x576xf32> -> vector<64x576xf32>
    %13 = arith.truncf %12 : vector<64x576xf32> to vector<64x576xbf16>
    %c0_10 = arith.constant 0 : index
    %c0_11 = arith.constant 0 : index
    %14 = vector.load %arg4[%c0_10, %c0_11] : memref<576x576xbf16, #tpu.memory_space<vmem>>, vector<576x576xbf16>
    %cst_12 = arith.constant dense<0.000000e+00> : vector<64x576xf32>
    %15 = tpu.matmul %13, %14, %cst_12 {dimension_numbers = #tpu.dot_dimension_numbers<[1], [0], [0], [1], [0, 0, 1, 1], [], []>} : vector<64x576xbf16>, vector<576x576xbf16>, vector<64x576xf32> -> vector<64x576xf32>
    %c1 = arith.constant 1 : index
    %c0_13 = arith.constant 0 : index
    %16 = vector.load %arg6[%c1, %c0_13] : memref<8x576xf32, #tpu.memory_space<vmem>>, vector<1x576xf32>
    %17 = vector.broadcast %16 : vector<1x576xf32> to vector<64x576xf32>
    %18 = arith.addf %15, %17 : vector<64x576xf32>
    %cst_14 = arith.constant 0.000000e+00 : f32
    %19 = vector.broadcast %cst_14 : f32 to vector<64x576xf32>
    %20 = arith.maximumf %18, %19 : vector<64x576xf32>
    %cst_15 = arith.constant dense<0xFF800000> : vector<576xf32>
    %21 = vector.multi_reduction <maximumf>, %20, %cst_15 [0] : vector<64x576xf32> to vector<576xf32>
    %22 = vector.shape_cast %21 : vector<576xf32> to vector<1x576xf32>
    %23 = tpu.iota {dimensions = array<i32: 0>} : vector<64x576xi32>
    %24 = tpu.iota {dimensions = array<i32: 1>} : vector<64x576xi32>
    %c9_i32 = arith.constant 9 : i32
    %25 = vector.broadcast %c9_i32 : i32 to vector<64x576xi32>
    %26 = arith.muli %23, %25 : vector<64x576xi32>
    %27 = arith.cmpi sge, %24, %26 : vector<64x576xi32>
    %c9_i32_16 = arith.constant 9 : i32
    %28 = vector.broadcast %c9_i32_16 : i32 to vector<64x576xi32>
    %29 = arith.muli %23, %28 : vector<64x576xi32>
    %c9_i32_17 = arith.constant 9 : i32
    %30 = vector.broadcast %c9_i32_17 : i32 to vector<64x576xi32>
    %31 = arith.addi %29, %30 : vector<64x576xi32>
    %32 = arith.cmpi slt, %24, %31 : vector<64x576xi32>
    %33 = arith.andi %27, %32 : vector<64x576xi1>
    %cst_18 = arith.constant 0.000000e+00 : f32
    %34 = vector.shape_cast %22 : vector<1x576xf32> to vector<1x576xf32>
    %35 = vector.broadcast %34 : vector<1x576xf32> to vector<64x576xf32>
    %36 = vector.broadcast %cst_18 : f32 to vector<64x576xf32>
    %37 = arith.select %33, %35, %36 : vector<64x576xi1>, vector<64x576xf32>
    %c0_19 = arith.constant 0 : index
    %c0_20 = arith.constant 0 : index
    %38 = vector.load %arg5[%c0_19, %c0_20] : memref<576x128xf32, #tpu.memory_space<vmem>>, vector<576x128xf32>
    %cst_21 = arith.constant dense<0.000000e+00> : vector<64x128xf32>
    %39 = tpu.matmul %37, %38, %cst_21 {dimension_numbers = #tpu.dot_dimension_numbers<[1], [0], [0], [1], [0, 0, 1, 1], [], []>} : vector<64x576xf32>, vector<576x128xf32>, vector<64x128xf32> -> vector<64x128xf32>
    %c2 = arith.constant 2 : index
    %c0_22 = arith.constant 0 : index
    %40 = vector.load %arg6[%c2, %c0_22] : memref<8x576xf32, #tpu.memory_space<vmem>>, vector<1x128xf32>
    %41 = vector.broadcast %40 : vector<1x128xf32> to vector<64x128xf32>
    %42 = arith.addf %39, %41 : vector<64x128xf32>
    %43 = tpu.iota {dimensions = array<i32: 1>} : vector<64x128xi32>
    %c5_i32 = arith.constant 5 : i32
    %44 = vector.broadcast %c5_i32 : i32 to vector<64x128xi32>
    %45 = arith.cmpi slt, %43, %44 : vector<64x128xi32>
    %cst_23 = arith.constant -1.000000e+30 : f32
    %46 = vector.broadcast %cst_23 : f32 to vector<64x128xf32>
    %47 = arith.select %45, %42, %46 : vector<64x128xi1>, vector<64x128xf32>
    %cst_24 = arith.constant dense<0xFF800000> : vector<64xf32>
    %48 = vector.multi_reduction <maximumf>, %47, %cst_24 [1] : vector<64x128xf32> to vector<64xf32>
    %49 = vector.shape_cast %48 : vector<64xf32> to vector<64x1xf32>
    %50 = vector.broadcast %49 : vector<64x1xf32> to vector<64x128xf32>
    %51 = arith.subf %47, %50 : vector<64x128xf32>
    %52 = math.exp %51 : vector<64x128xf32>
    %cst_25 = arith.constant dense<0.000000e+00> : vector<64xf32>
    %53 = vector.multi_reduction <add>, %52, %cst_25 [1] : vector<64x128xf32> to vector<64xf32>
    %54 = vector.shape_cast %53 : vector<64xf32> to vector<64x1xf32>
    %55 = math.log %54 : vector<64x1xf32>
    %56 = vector.broadcast %55 : vector<64x1xf32> to vector<64x128xf32>
    %57 = arith.subf %51, %56 : vector<64x128xf32>
    %c0_26 = arith.constant 0 : index
    %c0_27 = arith.constant 0 : index
    %58 = vector.load %arg7[%c0_26, %c0_27] : memref<64x128xf32, #tpu.memory_space<vmem>>, vector<64x128xf32>
    tpu.vector_store %arg7[%c0_26, %c0_27], %57 {strides = array<i32>} : memref<64x128xf32, #tpu.memory_space<vmem>>, vector<64x128xf32>,
    return
  }
  func.func @transform_0(%arg0: i32) -> (i32, i32) {
    %c0_i32 = arith.constant 0 : i32
    %c0_i32_0 = arith.constant 0 : i32
    %c0_i32_1 = arith.constant 0 : i32
    return %c0_i32, %c0_i32_0 : i32, i32
  }
  func.func @transform_1(%arg0: i32) -> (i32, i32) {
    %c0_i32 = arith.constant 0 : i32
    %c0_i32_0 = arith.constant 0 : i32
    return %arg0, %c0_i32 : i32, i32
  }
  func.func @transform_2(%arg0: i32) -> (i32, i32) {
    %c0_i32 = arith.constant 0 : i32
    %c0_i32_0 = arith.constant 0 : i32
    %c0_i32_1 = arith.constant 0 : i32
    return %c0_i32, %c0_i32_0 : i32, i32
  }
  func.func @transform_3(%arg0: i32) -> (i32, i32) {
    %c0_i32 = arith.constant 0 : i32
    %c0_i32_0 = arith.constant 0 : i32
    %c0_i32_1 = arith.constant 0 : i32
    return %c0_i32, %c0_i32_0 : i32, i32
  }
  func.func @transform_4(%arg0: i32) -> (i32, i32) {
    %c0_i32 = arith.constant 0 : i32
    %c0_i32_0 = arith.constant 0 : i32
    %c0_i32_1 = arith.constant 0 : i32
    return %c0_i32, %c0_i32_0 : i32, i32
  }
  func.func @transform_5(%arg0: i32) -> (i32, i32) {
    %c0_i32 = arith.constant 0 : i32
    %c0_i32_0 = arith.constant 0 : i32
    %c0_i32_1 = arith.constant 0 : i32
    return %c0_i32, %c0_i32_0 : i32, i32
  }
  func.func @transform_6(%arg0: i32) -> (i32, i32) {
    %c0_i32 = arith.constant 0 : i32
    %c0_i32_0 = arith.constant 0 : i32
    return %arg0, %c0_i32 : i32, i32
  }
}

</mosaic_0001>

<bundles_post_ra>
// kernel: chess_gnn_forward.1
= control target key start
LH: loop header
LB: loop body
LE: loop exit
PB: predicated region body
PF: predicated region fallthrough
CT: control target
= control target key end

     0   :  { %s6472_s21 = smov 0   ;;  %s8829_s0 = inlined_call_operand.vmem [shape: bf16[64,64], index: 0, kind: input, shape index: {}]   ;;  %s8830_s1 = inlined_call_operand.vmem [shape: bf16[256,448], index: 1, kind: input, shape index: {}]   ;;  %s8831_s2 = inlined_call_operand.vmem [shape: bf16[448,576], index: 2, kind: input, shape index: {}]   ;;  %s8832_s3 = inlined_call_operand.vmem [shape: bf16[576,576], index: 3, kind: input, shape index: {}]   ;;  %s8833_s4 = inlined_call_operand.vmem [shape: f32[576,128], index: 4, kind: input, shape index: {}]   ;;  %s8834_s5 = inlined_call_operand.vmem [shape: f32[8,576], index: 5, kind: input, shape index: {}]   ;;  %s8835_s6 = inlined_call_operand.vmem [shape: f32[256,128], index: 6, kind: output, shape index: {}]  }
   0x1 LB: > { %s4904_s22 = sadd.s32 4294967295, %s6434_s21   ;;  %p4908_p0 = scmp.ge.s32.totalorder %s6434_s21, 1  ;;  %s6434_s21 = sphi %s6472_s21, %s16_s21  }
   0x2   : > { %p214_p1 = scmp.lt.s32.totalorder %s6434_s21, 5 }
   0x4   : > { %p215_p2 = pnand %p4908_p0, %p214_p1 }
   0x5   : > { %s4909_s23 = sshll.u32 (!%p215_p2), %s4904_s22, 3  ;;  %v6436_v0 = vmov (!%p215_p2), 0   ;;  %v5946_v14 = vld [vmem:[%s8831_s2 + $0x4] ss:$20 sps:$4 sm:$0xff] (!%p215_p2)   ;;  %vm8836_vm0 = vcmask (!%p215_p2), 523264   ;;  %v5929_v25 = vld [vmem:[%s8829_s0 + $0x8] sm:$0xff] (!%p215_p2)  }
   0x6   : > { %218 = sbr.rel (%p215_p2) target bundleno = 1721 (0x6b9), region = 44  ;;  %p246_p3 = scmp.lt.s32.totalorder (!%p215_p2), %s4909_s23, 31  ;;  %428 = vmatprep.mubr.bf16.mxu0 (!%p215_p2), %v6436_v0  ;;  %501 = vmatprep.mubr.bf16.mxu1 (!%p215_p2), %v6436_v0  ;;  %v5928_v16 = vld [vmem:[%s8829_s0] sm:$0xff] (!%p215_p2)   ;;  %v5950_v22 = vld [vmem:[%s8831_s2 + $0x28] ss:$20 sps:$4 sm:$0xff] (!%p215_p2)   ;;  %v5930_v34 = vld [vmem:[%s8829_s0 + $0x10] sm:$0xff] (!%p215_p2)  }
   0x7   : > { %v5944_v18 = vld [vmem:[%s8831_s2] ss:$20 sps:$4 sm:$0xff] (!%p215_p2)   ;;  %v5947_v24 = vld [vmem:[%s8831_s2 + $0x8] ss:$20 sps:$4 sm:$0xff] (!%p215_p2)   ;;  %v5956_v27 = vld [vmem:[%s8831_s2 + $0x50] ss:$20 sps:$4 sm:$0xff] (!%p215_p2)  }
   0x8   : > { %v5952_v19 = vld [vmem:[%s8831_s2 + $0x2c] ss:$20 sps:$4 sm:$0xff] (!%p215_p2)   ;;  %v5958_v23 = vld [vmem:[%s8831_s2 + $0x54] ss:$20 sps:$4 sm:$0xff] (!%p215_p2)   ;;  %v5964_v28 = vld [vmem:[%s8831_s2 + $0x7c] ss:$20 sps:$4 sm:$0xff] (!%p215_p2)  }
   0x9   : > { %v5949_v21 = vld [vmem:[%s8831_s2 + $0xc] ss:$20 sps:$4 sm:$0xff] (!%p215_p2)   ;;  %v5955_v26 = vld [vmem:[%s8831_s2 + $0x34] ss:$20 sps:$4 sm:$0xff] (!%p215_p2)   ;;  %v5953_v29 = vld [vmem:[%s8831_s2 + $0x30] ss:$20 sps:$4 sm:$0xff] (!%p215_p2)  }
   0xa   : > { %v5961_v30 = vld [vmem:[%s8831_s2 + $0x5c] ss:$20 sps:$4 sm:$0xff] (!%p215_p2)   ;;  %v5962_v31 = vld [vmem:[%s8831_s2 + $0x78] ss:$20 sps:$4 sm:$0xff] (!%p215_p2)   ;;  %v5968_v36 = vld [vmem:[%s8831_s2 + $0xa0] ss:$20 sps:$4 sm:$0xff] (!%p215_p2)  }
   0xb   : > { %v5970_v32 = vld [vmem:[%s8831_s2 + $0xa4] ss:$20 sps:$4 sm:$0xff] (!%p215_p2)   ;;  %v5976_v37 = vld [vmem:[%s8831_s2 + $0xcc] ss:$20 sps:$4 sm:$0xff] (!%p215_p2)   ;;  %v5974_v40 = vld [vmem:[%s8831_s2 + $0xc8] ss:$20 sps:$4 sm:$0xff] (!%p215_p2)  }
   0xc   : > { %v5959_v33 = vld [vmem:[%s8831_s2 + $0x58] ss:$20 sps:$4 sm:$0xff] (!%p215_p2)   ;;  %v5965_v38 = vld [vmem:[%s8831_s2 + $0x80] ss:$20 sps:$4 sm:$0xff] (!%p215_p2)   ;;  %v5971_v42 = vld [vmem:[%s8831_s2 + $0xa8] ss:$20 sps:$4 sm:$0xff] (!%p215_p2)  }
   0xd   : > { %s8916_s23 = smov (!%p246_p3, %s4909_s23), 31  ;;  %v5967_v35 = vld [vmem:[%s8831_s2 + $0x84] ss:$20 sps:$4 sm:$0xff]   ;;  %v5973_v39 = vld [vmem:[%s8831_s2 + $0xac] ss:$20 sps:$4 sm:$0xff]  }
   0xe   : > { %s5342_s24 = sshll.u32 %s8916_s23, 4  ;;  %v5982_v41 = vld [vmem:[%s8831_s2 + $0xf4] ss:$20 sps:$4 sm:$0xff]   ;;  %v5937_v43 = vld [vmem:[%s8829_s0 + $0x18] sm:$0xff]   ;;  %v5980_v45 = vld [vmem:[%s8831_s2 + $0xf0] ss:$20 sps:$4 sm:$0xff]  }
   0xf   : > { %s6488_s27 = scalar_lea.vmem %s8830_s1, %s5342_s24  ;;  %v5979_v44 = vld [vmem:[%s8831_s2 + $0xd4] ss:$20 sps:$4 sm:$0xff]   ;;  %v5988_v46 = vld [vmem:[%s8831_s2 + $0x11c] ss:$20 sps:$4 sm:$0xff]   ;;  %v5986_v49 = vld [vmem:[%s8831_s2 + $0x118] ss:$20 sps:$4 sm:$0xff]  }
  0x10   : > { %v5916_v1 = vld [vmem:[%s6488_s27 + $0x4] ss:$16 sps:$4 sm:$0xff]   ;;  %v5918_v2 = vld [vmem:[%s6488_s27] ss:$16 sps:$4 sm:$0xff]   ;;  %v5931_v6 = vld [vmem:[%s6488_s27 + $0xc] ss:$16 sps:$4 sm:$0xff]  }
  0x11   : > { %396 = vmatprep.subr.bf16.mxu0 %v5916_v1  ;;  %v5919_v3 = vld [vmem:[%s6488_s27 + $0x24] ss:$16 sps:$4 sm:$0xff]   ;;  %v5921_v4 = vld [vmem:[%s6488_s27 + $0x20] ss:$16 sps:$4 sm:$0xff]   ;;  %v5933_v7 = vld [vmem:[%s6488_s27 + $0x8] ss:$16 sps:$4 sm:$0xff]   ;;  %469 = vmatprep.subr.bf16.mxu1 %v5931_v6 }
  0x12   : > { %397 = vmatpush1.bf16.msra.mxu0 %v5918_v2  ;;  %v5922_v5 = vld [vmem:[%s6488_s27 + $0x44] ss:$16 sps:$4 sm:$0xff]   ;;  %v5924_v8 = vld [vmem:[%s6488_s27 + $0x40] ss:$16 sps:$4 sm:$0xff]   ;;  %v5934_v9 = vld [vmem:[%s6488_s27 + $0x2c] ss:$16 sps:$4 sm:$0xff]   ;;  %470 = vmatpush1.bf16.msra.mxu1 %v5933_v7 }
  0x13   : > { %398 = vmatprep.subr.bf16.mxu0 %v5919_v3  ;;  %v5925_v10 = vld [vmem:[%s6488_s27 + $0x64] ss:$16 sps:$4 sm:$0xff]   ;;  %v5936_v11 = vld [vmem:[%s6488_s27 + $0x28] ss:$16 sps:$4 sm:$0xff]   ;;  %471 = vmatprep.subr.bf16.mxu1 %v5934_v9  ;;  %v5938_v12 = vld [vmem:[%s6488_s27 + $0x4c] ss:$16 sps:$4 sm:$0xff]  }
  0x14   : > { %v5927_v13 = vld [vmem:[%s6488_s27 + $0x60] ss:$16 sps:$4 sm:$0xff]   ;;  %v5940_v15 = vld [vmem:[%s6488_s27 + $0x48] ss:$16 sps:$4 sm:$0xff]   ;;  %v5941_v17 = vld [vmem:[%s6488_s27 + $0x6c] ss:$16 sps:$4 sm:$0xff]  }
  0x15   : > { %v5943_v20 = vld [vmem:[%s6488_s27 + $0x68] ss:$16 sps:$4 sm:$0xff]   ;;  %v5977_v47 = vld [vmem:[%s8831_s2 + $0xd0] ss:$20 sps:$4 sm:$0xff]   ;;  %v5989_v53 = vld [vmem:[%s8831_s2 + $0x120] ss:$20 sps:$4 sm:$0xff]  }
  0x16   : > { %399 = vmatpush1.bf16.msra.mxu0 %v5921_v4  ;;  %472 = vmatpush1.bf16.msra.mxu1 %v5936_v11  ;;  %v5985_v48 = vld [vmem:[%s8831_s2 + $0xfc] ss:$20 sps:$4 sm:$0xff]   ;;  %v5994_v50 = vld [vmem:[%s8831_s2 + $0x144] ss:$20 sps:$4 sm:$0xff]   ;;  %v5992_v54 = vld [vmem:[%s8831_s2 + $0x140] ss:$20 sps:$4 sm:$0xff]  }
  0x17   : > { %400 = vmatprep.subr.bf16.mxu0 %v5922_v5  ;;  %473 = vmatprep.subr.bf16.mxu1 %v5938_v12  ;;  %v5983_v51 = vld [vmem:[%s8831_s2 + $0xf8] ss:$20 sps:$4 sm:$0xff]   ;;  %v5998_v57 = vld [vmem:[%s8831_s2 + $0x168] ss:$20 sps:$4 sm:$0xff]   ;;  %v6004_v61 = vld [vmem:[%s8831_s2 + $0x190] ss:$20 sps:$4 sm:$0xff]  }
  0x18   : > { %v5991_v52 = vld [vmem:[%s8831_s2 + $0x124] ss:$20 sps:$4 sm:$0xff]   ;;  %v6000_v55 = vld [vmem:[%s8831_s2 + $0x16c] ss:$20 sps:$4 sm:$0xff]   ;;  %v6006_v58 = vld [vmem:[%s8831_s2 + $0x194] ss:$20 sps:$4 sm:$0xff]  }
  0x19   : > { %v5997_v56 = vld [vmem:[%s8831_s2 + $0x14c] ss:$20 sps:$4 sm:$0xff]   ;;  %v5995_v59 = vld [vmem:[%s8831_s2 + $0x148] ss:$20 sps:$4 sm:$0xff]   ;;  %v6001_v63 = vld [vmem:[%s8831_s2 + $0x170] ss:$20 sps:$4 sm:$0xff]  }
  0x1a   : > { %401 = vmatpush1.bf16.msra.mxu0 %v5924_v8  ;;  %474 = vmatpush1.bf16.msra.mxu1 %v5940_v15  ;;  %v6003_v60 = vld [vmem:[%s8831_s2 + $0x174] ss:$20 sps:$4 sm:$0xff]   ;;  %v6012_v62 = vld [vmem:[%s8831_s2 + $0x1bc] ss:$20 sps:$4 sm:$0xff]   ;;  %v6010_v2 = vld [vmem:[%s8831_s2 + $0x1b8] ss:$20 sps:$4 sm:$0xff]  }
  0x1b   : > { %402 = vmatprep.subr.bf16.mxu0 %v5925_v10  ;;  %475 = vmatprep.subr.bf16.mxu1 %v5941_v17  ;;  %v6009_v1 = vld [vmem:[%s8831_s2 + $0x19c] ss:$20 sps:$4 sm:$0xff]   ;;  %v6018_v3 = vld [vmem:[%s8831_s2 + $0x1e4] ss:$20 sps:$4 sm:$0xff]   ;;  %v6016_v6 = vld [vmem:[%s8831_s2 + $0x1e0] ss:$20 sps:$4 sm:$0xff]  }
  0x1c   : > { %v6007_v4 = vld [vmem:[%s8831_s2 + $0x198] ss:$20 sps:$4 sm:$0xff]   ;;  %v6013_v8 = vld [vmem:[%s8831_s2 + $0x1c0] ss:$20 sps:$4 sm:$0xff]   ;;  %v6022_v10 = vld [vmem:[%s8831_s2 + $0x208] ss:$20 sps:$4 sm:$0xff]  }
  0x1d   : > { %v6015_v5 = vld [vmem:[%s8831_s2 + $0x1c4] ss:$20 sps:$4 sm:$0xff]   ;;  %v6024_v7 = vld [vmem:[%s8831_s2 + $0x20c] ss:$20 sps:$4 sm:$0xff]   ;;  %v6030_v11 = vld [vmem:[%s8831_s2 + $0x234] ss:$20 sps:$4 sm:$0xff]  }
  0x1e   : > { %403 = vmatpush1.bf16.msra.mxu0 %v5927_v13  ;;  %476 = vmatpush1.bf16.msra.mxu1 %v5943_v20  ;;  %v6021_v9 = vld [vmem:[%s8831_s2 + $0x1ec] ss:$20 sps:$4 sm:$0xff]   ;;  %v6019_v12 = vld [vmem:[%s8831_s2 + $0x1e8] ss:$20 sps:$4 sm:$0xff]   ;;  %v6025_v15 = vld [vmem:[%s8831_s2 + $0x210] ss:$20 sps:$4 sm:$0xff]  }
  0x1f   : > { %1495 = vmatprep.subr.bf16.mxu0 %v5946_v14  ;;  %1641 = vmatprep.subr.bf16.mxu1 %v5949_v21  ;;  %v6027_v13 = vld [vmem:[%s8831_s2 + $0x214] ss:$20 sps:$4 sm:$0xff]   ;;  %v6028_v14 = vld [vmem:[%s8831_s2 + $0x230] ss:$20 sps:$4 sm:$0xff]   ;;  %v6031_v17 = vld [vmem:[%s8831_s2 + $0x238] ss:$20 sps:$4 sm:$0xff]  }
  0x20   : > { %v6034_v20 = vld [vmem:[%s8831_s2 + $0x258] ss:$20 sps:$4 sm:$0xff]   ;;  %v6037_v21 = vld [vmem:[%s8831_s2 + $0x260] ss:$20 sps:$4 sm:$0xff]   ;;  %s4913_s24 = sshll.u32 %s8916_s23, 3 }
  0x21   : > { %4934 = vmatmul.mubr.msk.bf16.vlgmr.msra.gmra.mrb[0].mxu0 %vm8836_vm0, %v5928_v16  ;;  %4938 = vmatmul.mubr.msk.bf16.vlgmr.msra.gmra.mrb[0].mxu1 %vm8836_vm0, %v5928_v16  ;;  %v6033_v16 = vld [vmem:[%s8831_s2 + $0x23c] ss:$20 sps:$4 sm:$0xff]   ;;  %s8808_s27 = scalar_lea.vmem %s8835_s6, %s4913_s24 }
  0x22   : > { %438 = vmatprep.mubr.bf16.mxu0 %v6436_v0  ;;  %1496 = vmatpush1.bf16.msra.mxu0 %v5944_v18  ;;  %v6036_v18 = vld [vmem:[%s8831_s2 + $0x25c] ss:$20 sps:$4 sm:$0xff]  }
  0x23   : > { %1497 = vmatprep.subr.bf16.mxu0 %v5952_v19  ;;  %511 = vmatprep.mubr.bf16.mxu1 %v6436_v0  ;;  %v6039_v19 = vld [vmem:[%s8831_s2 + $0x264] ss:$20 sps:$4 sm:$0xff]  }
  0x24   : > { %1642 = vmatpush1.bf16.msra.mxu1 %v5947_v24 }
  0x25   : > { %1643 = vmatprep.subr.bf16.mxu1 %v5955_v26 }
  0x26   : > { %1498 = vmatpush1.bf16.msra.mxu0 %v5950_v22  ;;  %v6042_v22 = vld [vmem:[%s8831_s2 + $0x284] ss:$20 sps:$4 sm:$0xff]  }
  0x27   : > { %1499 = vmatprep.subr.bf16.mxu0 %v5958_v23  ;;  %v6045_v23 = vld [vmem:[%s8831_s2 + $0x28c] ss:$20 sps:$4 sm:$0xff]  }
  0x28   : > { %1644 = vmatpush1.bf16.msra.mxu1 %v5953_v29 }
  0x29   : > { %4935 = vmatmul.mubr.msk.bf16.gmra.mrb[4].mxu0 %vm8836_vm0, %v5929_v25  ;;  %1645 = vmatprep.subr.bf16.mxu1 %v5961_v30  ;;  %v6040_v30 = vld [vmem:[%s8831_s2 + $0x280] ss:$20 sps:$4 sm:$0xff]  }
  0x2a   : > { %448 = vmatprep.mubr.bf16.mxu0 %v6436_v0  ;;  %1500 = vmatpush1.bf16.msra.mxu0 %v5956_v27 }
  0x2b   : > { %1501 = vmatprep.subr.bf16.mxu0 %v5964_v28  ;;  %4939 = vmatmul.mubr.msk.bf16.gmra.mrb[4].mxu1 %vm8836_vm0, %v5929_v25 }
  0x2c   : > { %521 = vmatprep.mubr.bf16.mxu1 %v6436_v0  ;;  %1646 = vmatpush1.bf16.msra.mxu1 %v5959_v33  ;;  %v6051_v33 = vld [vmem:[%s8831_s2 + $0x2b4] ss:$20 sps:$4 sm:$0xff]  }
  0x2d   : > { %1647 = vmatprep.subr.bf16.mxu1 %v5967_v35 }
  0x2e   : > { %1502 = vmatpush1.bf16.msra.mxu0 %v5962_v31  ;;  %v6043_v31 = vld [vmem:[%s8831_s2 + $0x288] ss:$20 sps:$4 sm:$0xff]  }
  0x2f   : > { %1503 = vmatprep.subr.bf16.mxu0 %v5970_v32  ;;  %v6048_v32 = vld [vmem:[%s8831_s2 + $0x2ac] ss:$20 sps:$4 sm:$0xff]  }
  0x30   : > { %1648 = vmatpush1.bf16.msra.mxu1 %v5965_v38 }
  0x31   : > { %4936 = vmatmul.mubr.msk.bf16.gmra.mrb[8].mxu0 %vm8836_vm0, %v5930_v34  ;;  %1649 = vmatprep.subr.bf16.mxu1 %v5973_v39 }
  0x32   : > { %458 = vmatprep.mubr.bf16.mxu0 %v6436_v0  ;;  %1504 = vmatpush1.bf16.msra.mxu0 %v5968_v36  ;;  %v6046_v36 = vld [vmem:[%s8831_s2 + $0x2a8] ss:$20 sps:$4 sm:$0xff]  }
  0x33   : > { %1505 = vmatprep.subr.bf16.mxu0 %v5976_v37  ;;  %4940 = vmatmul.mubr.msk.bf16.gmra.mrb[8].mxu1 %vm8836_vm0, %v5930_v34  ;;  %v6049_v37 = vld [vmem:[%s8831_s2 + $0x2b0] ss:$20 sps:$4 sm:$0xff]  }
  0x34   : > { %531 = vmatprep.mubr.bf16.mxu1 %v6436_v0  ;;  %1650 = vmatpush1.bf16.msra.mxu1 %v5971_v42 }
  0x35   : > { %1651 = vmatprep.subr.bf16.mxu1 %v5979_v44 }
  0x36   : > { %1506 = vmatpush1.bf16.msra.mxu0 %v5974_v40  ;;  %v6054_v40 = vld [vmem:[%s8831_s2 + $0x2d4] ss:$20 sps:$4 sm:$0xff]  }
  0x37   : > { %1507 = vmatprep.subr.bf16.mxu0 %v5982_v41  ;;  %v6057_v41 = vld [vmem:[%s8831_s2 + $0x2dc] ss:$20 sps:$4 sm:$0xff]  }
  0x38   : > { %1652 = vmatpush1.bf16.msra.mxu1 %v5977_v47 }
  0x39   : > { %4937 = vmatmul.mubr.msk.bf16.gmra.mrb[12].mxu0 %vm8836_vm0, %v5937_v43  ;;  %1653 = vmatprep.subr.bf16.mxu1 %v5985_v48 }
  0x3a   : > { %1508 = vmatpush1.bf16.msra.mxu0 %v5980_v45 }
  0x3b   : > { %1509 = vmatprep.subr.bf16.mxu0 %v5988_v46  ;;  %4941 = vmatmul.mubr.msk.bf16.gmra.mrb[12].mxu1 %vm8836_vm0, %v5937_v43 }
  0x3c   : > { %1654 = vmatpush1.bf16.msra.mxu1 %v5983_v51 }
  0x3d   : > { %1655 = vmatprep.subr.bf16.mxu1 %v5991_v52  ;;  %v6060_v52 = vld [vmem:[%s8831_s2 + $0x2fc] ss:$20 sps:$4 sm:$0xff]  }
  0x3e   : > { %1510 = vmatpush1.bf16.msra.mxu0 %v5986_v49  ;;  %v6052_v49 = vld [vmem:[%s8831_s2 + $0x2d0] ss:$20 sps:$4 sm:$0xff]  }
  0x3f   : > { %1511 = vmatprep.subr.bf16.mxu0 %v5994_v50  ;;  %v6055_v50 = vld [vmem:[%s8831_s2 + $0x2d8] ss:$20 sps:$4 sm:$0xff]  }
  0x40   : > { %1656 = vmatpush1.bf16.msra.mxu1 %v5989_v53  ;;  %v6063_v53 = vld [vmem:[%s8831_s2 + $0x304] ss:$20 sps:$4 sm:$0xff]  }
  0x41   : > { %1657 = vmatprep.subr.bf16.mxu1 %v5997_v56  ;;  %v6058_v56 = vld [vmem:[%s8831_s2 + $0x2f8] ss:$20 sps:$4 sm:$0xff]  }
  0x42   : > { %1512 = vmatpush1.bf16.msra.mxu0 %v5992_v54 }
  0x43   : > { %1513 = vmatprep.subr.bf16.mxu0 %v6000_v55 }
  0x44   : > { %1658 = vmatpush1.bf16.msra.mxu1 %v5995_v59 }
  0x45   : > { %1659 = vmatprep.subr.bf16.mxu1 %v6003_v60  ;;  %v6066_v60 = vld [vmem:[%s8831_s2 + $0x324] ss:$20 sps:$4 sm:$0xff]  }
  0x46   : > { %1514 = vmatpush1.bf16.msra.mxu0 %v5998_v57  ;;  %v6061_v57 = vld [vmem:[%s8831_s2 + $0x300] ss:$20 sps:$4 sm:$0xff]  }
  0x47   : > { %1515 = vmatprep.subr.bf16.mxu0 %v6006_v58 }
  0x48   : > { %1660 = vmatpush1.bf16.msra.mxu1 %v6001_v63 }
  0x49   : > { %1661 = vmatprep.subr.bf16.mxu1 %v6009_v1 }
  0x4a   : > { %1516 = vmatpush1.bf16.msra.mxu0 %v6004_v61  ;;  %v6069_v61 = vld [vmem:[%s8831_s2 + $0x32c] ss:$20 sps:$4 sm:$0xff]  }
  0x4b   : > { %1517 = vmatprep.subr.bf16.mxu0 %v6012_v62 }
  0x4c   : > { %1662 = vmatpush1.bf16.msra.mxu1 %v6007_v4 }
  0x4d   : > { %1663 = vmatprep.subr.bf16.mxu1 %v6015_v5 }
  0x4e   : > { %1518 = vmatpush1.bf16.msra.mxu0 %v6010_v2 }
  0x4f   : > { %1519 = vmatprep.subr.bf16.mxu0 %v6018_v3 }
  0x50   : > { %1664 = vmatpush1.bf16.msra.mxu1 %v6013_v8 }
  0x51   : > { %1665 = vmatprep.subr.bf16.mxu1 %v6021_v9  ;;  %v6072_v9 = vld [vmem:[%s8831_s2 + $0x34c] ss:$20 sps:$4 sm:$0xff]  }
  0x52   : > { %1520 = vmatpush1.bf16.msra.mxu0 %v6016_v6  ;;  %v6064_v6 = vld [vmem:[%s8831_s2 + $0x320] ss:$20 sps:$4 sm:$0xff]  }
  0x53   : > { %1521 = vmatprep.subr.bf16.mxu0 %v6024_v7  ;;  %v6067_v7 = vld [vmem:[%s8831_s2 + $0x328] ss:$20 sps:$4 sm:$0xff]  }
  0x54   : > { %1666 = vmatpush1.bf16.msra.mxu1 %v6019_v12 }
  0x55   : > { %1667 = vmatprep.subr.bf16.mxu1 %v6027_v13  ;;  %v6070_v13 = vld [vmem:[%s8831_s2 + $0x348] ss:$20 sps:$4 sm:$0xff]  }
  0x56   : > { %1522 = vmatpush1.bf16.msra.mxu0 %v6022_v10  ;;  %v6075_v10 = vld [vmem:[%s8831_s2 + $0x354] ss:$20 sps:$4 sm:$0xff]  }
  0x57   : > { %1523 = vmatprep.subr.bf16.mxu0 %v6030_v11 }
  0x58   : > { %1668 = vmatpush1.bf16.msra.mxu1 %v6025_v15 }
  0x59   : > { %1669 = vmatprep.subr.bf16.mxu1 %v6033_v16 }
  0x5a   : > { %1524 = vmatpush1.bf16.msra.mxu0 %v6028_v14  ;;  %v6073_v14 = vld [vmem:[%s8831_s2 + $0x350] ss:$20 sps:$4 sm:$0xff]  }
  0x5b   : > { %1525 = vmatprep.subr.bf16.mxu0 %v6036_v18  ;;  %v6081_v18 = vld [vmem:[%s8831_s2 + $0x37c] ss:$20 sps:$4 sm:$0xff]  }
  0x5c   : > { %1670 = vmatpush1.bf16.msra.mxu1 %v6031_v17  ;;  %v6078_v17 = vld [vmem:[%s8831_s2 + $0x374] ss:$20 sps:$4 sm:$0xff]  }
  0x5d   : > { %1671 = vmatprep.subr.bf16.mxu1 %v6039_v19 }
  0x5e   : > { %1526 = vmatpush1.bf16.msra.mxu0 %v6034_v20 }
  0x5f   : > { %1568 = vmatprep.subr.bf16.mxu0 %v6042_v22 }
  0x60   : > { %1672 = vmatpush1.bf16.msra.mxu1 %v6037_v21 }
  0x61   : > { %1714 = vmatprep.subr.bf16.mxu1 %v6045_v23 }
  0xf4   : > { %v430_v24 = vpop.f32.mrb[0].mxu0  ;;  %v503_v34 = vpop.f32.mrb[0].mxu1 }
  0xf5   : > { %v432_v25 = vpop.f32.mrb[1].mxu0  ;;  %v505_v35 = vpop.f32.mrb[1].mxu1 }
  0xf6   : > { %v434_v26 = vpop.f32.mrb[2].mxu0  ;;  %v507_v39 = vpop.f32.mrb[2].mxu1 }
  0xf7   : > { %v6730_v27 = vpack.c.bf16 %v434_v26, %v430_v24  ;;  %v436_v28 = vpop.f32.mrb[3].mxu0  ;;  %v6762_v43 = vpack.c.bf16 %v507_v39, %v503_v34  ;;  %v509_v44 = vpop.f32.mrb[3].mxu1  ;;  %v6076_v26 = vld [vmem:[%s8831_s2 + $0x370] ss:$20 sps:$4 sm:$0xff]   ;;  %v6093_v39 = vld [vmem:[%s8831_s2 + $0x3cc] ss:$20 sps:$4 sm:$0xff]  }
  0xf8   : > { %v6732_v29 = vpack.c.bf16 %v436_v28, %v432_v25  ;;  %v6764_v46 = vpack.c.bf16 %v509_v44, %v505_v35  ;;  %v6079_v28 = vld [vmem:[%s8831_s2 + $0x378] ss:$20 sps:$4 sm:$0xff]   ;;  %v6088_v44 = vld [vmem:[%s8831_s2 + $0x3c0] ss:$20 sps:$4 sm:$0xff]  }
  0xf9   : > { %v6082_v35 = vld [vmem:[%s8831_s2 + $0x398] ss:$20 sps:$4 sm:$0xff]  }
  0xfa   : > { %1527 = vmatprep.mubr.bf16.mxu0 %v6732_v29  ;;  %1673 = vmatprep.mubr.bf16.mxu1 %v6732_v29 }
  0xfb   : > { %1528 = vmatmul.mubr.bf16.vlgmr.msra.gmra.mrb[16].mxu0 %v6730_v27  ;;  %1674 = vmatmul.mubr.bf16.vlgmr.msra.gmra.mrb[16].mxu1 %v6730_v27 }
  0xfc   : > { %1569 = vmatpush1.bf16.msra.mxu0 %v6040_v30  ;;  %1715 = vmatpush1.bf16.msra.mxu1 %v6043_v31  ;;  %v440_v38 = vpop.f32.mrb[4].mxu0  ;;  %v6084_v31 = vld [vmem:[%s8831_s2 + $0x39c] ss:$20 sps:$4 sm:$0xff]  }
  0xfd   : > { %1570 = vmatprep.subr.bf16.mxu0 %v6048_v32  ;;  %1716 = vmatprep.subr.bf16.mxu1 %v6051_v33  ;;  %v442_v42 = vpop.f32.mrb[5].mxu0  ;;  %v6087_v32 = vld [vmem:[%s8831_s2 + $0x3a4] ss:$20 sps:$4 sm:$0xff]  }
  0xfe   : > { %v444_v45 = vpop.f32.mrb[6].mxu0  ;;  %v513_v54 = vpop.f32.mrb[4].mxu1 }
  0xff   : > { %v6766_v47 = vpack.c.bf16 %v444_v45, %v440_v38  ;;  %v446_v48 = vpop.f32.mrb[7].mxu0  ;;  %v515_v55 = vpop.f32.mrb[5].mxu1  ;;  %v6090_v38 = vld [vmem:[%s8831_s2 + $0x3c4] ss:$20 sps:$4 sm:$0xff]   ;;  %v6091_v45 = vld [vmem:[%s8831_s2 + $0x3c8] ss:$20 sps:$4 sm:$0xff]  }
 0x100   : > { %1571 = vmatpush1.bf16.msra.mxu0 %v6046_v36  ;;  %1717 = vmatpush1.bf16.msra.mxu1 %v6049_v37  ;;  %v6774_v51 = vpack.c.bf16 %v446_v48, %v442_v42  ;;  %v517_v59 = vpop.f32.mrb[6].mxu1  ;;  %v6085_v36 = vld [vmem:[%s8831_s2 + $0x3a0] ss:$20 sps:$4 sm:$0xff]  }
 0x101   : > { %1572 = vmatprep.subr.bf16.mxu0 %v6054_v40  ;;  %1718 = vmatprep.subr.bf16.mxu1 %v6057_v41  ;;  %v6798_v63 = vpack.c.bf16 %v517_v59, %v513_v54  ;;  %v519_v1 = vpop.f32.mrb[7].mxu1  ;;  %v6096_v48 = vld [vmem:[%s8831_s2 + $0x3ec] ss:$20 sps:$4 sm:$0xff]   ;;  %v6105_v54 = vld [vmem:[%s8831_s2 + $0x41c] ss:$20 sps:$4 sm:$0xff]  }
 0x102   : > { %1537 = vmatprep.mubr.bf16.mxu0 %v6774_v51  ;;  %1683 = vmatprep.mubr.bf16.mxu1 %v6774_v51  ;;  %v6800_v3 = vpack.c.bf16 %v519_v1, %v515_v55  ;;  %v6100_v55 = vld [vmem:[%s8831_s2 + $0x410] ss:$20 sps:$4 sm:$0xff]   ;;  %v6106_v59 = vld [vmem:[%s8831_s2 + $0x438] ss:$20 sps:$4 sm:$0xff]  }
 0x103   : > { %1538 = vmatmul.mubr.bf16.gmra.mrb[20].mxu0 %v6766_v47  ;;  %1684 = vmatmul.mubr.bf16.gmra.mrb[20].mxu1 %v6766_v47  ;;  %v6114_v1 = vld [vmem:[%s8831_s2 + $0x290] ss:$20 sps:$4 sm:$0xff]  }
 0x104   : > { %1573 = vmatpush1.bf16.msra.mxu0 %v6052_v49  ;;  %1719 = vmatpush1.bf16.msra.mxu1 %v6055_v50  ;;  %v450_v58 = vpop.f32.mrb[8].mxu0  ;;  %v6099_v49 = vld [vmem:[%s8831_s2 + $0x3f4] ss:$20 sps:$4 sm:$0xff]  }
 0x105   : > { %1574 = vmatprep.subr.bf16.mxu0 %v6060_v52  ;;  %1720 = vmatprep.subr.bf16.mxu1 %v6063_v53  ;;  %v452_v62 = vpop.f32.mrb[9].mxu0  ;;  %v6094_v50 = vld [vmem:[%s8831_s2 + $0x3e8] ss:$20 sps:$4 sm:$0xff]   ;;  %v6097_v52 = vld [vmem:[%s8831_s2 + $0x3f0] ss:$20 sps:$4 sm:$0xff]  }
 0x106   : > { %v454_v2 = vpop.f32.mrb[10].mxu0  ;;  %v523_v11 = vpop.f32.mrb[8].mxu1  ;;  %v6102_v53 = vld [vmem:[%s8831_s2 + $0x414] ss:$20 sps:$4 sm:$0xff]  }
 0x107   : > { %v6802_v4 = vpack.c.bf16 %v454_v2, %v450_v58  ;;  %v456_v5 = vpop.f32.mrb[11].mxu0  ;;  %v525_v12 = vpop.f32.mrb[9].mxu1  ;;  %v6111_v58 = vld [vmem:[%s8831_s2 + $0x444] ss:$20 sps:$4 sm:$0xff]  }
 0x108   : > { %1575 = vmatpush1.bf16.msra.mxu0 %v6058_v56  ;;  %1721 = vmatpush1.bf16.msra.mxu1 %v6061_v57  ;;  %v6810_v8 = vpack.c.bf16 %v456_v5, %v452_v62  ;;  %v527_v16 = vpop.f32.mrb[10].mxu1  ;;  %v6103_v56 = vld [vmem:[%s8831_s2 + $0x418] ss:$20 sps:$4 sm:$0xff]   ;;  %v6108_v57 = vld [vmem:[%s8831_s2 + $0x43c] ss:$20 sps:$4 sm:$0xff]  }
 0x109   : > { %1576 = vmatprep.subr.bf16.mxu0 %v6066_v60  ;;  %1722 = vmatprep.subr.bf16.mxu1 %v6069_v61  ;;  %v6834_v20 = vpack.c.bf16 %v527_v16, %v523_v11  ;;  %v529_v21 = vpop.f32.mrb[11].mxu1  ;;  %v6109_v60 = vld [vmem:[%s8831_s2 + $0x440] ss:$20 sps:$4 sm:$0xff]   ;;  %v6112_v61 = vld [vmem:[%s8831_s2 + $0x150] ss:$20 sps:$4 sm:$0xff]  }
 0x10a   : > { %1547 = vmatprep.mubr.bf16.mxu0 %v6810_v8  ;;  %1693 = vmatprep.mubr.bf16.mxu1 %v6810_v8  ;;  %v6836_v23 = vpack.c.bf16 %v529_v21, %v525_v12  ;;  %v6113_v62 = vld [vmem:[%s8831_s2 + $0x10] ss:$20 sps:$4 sm:$0xff]   ;;  %v6115_v2 = vld [vmem:[%s8831_s2 + $0x178] ss:$20 sps:$4 sm:$0xff]   ;;  %v6121_v11 = vld [vmem:[%s8831_s2 + $0x1c8] ss:$20 sps:$4 sm:$0xff]  }
 0x10b   : > { %1548 = vmatmul.mubr.bf16.gmra.mrb[24].mxu0 %v6802_v4  ;;  %1694 = vmatmul.mubr.bf16.gmra.mrb[24].mxu1 %v6802_v4  ;;  %v6116_v5 = vld [vmem:[%s8831_s2 + $0x38] ss:$20 sps:$4 sm:$0xff]   ;;  %v6122_v12 = vld [vmem:[%s8831_s2 + $0x88] ss:$20 sps:$4 sm:$0xff]   ;;  %v6126_v16 = vld [vmem:[%s8831_s2 + $0x330] ss:$20 sps:$4 sm:$0xff]  }
 0x10c   : > { %1577 = vmatpush1.bf16.msra.mxu0 %v6064_v6  ;;  %1723 = vmatpush1.bf16.msra.mxu1 %v6067_v7  ;;  %v460_v15 = vpop.f32.mrb[12].mxu0  ;;  %v6117_v6 = vld [vmem:[%s8831_s2 + $0x2b8] ss:$20 sps:$4 sm:$0xff]   ;;  %v6118_v7 = vld [vmem:[%s8831_s2 + $0x1a0] ss:$20 sps:$4 sm:$0xff]  }
 0x10d   : > { %1578 = vmatprep.subr.bf16.mxu0 %v6072_v9  ;;  %1724 = vmatprep.subr.bf16.mxu1 %v6075_v10  ;;  %v462_v19 = vpop.f32.mrb[13].mxu0  ;;  %v6119_v9 = vld [vmem:[%s8831_s2 + $0x60] ss:$20 sps:$4 sm:$0xff]  }
 0x10e   : > { %v464_v22 = vpop.f32.mrb[14].mxu0  ;;  %v533_v33 = vpop.f32.mrb[12].mxu1  ;;  %v6120_v10 = vld [vmem:[%s8831_s2 + $0x2e0] ss:$20 sps:$4 sm:$0xff]  }
 0x10f   : > { %v6838_v24 = vpack.c.bf16 %v464_v22, %v460_v15  ;;  %v466_v25 = vpop.f32.mrb[15].mxu0  ;;  %v535_v34 = vpop.f32.mrb[13].mxu1  ;;  %v6125_v15 = vld [vmem:[%s8831_s2 + $0xb0] ss:$20 sps:$4 sm:$0xff]   ;;  %v6130_v21 = vld [vmem:[%s8831_s2 + $0x240] ss:$20 sps:$4 sm:$0xff]  }
 0x110   : > { %1579 = vmatpush1.bf16.msra.mxu0 %v6070_v13  ;;  %1725 = vmatpush1.bf16.msra.mxu1 %v6073_v14  ;;  %v6846_v30 = vpack.c.bf16 %v466_v25, %v462_v19  ;;  %v537_v37 = vpop.f32.mrb[14].mxu1  ;;  %v6123_v13 = vld [vmem:[%s8831_s2 + $0x308] ss:$20 sps:$4 sm:$0xff]   ;;  %v6124_v14 = vld [vmem:[%s8831_s2 + $0x1f0] ss:$20 sps:$4 sm:$0xff]  }
 0x111   : > { %1580 = vmatprep.subr.bf16.mxu0 %v6078_v17  ;;  %1726 = vmatprep.subr.bf16.mxu1 %v6081_v18  ;;  %v6870_v40 = vpack.c.bf16 %v537_v37, %v533_v33  ;;  %v539_v41 = vpop.f32.mrb[15].mxu1  ;;  %v6127_v17 = vld [vmem:[%s8831_s2 + $0x218] ss:$20 sps:$4 sm:$0xff]   ;;  %v6131_v22 = vld [vmem:[%s8831_s2 + $0x100] ss:$20 sps:$4 sm:$0xff]  }
 0x112   : > { %1557 = vmatprep.mubr.bf16.mxu0 %v6846_v30  ;;  %1703 = vmatprep.mubr.bf16.mxu1 %v6846_v30  ;;  %v6876_v42 = vpack.c.bf16 %v539_v41, %v535_v34  ;;  %v6128_v18 = vld [vmem:[%s8831_s2 + $0xd8] ss:$20 sps:$4 sm:$0xff]   ;;  %v6132_v25 = vld [vmem:[%s8831_s2 + $0x380] ss:$20 sps:$4 sm:$0xff]  }
 0x113   : > { %1558 = vmatmul.mubr.bf16.gmra.mrb[28].mxu0 %v6838_v24  ;;  %1704 = vmatmul.mubr.bf16.gmra.mrb[28].mxu1 %v6838_v24  ;;  %v6129_v19 = vld [vmem:[%s8831_s2 + $0x358] ss:$20 sps:$4 sm:$0xff]  }
 0x114   : > { %1581 = vmatpush1.bf16.msra.mxu0 %v6076_v26  ;;  %1727 = vmatpush1.bf16.msra.mxu1 %v6079_v28  ;;  %v6133_v26 = vld [vmem:[%s8831_s2 + $0x268] ss:$20 sps:$4 sm:$0xff]  }
 0x115   : > { %1582 = vmatprep.subr.bf16.mxu0 %v6084_v31  ;;  %1728 = vmatprep.subr.bf16.mxu1 %v6087_v32  ;;  %v6134_v28 = vld [vmem:[%s8831_s2 + $0x128] ss:$20 sps:$4 sm:$0xff]   ;;  %v6138_v32 = vld [vmem:[%s8831_s2 + $0x420] ss:$20 sps:$4 sm:$0xff]  }
 0x116   : > { %5082 = vmatprep.mubr.msk.bf16.mxu0 %vm8836_vm0, %v6764_v46  ;;  %5086 = vmatprep.mubr.msk.bf16.mxu1 %vm8836_vm0, %v6764_v46  ;;  %v6135_v31 = vld [vmem:[%s8831_s2 + $0x3a8] ss:$20 sps:$4 sm:$0xff]  }
 0x118   : > { %1583 = vmatpush1.bf16.msra.mxu0 %v6082_v35  ;;  %1729 = vmatpush1.bf16.msra.mxu1 %v6085_v36 }
 0x119   : > { %1584 = vmatprep.subr.bf16.mxu0 %v6090_v38  ;;  %1730 = vmatprep.subr.bf16.mxu1 %v6093_v39 }
 0x11c   : > { %1585 = vmatpush1.bf16.msra.mxu0 %v6088_v44  ;;  %1731 = vmatpush1.bf16.msra.mxu1 %v6091_v45 }
 0x11d   : > { %1586 = vmatprep.subr.bf16.mxu0 %v6096_v48  ;;  %1732 = vmatprep.subr.bf16.mxu1 %v6099_v49 }
 0x120   : > { %1587 = vmatpush1.bf16.msra.mxu0 %v6094_v50  ;;  %1733 = vmatpush1.bf16.msra.mxu1 %v6097_v52 }
 0x121   : > { %1588 = vmatprep.subr.bf16.mxu0 %v6102_v53  ;;  %1734 = vmatprep.subr.bf16.mxu1 %v6105_v54 }
 0x124   : > { %1589 = vmatpush1.bf16.msra.mxu0 %v6100_v55  ;;  %1735 = vmatpush1.bf16.msra.mxu1 %v6103_v56 }
 0x125   : > { %1590 = vmatprep.subr.bf16.mxu0 %v6108_v57  ;;  %1736 = vmatprep.subr.bf16.mxu1 %v6111_v58 }
 0x128   : > { %1591 = vmatpush1.bf16.msra.mxu0 %v6106_v59  ;;  %1737 = vmatpush1.bf16.msra.mxu1 %v6109_v60 }
 0x129   : > { %5343 = vmatprep.subr.bf16.mxu0 %v6112_v61  ;;  %1852 = vmatprep.subr.bf16.mxu1 %v6436_v0 }
 0x12b   : > { %1601 = vmatmul.mubr.bf16.vlgmr.msra.gmra.mrb[16].mxu0 %v6762_v43  ;;  %1747 = vmatmul.mubr.bf16.vlgmr.msra.gmra.mrb[16].mxu1 %v6762_v43 }
 0x12c   : > { %5344 = vmatpush3.bf16.msra.mxu0 %v6113_v62  ;;  %1853 = vmatpush1.bf16.msra.mxu1 %v6114_v1 }
 0x12d   : > { %5083 = vmatprep.mubr.msk.bf16.mxu0 %vm8836_vm0, %v6800_v3  ;;  %5087 = vmatprep.mubr.msk.bf16.mxu1 %vm8836_vm0, %v6800_v3 }
 0x12e   : > { %5345 = vmatprep.subr.bf16.mxu0 %v6115_v2  ;;  %1854 = vmatprep.subr.bf16.mxu1 %v6436_v0 }
 0x130   : > { %5346 = vmatpush3.bf16.msra.mxu0 %v6116_v5  ;;  %1855 = vmatpush1.bf16.msra.mxu1 %v6117_v6 }
 0x131   : > { %5347 = vmatprep.subr.bf16.mxu0 %v6118_v7  ;;  %1856 = vmatprep.subr.bf16.mxu1 %v6436_v0 }
 0x133   : > { %1611 = vmatmul.mubr.bf16.gmra.mrb[20].mxu0 %v6798_v63  ;;  %1757 = vmatmul.mubr.bf16.gmra.mrb[20].mxu1 %v6798_v63 }
 0x134   : > { %5348 = vmatpush3.bf16.msra.mxu0 %v6119_v9  ;;  %1857 = vmatpush1.bf16.msra.mxu1 %v6120_v10 }
 0x135   : > { %5084 = vmatprep.mubr.msk.bf16.mxu0 %vm8836_vm0, %v6836_v23  ;;  %5088 = vmatprep.mubr.msk.bf16.mxu1 %vm8836_vm0, %v6836_v23 }
 0x136   : > { %5349 = vmatprep.subr.bf16.mxu0 %v6121_v11  ;;  %1858 = vmatprep.subr.bf16.mxu1 %v6436_v0 }
 0x138   : > { %5350 = vmatpush3.bf16.msra.mxu0 %v6122_v12  ;;  %1859 = vmatpush1.bf16.msra.mxu1 %v6123_v13 }
 0x139   : > { %5351 = vmatprep.subr.bf16.mxu0 %v6124_v14  ;;  %1860 = vmatprep.subr.bf16.mxu1 %v6436_v0 }
 0x13b   : > { %1621 = vmatmul.mubr.bf16.gmra.mrb[24].mxu0 %v6834_v20  ;;  %1767 = vmatmul.mubr.bf16.gmra.mrb[24].mxu1 %v6834_v20 }
 0x13c   : > { %5352 = vmatpush3.bf16.msra.mxu0 %v6125_v15  ;;  %1861 = vmatpush1.bf16.msra.mxu1 %v6126_v16 }
 0x13d   : > { %5085 = vmatprep.mubr.msk.bf16.mxu0 %vm8836_vm0, %v6876_v42  ;;  %5089 = vmatprep.mubr.msk.bf16.mxu1 %vm8836_vm0, %v6876_v42 }
 0x13e   : > { %5353 = vmatprep.subr.bf16.mxu0 %v6127_v17  ;;  %1862 = vmatprep.subr.bf16.mxu1 %v6436_v0 }
 0x140   : > { %5354 = vmatpush3.bf16.msra.mxu0 %v6128_v18  ;;  %1863 = vmatpush1.bf16.msra.mxu1 %v6129_v19 }
 0x141   : > { %5355 = vmatprep.subr.bf16.mxu0 %v6130_v21  ;;  %1864 = vmatprep.subr.bf16.mxu1 %v6436_v0 }
 0x143   : > { %1631 = vmatmul.mubr.bf16.gmra.mrb[28].mxu0 %v6870_v40  ;;  %1777 = vmatmul.mubr.bf16.gmra.mrb[28].mxu1 %v6870_v40 }
 0x144   : > { %5356 = vmatpush3.bf16.msra.mxu0 %v6131_v22  ;;  %1819 = vmatprep.mubr.bf16.mxu0 %v6732_v29  ;;  %v6136_v29 = vld [vmem:[%s8831_s2 + $0x3d0] ss:$20 sps:$4 sm:$0xff]  }
 0x145   : > { %1865 = vmatpush1.bf16.msra.mxu1 %v6132_v25  ;;  %5090 = vmatprep.mubr.msk.bf16.mxu1 %vm8836_vm0, %v6764_v46  ;;  %v6137_v46 = vld [vmem:[%s8831_s2 + $0x3f8] ss:$20 sps:$4 sm:$0xff]  }
 0x146   : > { %5357 = vmatprep.subr.bf16.mxu0 %v6133_v26  ;;  %1866 = vmatprep.subr.bf16.mxu1 %v6436_v0 }
 0x148   : > { %5358 = vmatpush3.bf16.msra.mxu0 %v6134_v28 }
 0x149   : > { %1867 = vmatpush1.bf16.msra.mxu1 %v6135_v31 }
 0x14a   : > { %1868 = vmatprep.subr.bf16.mxu1 %v6436_v0 }
 0x14b   : > { %1820 = vmatmul.mubr.bf16.vlgmr.msra.gmra.mrb[32].mxu0 %v6730_v27  ;;  %v6139_v27 = vld [vmem:[%s8831_s2 + $0x448] ss:$20 sps:$4 sm:$0xff]  }
 0x14c   : > { %1827 = vmatprep.mubr.bf16.mxu0 %v6774_v51  ;;  %v726_v51 = vld [vmem:[%s8834_s5] ss:$8 sm:$0xf] }
 0x14d   : > { %1869 = vmatpush1.bf16.msra.mxu1 %v6136_v29 }
 0x14e   : > { %1870 = vmatprep.subr.bf16.mxu1 %v6436_v0 }
 0x151   : > { %1871 = vmatpush1.bf16.msra.mxu1 %v6137_v46 }
 0x152   : > { %1872 = vmatprep.subr.bf16.mxu1 %v6436_v0 }
 0x153   : > { %1828 = vmatmul.mubr.bf16.gmra.mrb[36].mxu0 %v6766_v47 }
 0x154   : > { %1835 = vmatprep.mubr.bf16.mxu0 %v6810_v8 }
 0x155   : > { %1873 = vmatpush1.bf16.msra.mxu1 %v6138_v32 }
 0x156   : > { %1874 = vmatprep.subr.bf16.mxu1 %v6436_v0 }
 0x159   : > { %1875 = vmatpush1.bf16.msra.mxu1 %v6139_v27 }
 0x15b   : > { %1836 = vmatmul.mubr.bf16.gmra.mrb[40].mxu0 %v6802_v4 }
 0x15c   : > { %1885 = vmatmul.mubr.bf16.vlgmr.msra.gmra.mrb[32].mxu1 %v6762_v43  ;;  %1843 = vmatprep.mubr.bf16.mxu0 %v6846_v30  ;;  %v730_v43 = vlaneseq }
 0x15d   : > { %5091 = vmatprep.mubr.msk.bf16.mxu1 %vm8836_vm0, %v6800_v3 }
 0x15e   : > { %v7059_v47 = vshrl.u32 %v730_v43, 7 }
 0x160   : > { %v732_v4 = vsub.s32 0, %v7059_v47  ;;  %v740_v8 = vsub.s32 2, %v7059_v47 }
 0x163   : > { %1844 = vmatmul.mubr.bf16.gmra.mrb[44].mxu0 %v6838_v24 }
 0x164   : > { %1893 = vmatmul.mubr.bf16.gmra.mrb[36].mxu1 %v6798_v63  ;;  %2009 = vmatprep.mubr.bf16.mxu0 %v6436_v0  ;;  %v727_v63 = vld [vmem:[%s8834_s5] ss:$8 sm:$0x10] }
 0x165   : > { %5092 = vmatprep.mubr.msk.bf16.mxu1 %vm8836_vm0, %v6836_v23  ;;  %v7067_v3 = vor.u32 %v727_v63, %v726_v51  ;;  %v744_v23 = vsub.s32 3, %v7059_v47 }
 0x167   : > { %v7076_v24 = vrot.slane %v7067_v3, %v732_v4  ;;  %v7081_v30 = vrot.slane %v7067_v3, %v740_v8  ;;  %v7091_v34 = vrot.slane %v7067_v3, %v744_v23 }
 0x16c   : > { %1901 = vmatmul.mubr.bf16.gmra.mrb[40].mxu1 %v6834_v20  ;;  %v736_v20 = vsub.s32 1, %v7059_v47 }
 0x16d   : > { %5093 = vmatprep.mubr.msk.bf16.mxu1 %vm8836_vm0, %v6876_v42 }
 0x16e   : > { %v7086_v33 = vrot.slane %v7067_v3, %v736_v20 }
 0x174   : > { %1909 = vmatmul.mubr.bf16.gmra.mrb[44].mxu1 %v6870_v40 }
 0x175   : > { %2082 = vmatprep.mubr.bf16.mxu1 %v6436_v0 }
 0x1fe   : > { %v1602_v35 = vpop.f32.mrb[16].mxu0  ;;  %v1748_v36 = vpop.f32.mrb[16].mxu1 }
 0x1ff   : > { %v5747_v37 = vadd.f32 %v1602_v35, %v7076_v24  ;;  %v5763_v38 = vadd.f32 %v1748_v36, %v7081_v30  ;;  %v1604_v39 = vpop.f32.mrb[17].mxu0  ;;  %v1750_v40 = vpop.f32.mrb[17].mxu1 }
 0x200   : > { %v5748_v41 = vadd.f32 %v1604_v39, %v7086_v33  ;;  %v5764_v42 = vadd.f32 %v1750_v40, %v7091_v34  ;;  %v1606_v44 = vpop.f32.mrb[18].mxu0  ;;  %v1752_v45 = vpop.f32.mrb[18].mxu1 }
 0x201   : > { %v5749_v48 = vadd.f32 %v1606_v44, %v7076_v24  ;;  %v5765_v49 = vadd.f32 %v1752_v45, %v7081_v30  ;;  %v1608_v50 = vpop.f32.mrb[19].mxu0  ;;  %v1754_v52 = vpop.f32.mrb[19].mxu1  ;;  %v1917_v55 = vmax.f32 %v5747_v37, 0.0  ;;  %v1919_v56 = vmax.f32 %v5763_v38, 0.0 }
 0x202   : > { %v5750_v53 = vadd.f32 %v1608_v50, %v7086_v33  ;;  %v5766_v54 = vadd.f32 %v1754_v52, %v7091_v34  ;;  %v1918_v59 = vmax.f32 %v5748_v41, 0.0  ;;  %v1920_v60 = vmax.f32 %v5764_v42, 0.0 }
 0x203   : > { %v1922_v57 = vmax.f32 %v5749_v48, 0.0  ;;  %v1924_v58 = vmax.f32 %v5765_v49, 0.0 }
 0x204   : > { %v1923_v61 = vmax.f32 %v5750_v53, 0.0  ;;  %v1925_v62 = vmax.f32 %v5766_v54, 0.0 }
 0x205   : > { %v1957_v1 = vpack.c.bf16 %v1922_v57, %v1917_v55  ;;  %v1959_v2 = vpack.c.bf16 %v1924_v58, %v1919_v56 }
 0x206   : > { %v1958_v5 = vpack.c.bf16 %v1923_v61, %v1918_v59  ;;  %v1960_v6 = vpack.c.bf16 %v1925_v62, %v1920_v60  ;;  %v1612_v7 = vpop.f32.mrb[20].mxu0  ;;  %v1758_v9 = vpop.f32.mrb[20].mxu1 }
 0x207   : > { %v5751_v10 = vadd.f32 %v1612_v7, %v7076_v24  ;;  %v5767_v11 = vadd.f32 %v1758_v9, %v7081_v30  ;;  %v1614_v12 = vpop.f32.mrb[21].mxu0  ;;  %v1760_v13 = vpop.f32.mrb[21].mxu1 }
 0x208   : > { %v5752_v14 = vadd.f32 %v1614_v12, %v7086_v33  ;;  %v5768_v15 = vadd.f32 %v1760_v13, %v7091_v34  ;;  %v1616_v16 = vpop.f32.mrb[22].mxu0  ;;  %v1762_v17 = vpop.f32.mrb[22].mxu1  ;;  %1977 = vmatprep.subr.bf16.mxu0 %v1958_v5  ;;  %2050 = vmatprep.subr.bf16.mxu1 %v1960_v6 }
 0x209   : > { %v5753_v18 = vadd.f32 %v1616_v16, %v7076_v24  ;;  %v5769_v19 = vadd.f32 %v1762_v17, %v7081_v30  ;;  %v1618_v21 = vpop.f32.mrb[23].mxu0  ;;  %v1764_v22 = vpop.f32.mrb[23].mxu1  ;;  %1978 = vmatpush1.bf16.msra.mxu0 %v1957_v1  ;;  %2051 = vmatpush1.bf16.msra.mxu1 %v1959_v2  ;;  %v1927_v28 = vmax.f32 %v5751_v10, 0.0  ;;  %v1929_v31 = vmax.f32 %v5767_v11, 0.0 }
 0x20a   : > { %v5754_v25 = vadd.f32 %v1618_v21, %v7086_v33  ;;  %v5770_v26 = vadd.f32 %v1764_v22, %v7091_v34  ;;  %v1928_v32 = vmax.f32 %v5752_v14, 0.0  ;;  %v1930_v27 = vmax.f32 %v5768_v15, 0.0 }
 0x20b   : > { %v1932_v29 = vmax.f32 %v5753_v18, 0.0  ;;  %v1934_v46 = vmax.f32 %v5769_v19, 0.0 }
 0x20c   : > { %v1933_v51 = vmax.f32 %v5754_v25, 0.0  ;;  %v1935_v63 = vmax.f32 %v5770_v26, 0.0 }
 0x20d   : > { %v1962_v35 = vpack.c.bf16 %v1932_v29, %v1927_v28  ;;  %v1964_v36 = vpack.c.bf16 %v1934_v46, %v1929_v31 }
 0x20e   : > { %v1963_v37 = vpack.c.bf16 %v1933_v51, %v1928_v32  ;;  %v1965_v38 = vpack.c.bf16 %v1935_v63, %v1930_v27  ;;  %v1622_v39 = vpop.f32.mrb[24].mxu0  ;;  %v1768_v40 = vpop.f32.mrb[24].mxu1 }
 0x20f   : > { %v5755_v41 = vadd.f32 %v1622_v39, %v7076_v24  ;;  %v5771_v42 = vadd.f32 %v1768_v40, %v7081_v30  ;;  %v1624_v44 = vpop.f32.mrb[25].mxu0  ;;  %v1770_v45 = vpop.f32.mrb[25].mxu1 }
 0x210   : > { %v5756_v48 = vadd.f32 %v1624_v44, %v7086_v33  ;;  %v5772_v49 = vadd.f32 %v1770_v45, %v7091_v34  ;;  %v1626_v50 = vpop.f32.mrb[26].mxu0  ;;  %v1772_v52 = vpop.f32.mrb[26].mxu1  ;;  %1979 = vmatprep.subr.bf16.mxu0 %v1963_v37  ;;  %2052 = vmatprep.subr.bf16.mxu1 %v1965_v38 }
 0x211   : > { %v5757_v53 = vadd.f32 %v1626_v50, %v7076_v24  ;;  %v5773_v54 = vadd.f32 %v1772_v52, %v7081_v30  ;;  %v1628_v55 = vpop.f32.mrb[27].mxu0  ;;  %v1774_v56 = vpop.f32.mrb[27].mxu1  ;;  %1980 = vmatpush1.bf16.msra.mxu0 %v1962_v35  ;;  %2053 = vmatpush1.bf16.msra.mxu1 %v1964_v36  ;;  %v1937_v59 = vmax.f32 %v5755_v41, 0.0  ;;  %v1939_v60 = vmax.f32 %v5771_v42, 0.0  ;;  %v6142_v42 = vld [vmem:[%s8832_s3 + $0x4] ss:$20 sps:$4 sm:$0xff]  }
 0x212   : > { %v5758_v57 = vadd.f32 %v1628_v55, %v7086_v33  ;;  %v5774_v58 = vadd.f32 %v1774_v56, %v7091_v34  ;;  %v1938_v1 = vmax.f32 %v5756_v48, 0.0  ;;  %v1940_v2 = vmax.f32 %v5772_v49, 0.0  ;;  %v6140_v49 = vld [vmem:[%s8832_s3] ss:$20 sps:$4 sm:$0xff]   ;;  %v6146_v55 = vld [vmem:[%s8832_s3 + $0x28] ss:$20 sps:$4 sm:$0xff]  }
 0x213   : > { %v1942_v61 = vmax.f32 %v5757_v53, 0.0  ;;  %v1944_v62 = vmax.f32 %v5773_v54, 0.0  ;;  %v6148_v50 = vld [vmem:[%s8832_s3 + $0x2c] ss:$20 sps:$4 sm:$0xff]   ;;  %v748_v54 = vsub.s32 4, %v7059_v47 }
 0x214   : > { %v1943_v5 = vmax.f32 %v5758_v57, 0.0  ;;  %v1945_v6 = vmax.f32 %v5774_v58, 0.0  ;;  %v7137_v52 = vld [vmem:[%s8829_s0] sm:$0xff]   ;;  %v6154_v57 = vld [vmem:[%s8832_s3 + $0x54] ss:$20 sps:$4 sm:$0xff]  }
 0x215   : > { %v1967_v7 = vpack.c.bf16 %v1942_v61, %v1937_v59  ;;  %v1969_v9 = vpack.c.bf16 %v1944_v62, %v1939_v60  ;;  %v7155_v62 = vrot.slane %v7067_v3, %v748_v54 }
 0x216   : > { %v1968_v10 = vpack.c.bf16 %v1943_v5, %v1938_v1  ;;  %v1970_v11 = vpack.c.bf16 %v1945_v6, %v1940_v2  ;;  %v1632_v12 = vpop.f32.mrb[28].mxu0  ;;  %v1778_v13 = vpop.f32.mrb[28].mxu1  ;;  %v6152_v1 = vld [vmem:[%s8832_s3 + $0x50] ss:$20 sps:$4 sm:$0xff]   ;;  %v7166_v5 = vld [vmem:[%s8829_s0 + $0x8] sm:$0xff]  }
 0x217   : > { %v5759_v14 = vadd.f32 %v1632_v12, %v7076_v24  ;;  %v5775_v15 = vadd.f32 %v1778_v13, %v7081_v30  ;;  %v1634_v16 = vpop.f32.mrb[29].mxu0  ;;  %v1780_v17 = vpop.f32.mrb[29].mxu1  ;;  %v6160_v2 = vld [vmem:[%s8832_s3 + $0x7c] ss:$20 sps:$4 sm:$0xff]  }
 0x218   : > { %v5760_v18 = vadd.f32 %v1634_v16, %v7086_v33  ;;  %v5776_v19 = vadd.f32 %v1780_v17, %v7091_v34  ;;  %v1636_v21 = vpop.f32.mrb[30].mxu0  ;;  %v1782_v22 = vpop.f32.mrb[30].mxu1  ;;  %1981 = vmatprep.subr.bf16.mxu0 %v1968_v10  ;;  %2054 = vmatprep.subr.bf16.mxu1 %v1970_v11  ;;  %v6166_v11 = vld [vmem:[%s8832_s3 + $0xa4] ss:$20 sps:$4 sm:$0xff]  }
 0x219   : > { %v5761_v25 = vadd.f32 %v1636_v21, %v7076_v24  ;;  %v5777_v26 = vadd.f32 %v1782_v22, %v7081_v30  ;;  %v1638_v28 = vpop.f32.mrb[31].mxu0  ;;  %v1784_v31 = vpop.f32.mrb[31].mxu1  ;;  %1982 = vmatpush1.bf16.msra.mxu0 %v1967_v7  ;;  %2055 = vmatpush1.bf16.msra.mxu1 %v1969_v9  ;;  %v1947_v32 = vmax.f32 %v5759_v14, 0.0  ;;  %v1949_v27 = vmax.f32 %v5775_v15, 0.0  ;;  %v6158_v7 = vld [vmem:[%s8832_s3 + $0x78] ss:$20 sps:$4 sm:$0xff]  }
 0x21a   : > { %v5762_v29 = vadd.f32 %v1638_v28, %v7086_v33  ;;  %v5778_v46 = vadd.f32 %v1784_v31, %v7091_v34  ;;  %v1948_v35 = vmax.f32 %v5760_v18, 0.0  ;;  %v1950_v36 = vmax.f32 %v5776_v19, 0.0 }
 0x21b   : > { %v1952_v51 = vmax.f32 %v5761_v25, 0.0  ;;  %v1954_v63 = vmax.f32 %v5777_v26, 0.0  ;;  %v6164_v25 = vld [vmem:[%s8832_s3 + $0xa0] ss:$20 sps:$4 sm:$0xff]  }
 0x21c   : > { %v1953_v37 = vmax.f32 %v5762_v29, 0.0  ;;  %v1955_v38 = vmax.f32 %v5778_v46, 0.0  ;;  %v6172_v26 = vld [vmem:[%s8832_s3 + $0xcc] ss:$20 sps:$4 sm:$0xff]   ;;  %v7191_v29 = vld [vmem:[%s8829_s0 + $0x10] sm:$0xff]  }
 0x21d   : > { %v1972_v39 = vpack.c.bf16 %v1952_v51, %v1947_v32  ;;  %v1974_v24 = vpack.c.bf16 %v1954_v63, %v1949_v27  ;;  %v6170_v51 = vld [vmem:[%s8832_s3 + $0xc8] ss:$20 sps:$4 sm:$0xff]  }
 0x21e   : > { %v1973_v40 = vpack.c.bf16 %v1953_v37, %v1948_v35  ;;  %v1975_v30 = vpack.c.bf16 %v1955_v38, %v1950_v36  ;;  %v5359_v41 = vpop.f32.mrb[32].mxu0  ;;  %v6178_v36 = vld [vmem:[%s8832_s3 + $0xf4] ss:$20 sps:$4 sm:$0xff]  }
 0x21f   : > { %v5360_v33 = vpop.f32.mrb[33].mxu0 }
 0x220   : > { %v5361_v44 = vadd.f32 %v5360_v33, %v5359_v41  ;;  %v5362_v34 = vpop.f32.mrb[34].mxu0  ;;  %1983 = vmatprep.subr.bf16.mxu0 %v1973_v40  ;;  %2056 = vmatprep.subr.bf16.mxu1 %v1975_v30 }
 0x221   : > { %v5363_v45 = vpop.f32.mrb[35].mxu0  ;;  %1984 = vmatpush1.bf16.msra.mxu0 %v1972_v39  ;;  %2057 = vmatpush1.bf16.msra.mxu1 %v1974_v24 }
 0x222   : > { %v5364_v48 = vadd.f32 %v5363_v45, %v5362_v34  ;;  %3402 = vmatprep.subr.bf16.mxu1 %v6142_v42  ;;  %v1822_v6 = vadd.f32 %v5361_v44, %v7155_v62  ;;  %v6176_v34 = vld [vmem:[%s8832_s3 + $0xf0] ss:$20 sps:$4 sm:$0xff]  }
 0x223   : > { %v6184_v45 = vld [vmem:[%s8832_s3 + $0x11c] ss:$20 sps:$4 sm:$0xff]  }
 0x224   : > { %5094 = vmatmul.mubr.msk.bf16.vlgmr.msra.gmra.mrb[48].mxu0 %vm8836_vm0, %v7137_v52  ;;  %5098 = vmatmul.mubr.msk.bf16.vlgmr.msra.gmra.mrb[48].mxu1 %vm8836_vm0, %v7137_v52  ;;  %v1825_v16 = vadd.f32 %v5364_v48, %v7155_v62 }
 0x225   : > { %2019 = vmatprep.mubr.bf16.mxu0 %v6436_v0  ;;  %2092 = vmatprep.mubr.bf16.mxu1 %v6436_v0 }
 0x226   : > { %v5365_v53 = vpop.f32.mrb[36].mxu0  ;;  %3403 = vmatpush1.bf16.msra.mxu1 %v6140_v49 }
 0x227   : > { %v5366_v56 = vpop.f32.mrb[37].mxu0  ;;  %3404 = vmatprep.subr.bf16.mxu1 %v6148_v50  ;;  %v7216_v50 = vld [vmem:[%s8829_s0 + $0x18] sm:$0xff]  }
 0x228   : > { %v5367_v58 = vadd.f32 %v5366_v56, %v5365_v53  ;;  %v5368_v59 = vpop.f32.mrb[38].mxu0  ;;  %v6182_v56 = vld [vmem:[%s8832_s3 + $0x118] ss:$20 sps:$4 sm:$0xff]  }
 0x229   : > { %v5369_v60 = vpop.f32.mrb[39].mxu0 }
 0x22a   : > { %v5370_v61 = vadd.f32 %v5369_v60, %v5368_v59  ;;  %3405 = vmatpush1.bf16.msra.mxu1 %v6146_v55  ;;  %v1830_v27 = vadd.f32 %v5367_v58, %v7155_v62  ;;  %v6190_v58 = vld [vmem:[%s8832_s3 + $0x144] ss:$20 sps:$4 sm:$0xff]  }
 0x22b   : > { %3406 = vmatprep.subr.bf16.mxu1 %v6154_v57 }
 0x22c   : > { %5095 = vmatmul.mubr.msk.bf16.gmra.mrb[52].mxu0 %vm8836_vm0, %v7166_v5  ;;  %5099 = vmatmul.mubr.msk.bf16.gmra.mrb[52].mxu1 %vm8836_vm0, %v7166_v5  ;;  %v1833_v40 = vadd.f32 %v5370_v61, %v7155_v62 }
 0x22d   : > { %2029 = vmatprep.mubr.bf16.mxu0 %v6436_v0  ;;  %2102 = vmatprep.mubr.bf16.mxu1 %v6436_v0 }
 0x22e   : > { %v5371_v3 = vpop.f32.mrb[40].mxu0  ;;  %3407 = vmatpush1.bf16.msra.mxu1 %v6152_v1 }
 0x22f   : > { %v1886_v9 = vpop.f32.mrb[32].mxu1  ;;  %v5372_v10 = vpop.f32.mrb[41].mxu0  ;;  %3408 = vmatprep.subr.bf16.mxu1 %v6160_v2 }
 0x230   : > { %v1887_v12 = vadd.f32 %v1886_v9, %v1822_v6  ;;  %v5373_v13 = vadd.f32 %v5372_v10, %v5371_v3  ;;  %v1888_v14 = vpop.f32.mrb[33].mxu1  ;;  %v5374_v15 = vpop.f32.mrb[42].mxu0  ;;  %v6188_v3 = vld [vmem:[%s8832_s3 + $0x140] ss:$20 sps:$4 sm:$0xff]  }
 0x231   : > { %v1889_v17 = vpop.f32.mrb[34].mxu1  ;;  %v5375_v18 = vpop.f32.mrb[43].mxu0  ;;  %v6196_v6 = vld [vmem:[%s8832_s3 + $0x16c] ss:$20 sps:$4 sm:$0xff]   ;;  %v6202_v14 = vld [vmem:[%s8832_s3 + $0x194] ss:$20 sps:$4 sm:$0xff]  }
 0x232   : > { %v1890_v19 = vadd.f32 %v1889_v17, %v1825_v16  ;;  %v5376_v21 = vadd.f32 %v5375_v18, %v5374_v15  ;;  %v1891_v22 = vpop.f32.mrb[35].mxu1  ;;  %3409 = vmatpush1.bf16.msra.mxu1 %v6158_v7  ;;  %v1921_v28 = vmax.f32 %v1887_v12, 0.0  ;;  %v1838_v55 = vadd.f32 %v5373_v13, %v7155_v62  ;;  %v6194_v12 = vld [vmem:[%s8832_s3 + $0x168] ss:$20 sps:$4 sm:$0xff]  }
 0x233   : > { %3410 = vmatprep.subr.bf16.mxu1 %v6166_v11  ;;  %v6200_v22 = vld [vmem:[%s8832_s3 + $0x190] ss:$20 sps:$4 sm:$0xff]  }
 0x234   : > { %v1926_v31 = vmax.f32 %v1890_v19, 0.0  ;;  %5096 = vmatmul.mubr.msk.bf16.gmra.mrb[56].mxu0 %vm8836_vm0, %v7191_v29  ;;  %5100 = vmatmul.mubr.msk.bf16.gmra.mrb[56].mxu1 %vm8836_vm0, %v7191_v29  ;;  %v1841_v61 = vadd.f32 %v5376_v21, %v7155_v62 }
 0x235   : > { %2039 = vmatprep.mubr.bf16.mxu0 %v6436_v0  ;;  %2112 = vmatprep.mubr.bf16.mxu1 %v6436_v0 }
 0x236   : > { %v1961_v46 = vpack.c.bf16 %v1926_v31, %v1921_v28  ;;  %v5377_v32 = vpop.f32.mrb[44].mxu0  ;;  %3411 = vmatpush1.bf16.msra.mxu1 %v6164_v25  ;;  %v6208_v25 = vld [vmem:[%s8832_s3 + $0x1bc] ss:$20 sps:$4 sm:$0xff]  }
 0x237   : > { %v1894_v63 = vpop.f32.mrb[36].mxu1  ;;  %v5378_v35 = vpop.f32.mrb[45].mxu0  ;;  %3412 = vmatprep.subr.bf16.mxu1 %v6172_v26 }
 0x238   : > { %v1895_v37 = vadd.f32 %v1894_v63, %v1830_v27  ;;  %v5379_v38 = vadd.f32 %v5378_v35, %v5377_v32  ;;  %v1896_v39 = vpop.f32.mrb[37].mxu1  ;;  %5607 = vmatprep.subr.bf16.mxu0 %v1961_v46  ;;  %v5380_v24 = vpop.f32.mrb[46].mxu0  ;;  %v6214_v32 = vld [vmem:[%s8832_s3 + $0x1e4] ss:$20 sps:$4 sm:$0xff]   ;;  %v6143_v27 = vld [vmem:[%s8832_s3 + $0x8] ss:$20 sps:$4 sm:$0xff]  }
 0x239   : > { %v1897_v30 = vpop.f32.mrb[38].mxu1  ;;  %5608 = vmatpush3.bf16.msra.mxu0 %v1961_v46  ;;  %v5381_v41 = vpop.f32.mrb[47].mxu0  ;;  %v6206_v46 = vld [vmem:[%s8832_s3 + $0x1b8] ss:$20 sps:$4 sm:$0xff]   ;;  %v6212_v63 = vld [vmem:[%s8832_s3 + $0x1e0] ss:$20 sps:$4 sm:$0xff]  }
 0x23a   : > { %v1898_v42 = vadd.f32 %v1897_v30, %v1833_v40  ;;  %v5382_v33 = vadd.f32 %v5381_v41, %v5380_v24  ;;  %v1899_v44 = vpop.f32.mrb[39].mxu1  ;;  %3413 = vmatpush1.bf16.msra.mxu1 %v6170_v51  ;;  %v1931_v48 = vmax.f32 %v1895_v37, 0.0  ;;  %v1846_v11 = vadd.f32 %v5379_v38, %v7155_v62  ;;  %v6151_v51 = vld [vmem:[%s8832_s3 + $0x34] ss:$20 sps:$4 sm:$0xff]   ;;  %v6220_v35 = vld [vmem:[%s8832_s3 + $0x20c] ss:$20 sps:$4 sm:$0xff]  }
 0x23b   : > { %3414 = vmatprep.subr.bf16.mxu1 %v6178_v36  ;;  %v6149_v36 = vld [vmem:[%s8832_s3 + $0x30] ss:$20 sps:$4 sm:$0xff]   ;;  %v6218_v38 = vld [vmem:[%s8832_s3 + $0x208] ss:$20 sps:$4 sm:$0xff]   ;;  %v6161_v40 = vld [vmem:[%s8832_s3 + $0x80] ss:$20 sps:$4 sm:$0xff]  }
 0x23c   : > { %v1936_v49 = vmax.f32 %v1898_v42, 0.0  ;;  %5097 = vmatmul.mubr.msk.bf16.gmra.mrb[60].mxu0 %vm8836_vm0, %v7216_v50  ;;  %5101 = vmatmul.mubr.msk.bf16.gmra.mrb[60].mxu1 %vm8836_vm0, %v7216_v50  ;;  %v1849_v17 = vadd.f32 %v5382_v33, %v7155_v62  ;;  %v6145_v62 = vld [vmem:[%s8832_s3 + $0xc] ss:$20 sps:$4 sm:$0xff]   ;;  %v6157_v37 = vld [vmem:[%s8832_s3 + $0x5c] ss:$20 sps:$4 sm:$0xff]  }
 0x23d   : > { %5615 = vmatprep.mubr.msk.bf16.mxu0 %vm8836_vm0, %v7137_v52  ;;  %v6163_v39 = vld [vmem:[%s8832_s3 + $0x84] ss:$20 sps:$4 sm:$0xff]   ;;  %v6169_v30 = vld [vmem:[%s8832_s3 + $0xac] ss:$20 sps:$4 sm:$0xff]   ;;  %v6167_v41 = vld [vmem:[%s8832_s3 + $0xa8] ss:$20 sps:$4 sm:$0xff]  }
 0x23e   : > { %v1966_v53 = vpack.c.bf16 %v1936_v49, %v1931_v48  ;;  %3415 = vmatpush1.bf16.msra.mxu1 %v6176_v34  ;;  %v6224_v24 = vld [vmem:[%s8832_s3 + $0x230] ss:$20 sps:$4 sm:$0xff]   ;;  %v6175_v42 = vld [vmem:[%s8832_s3 + $0xd4] ss:$20 sps:$4 sm:$0xff]   ;;  %v6179_v34 = vld [vmem:[%s8832_s3 + $0xf8] ss:$20 sps:$4 sm:$0xff]  }
 0x23f   : > { %v1902_v57 = vpop.f32.mrb[40].mxu1  ;;  %3416 = vmatprep.subr.bf16.mxu1 %v6184_v45  ;;  %v6173_v33 = vld [vmem:[%s8832_s3 + $0xd0] ss:$20 sps:$4 sm:$0xff]   ;;  %v6185_v48 = vld [vmem:[%s8832_s3 + $0x120] ss:$20 sps:$4 sm:$0xff]  }
 0x240   : > { %v1903_v59 = vadd.f32 %v1902_v57, %v1838_v55  ;;  %v1904_v60 = vpop.f32.mrb[41].mxu1  ;;  %5609 = vmatprep.subr.bf16.mxu0 %v1966_v53  ;;  %v6181_v44 = vld [vmem:[%s8832_s3 + $0xfc] ss:$20 sps:$4 sm:$0xff]   ;;  %v6187_v45 = vld [vmem:[%s8832_s3 + $0x124] ss:$20 sps:$4 sm:$0xff]  }
 0x241   : > { %v1905_v52 = vpop.f32.mrb[42].mxu1  ;;  %5610 = vmatpush3.bf16.msra.mxu0 %v1966_v53  ;;  %v6193_v49 = vld [vmem:[%s8832_s3 + $0x14c] ss:$20 sps:$4 sm:$0xff]   ;;  %v6199_v53 = vld [vmem:[%s8832_s3 + $0x174] ss:$20 sps:$4 sm:$0xff]  }
 0x242   : > { %v1906_v1 = vadd.f32 %v1905_v52, %v1841_v61  ;;  %v1907_v2 = vpop.f32.mrb[43].mxu1  ;;  %3417 = vmatpush1.bf16.msra.mxu1 %v6182_v56  ;;  %v1941_v7 = vmax.f32 %v1903_v59, 0.0  ;;  %v6197_v55 = vld [vmem:[%s8832_s3 + $0x170] ss:$20 sps:$4 sm:$0xff]   ;;  %v6230_v59 = vld [vmem:[%s8832_s3 + $0x258] ss:$20 sps:$4 sm:$0xff]  }
 0x243   : > { %3418 = vmatprep.subr.bf16.mxu1 %v6190_v58  ;;  %v6205_v56 = vld [vmem:[%s8832_s3 + $0x19c] ss:$20 sps:$4 sm:$0xff]   ;;  %v6203_v58 = vld [vmem:[%s8832_s3 + $0x198] ss:$20 sps:$4 sm:$0xff]   ;;  %v6209_v52 = vld [vmem:[%s8832_s3 + $0x1c0] ss:$20 sps:$4 sm:$0xff]  }
 0x244   : > { %v1946_v9 = vmax.f32 %v1906_v1, 0.0  ;;  %v6232_v57 = vld [vmem:[%s8832_s3 + $0x25c] ss:$20 sps:$4 sm:$0xff]   ;;  %v6211_v60 = vld [vmem:[%s8832_s3 + $0x1c4] ss:$20 sps:$4 sm:$0xff]  }
 0x245   : > { %v6238_v61 = vld [vmem:[%s8832_s3 + $0x284] ss:$20 sps:$4 sm:$0xff]   ;;  %v6217_v1 = vld [vmem:[%s8832_s3 + $0x1ec] ss:$20 sps:$4 sm:$0xff]   ;;  %v6215_v2 = vld [vmem:[%s8832_s3 + $0x1e8] ss:$20 sps:$4 sm:$0xff]  }
 0x246   : > { %v1971_v10 = vpack.c.bf16 %v1946_v9, %v1941_v7  ;;  %3419 = vmatpush1.bf16.msra.mxu1 %v6188_v3  ;;  %v6223_v3 = vld [vmem:[%s8832_s3 + $0x214] ss:$20 sps:$4 sm:$0xff]   ;;  %v6229_v7 = vld [vmem:[%s8832_s3 + $0x23c] ss:$20 sps:$4 sm:$0xff]   ;;  %v6227_v9 = vld [vmem:[%s8832_s3 + $0x238] ss:$20 sps:$4 sm:$0xff]  }
 0x247   : > { %v1910_v13 = vpop.f32.mrb[44].mxu1  ;;  %3420 = vmatprep.subr.bf16.mxu1 %v6196_v6  ;;  %v6221_v6 = vld [vmem:[%s8832_s3 + $0x210] ss:$20 sps:$4 sm:$0xff]  }
 0x248   : > { %v1911_v15 = vadd.f32 %v1910_v13, %v1846_v11  ;;  %v1912_v16 = vpop.f32.mrb[45].mxu1  ;;  %5611 = vmatprep.subr.bf16.mxu0 %v1971_v10  ;;  %v6233_v11 = vld [vmem:[%s8832_s3 + $0x260] ss:$20 sps:$4 sm:$0xff]  }
 0x249   : > { %v1913_v18 = vpop.f32.mrb[46].mxu1  ;;  %5612 = vmatpush3.bf16.msra.mxu0 %v1971_v10  ;;  %v6235_v10 = vld [vmem:[%s8832_s3 + $0x264] ss:$20 sps:$4 sm:$0xff]  }
 0x24a   : > { %v1914_v19 = vadd.f32 %v1913_v18, %v1849_v17  ;;  %v1915_v21 = vpop.f32.mrb[47].mxu1  ;;  %3421 = vmatpush1.bf16.msra.mxu1 %v6194_v12  ;;  %v1951_v26 = vmax.f32 %v1911_v15, 0.0  ;;  %v6241_v12 = vld [vmem:[%s8832_s3 + $0x28c] ss:$20 sps:$4 sm:$0xff]  }
 0x24b   : > { %3422 = vmatprep.subr.bf16.mxu1 %v6202_v14 }
 0x24c   : > { %v1956_v28 = vmax.f32 %v1914_v19, 0.0 }
 0x24e   : > { %v1976_v31 = vpack.c.bf16 %v1956_v28, %v1951_v26  ;;  %3423 = vmatpush1.bf16.msra.mxu1 %v6200_v22  ;;  %v6236_v28 = vld [vmem:[%s8832_s3 + $0x280] ss:$20 sps:$4 sm:$0xff]  }
 0x24f   : > { %3424 = vmatprep.subr.bf16.mxu1 %v6208_v25 }
 0x250   : > { %5613 = vmatprep.subr.bf16.mxu0 %v1976_v31 }
 0x251   : > { %5614 = vmatpush3.bf16.msra.mxu0 %v1976_v31  ;;  %v6239_v31 = vld [vmem:[%s8832_s3 + $0x288] ss:$20 sps:$4 sm:$0xff]  }
 0x252   : > { %3621 = vmatprep.subr.bf16.mxu0 %v6145_v62  ;;  %3425 = vmatpush1.bf16.msra.mxu1 %v6206_v46  ;;  %v6244_v46 = vld [vmem:[%s8832_s3 + $0x2ac] ss:$20 sps:$4 sm:$0xff]  }
 0x253   : > { %3426 = vmatprep.subr.bf16.mxu1 %v6214_v32  ;;  %v6247_v32 = vld [vmem:[%s8832_s3 + $0x2b4] ss:$20 sps:$4 sm:$0xff]  }
 0x254   : > { %5616 = vmatmul.mubr.msk.bf16.vlgmr.msra.gmra.mrb[64].mxu0 %vm8836_vm0, %v7166_v5  ;;  %v6226_v5 = vld [vmem:[%s8832_s3 + $0x234] ss:$20 sps:$4 sm:$0xff]  }
 0x255   : > { %5619 = vmatprep.mubr.msk.bf16.mxu0 %vm8836_vm0, %v7191_v29  ;;  %3622 = vmatpush1.bf16.msra.mxu0 %v6143_v27  ;;  %v6155_v29 = vld [vmem:[%s8832_s3 + $0x58] ss:$20 sps:$4 sm:$0xff]   ;;  %v6242_v27 = vld [vmem:[%s8832_s3 + $0x2a8] ss:$20 sps:$4 sm:$0xff]  }
 0x256   : > { %3623 = vmatprep.subr.bf16.mxu0 %v6151_v51  ;;  %3427 = vmatpush1.bf16.msra.mxu1 %v6212_v63  ;;  %v6245_v51 = vld [vmem:[%s8832_s3 + $0x2b0] ss:$20 sps:$4 sm:$0xff]  }
 0x257   : > { %3428 = vmatprep.subr.bf16.mxu1 %v6220_v35 }
 0x259   : > { %3624 = vmatpush1.bf16.msra.mxu0 %v6149_v36  ;;  %v6250_v36 = vld [vmem:[%s8832_s3 + $0x2d4] ss:$20 sps:$4 sm:$0xff]  }
 0x25a   : > { %3625 = vmatprep.subr.bf16.mxu0 %v6157_v37  ;;  %3429 = vmatpush1.bf16.msra.mxu1 %v6218_v38  ;;  %v6253_v37 = vld [vmem:[%s8832_s3 + $0x2dc] ss:$20 sps:$4 sm:$0xff]  }
 0x25b   : > { %3430 = vmatprep.subr.bf16.mxu1 %v6226_v5 }
 0x25c   : > { %5620 = vmatmul.mubr.msk.bf16.gmra.mrb[68].mxu0 %vm8836_vm0, %v7216_v50  ;;  %v6191_v50 = vld [vmem:[%s8832_s3 + $0x148] ss:$20 sps:$4 sm:$0xff]  }
 0x25d   : > { %3626 = vmatpush1.bf16.msra.mxu0 %v6155_v29 }
 0x25e   : > { %3627 = vmatprep.subr.bf16.mxu0 %v6163_v39  ;;  %3431 = vmatpush1.bf16.msra.mxu1 %v6224_v24 }
 0x25f   : > { %3432 = vmatprep.subr.bf16.mxu1 %v6232_v57  ;;  %v6265_v57 = vld [vmem:[%s8832_s3 + $0x32c] ss:$20 sps:$4 sm:$0xff]  }
 0x261   : > { %3628 = vmatpush1.bf16.msra.mxu0 %v6161_v40 }
 0x262   : > { %3629 = vmatprep.subr.bf16.mxu0 %v6169_v30  ;;  %3433 = vmatpush1.bf16.msra.mxu1 %v6230_v59 }
 0x263   : > { %3475 = vmatprep.subr.bf16.mxu1 %v6238_v61 }
 0x265   : > { %3630 = vmatpush1.bf16.msra.mxu0 %v6167_v41 }
 0x266   : > { %3631 = vmatprep.subr.bf16.mxu0 %v6175_v42  ;;  %v6248_v42 = vld [vmem:[%s8832_s3 + $0x2d0] ss:$20 sps:$4 sm:$0xff]  }
 0x269   : > { %3632 = vmatpush1.bf16.msra.mxu0 %v6173_v33  ;;  %v6251_v33 = vld [vmem:[%s8832_s3 + $0x2d8] ss:$20 sps:$4 sm:$0xff]  }
 0x26a   : > { %3633 = vmatprep.subr.bf16.mxu0 %v6181_v44 }
 0x26d   : > { %3634 = vmatpush1.bf16.msra.mxu0 %v6179_v34 }
 0x26e   : > { %3635 = vmatprep.subr.bf16.mxu0 %v6187_v45  ;;  %v6256_v45 = vld [vmem:[%s8832_s3 + $0x2fc] ss:$20 sps:$4 sm:$0xff]  }
 0x271   : > { %3636 = vmatpush1.bf16.msra.mxu0 %v6185_v48  ;;  %v6259_v48 = vld [vmem:[%s8832_s3 + $0x304] ss:$20 sps:$4 sm:$0xff]  }
 0x272   : > { %3637 = vmatprep.subr.bf16.mxu0 %v6193_v49  ;;  %v6254_v49 = vld [vmem:[%s8832_s3 + $0x2f8] ss:$20 sps:$4 sm:$0xff]  }
 0x275   : > { %3638 = vmatpush1.bf16.msra.mxu0 %v6191_v50  ;;  %v6257_v50 = vld [vmem:[%s8832_s3 + $0x300] ss:$20 sps:$4 sm:$0xff]  }
 0x276   : > { %3639 = vmatprep.subr.bf16.mxu0 %v6199_v53 }
 0x279   : > { %3640 = vmatpush1.bf16.msra.mxu0 %v6197_v55 }
 0x27a   : > { %3641 = vmatprep.subr.bf16.mxu0 %v6205_v56  ;;  %v6262_v56 = vld [vmem:[%s8832_s3 + $0x324] ss:$20 sps:$4 sm:$0xff]  }
 0x27d   : > { %3642 = vmatpush1.bf16.msra.mxu0 %v6203_v58 }
 0x27e   : > { %3643 = vmatprep.subr.bf16.mxu0 %v6211_v60 }
 0x281   : > { %3644 = vmatpush1.bf16.msra.mxu0 %v6209_v52 }
 0x282   : > { %3645 = vmatprep.subr.bf16.mxu0 %v6217_v1 }
 0x285   : > { %3646 = vmatpush1.bf16.msra.mxu0 %v6215_v2 }
 0x286   : > { %3647 = vmatprep.subr.bf16.mxu0 %v6223_v3 }
 0x289   : > { %3648 = vmatpush1.bf16.msra.mxu0 %v6221_v6  ;;  %v6260_v6 = vld [vmem:[%s8832_s3 + $0x320] ss:$20 sps:$4 sm:$0xff]  }
 0x28a   : > { %3649 = vmatprep.subr.bf16.mxu0 %v6229_v7  ;;  %v6263_v7 = vld [vmem:[%s8832_s3 + $0x328] ss:$20 sps:$4 sm:$0xff]  }
 0x28d   : > { %3650 = vmatpush1.bf16.msra.mxu0 %v6227_v9 }
 0x28e   : > { %3651 = vmatprep.subr.bf16.mxu0 %v6235_v10 }
 0x291   : > { %3652 = vmatpush1.bf16.msra.mxu0 %v6233_v11  ;;  %v6268_v11 = vld [vmem:[%s8832_s3 + $0x34c] ss:$20 sps:$4 sm:$0xff]  }
 0x292   : > { %3694 = vmatprep.subr.bf16.mxu0 %v6241_v12  ;;  %v6271_v12 = vld [vmem:[%s8832_s3 + $0x354] ss:$20 sps:$4 sm:$0xff]  }
 0x2f7   : > { %v2011_v13 = vpop.f32.mrb[48].mxu0  ;;  %v2084_v14 = vpop.f32.mrb[48].mxu1 }
 0x2f8   : > { %v2013_v15 = vpop.f32.mrb[49].mxu0  ;;  %v2086_v16 = vpop.f32.mrb[49].mxu1 }
 0x2f9   : > { %v2015_v17 = vpop.f32.mrb[50].mxu0  ;;  %v2088_v18 = vpop.f32.mrb[50].mxu1 }
 0x2fa   : > { %v7387_v19 = vpack.c.bf16 %v2015_v17, %v2011_v13  ;;  %v2017_v21 = vpop.f32.mrb[51].mxu0  ;;  %v7389_v22 = vpack.c.bf16 %v2088_v18, %v2084_v14  ;;  %v2090_v25 = vpop.f32.mrb[51].mxu1  ;;  %v6266_v13 = vld [vmem:[%s8832_s3 + $0x348] ss:$20 sps:$4 sm:$0xff]   ;;  %v6269_v14 = vld [vmem:[%s8832_s3 + $0x350] ss:$20 sps:$4 sm:$0xff]  }
 0x2fb   : > { %v7391_v26 = vpack.c.bf16 %v2017_v21, %v2013_v15  ;;  %v7399_v62 = vpack.c.bf16 %v2090_v25, %v2086_v16  ;;  %v6274_v17 = vld [vmem:[%s8832_s3 + $0x374] ss:$20 sps:$4 sm:$0xff]   ;;  %v6277_v18 = vld [vmem:[%s8832_s3 + $0x37c] ss:$20 sps:$4 sm:$0xff]  }
 0x2fd   : > { %3434 = vmatprep.mubr.bf16.mxu1 %v7391_v26  ;;  %3653 = vmatprep.mubr.bf16.mxu0 %v7391_v26 }
 0x2fe   : > { %3435 = vmatmul.mubr.bf16.vlgmr.msra.gmra.mrb[64].mxu1 %v7387_v19  ;;  %3654 = vmatmul.mubr.bf16.vlgmr.msra.gmra.mrb[72].mxu0 %v7387_v19 }
 0x2ff   : > { %3476 = vmatpush1.bf16.msra.mxu1 %v6236_v28  ;;  %3695 = vmatpush1.bf16.msra.mxu0 %v6239_v31  ;;  %v2021_v63 = vpop.f32.mrb[52].mxu0  ;;  %v2094_v35 = vpop.f32.mrb[52].mxu1 }
 0x300   : > { %3477 = vmatprep.subr.bf16.mxu1 %v6244_v46  ;;  %3696 = vmatprep.subr.bf16.mxu0 %v6247_v32  ;;  %v2023_v38 = vpop.f32.mrb[53].mxu0  ;;  %v2096_v5 = vpop.f32.mrb[53].mxu1 }
 0x301   : > { %v2025_v29 = vpop.f32.mrb[54].mxu0  ;;  %v2098_v39 = vpop.f32.mrb[54].mxu1 }
 0x302   : > { %v7423_v24 = vpack.c.bf16 %v2025_v29, %v2021_v63  ;;  %v2027_v40 = vpop.f32.mrb[55].mxu0  ;;  %v7425_v30 = vpack.c.bf16 %v2098_v39, %v2094_v35  ;;  %v2100_v41 = vpop.f32.mrb[55].mxu1  ;;  %v6272_v63 = vld [vmem:[%s8832_s3 + $0x370] ss:$20 sps:$4 sm:$0xff]   ;;  %v6275_v35 = vld [vmem:[%s8832_s3 + $0x378] ss:$20 sps:$4 sm:$0xff]  }
 0x303   : > { %3478 = vmatpush1.bf16.msra.mxu1 %v6242_v27  ;;  %3697 = vmatpush1.bf16.msra.mxu0 %v6245_v51  ;;  %v7433_v44 = vpack.c.bf16 %v2027_v40, %v2023_v38  ;;  %v7435_v34 = vpack.c.bf16 %v2100_v41, %v2096_v5  ;;  %v6280_v38 = vld [vmem:[%s8832_s3 + $0x39c] ss:$20 sps:$4 sm:$0xff]   ;;  %v6283_v5 = vld [vmem:[%s8832_s3 + $0x3a4] ss:$20 sps:$4 sm:$0xff]   ;;  %v6281_v39 = vld [vmem:[%s8832_s3 + $0x3a0] ss:$20 sps:$4 sm:$0xff]  }
 0x304   : > { %3479 = vmatprep.subr.bf16.mxu1 %v6250_v36  ;;  %3698 = vmatprep.subr.bf16.mxu0 %v6253_v37  ;;  %v6278_v29 = vld [vmem:[%s8832_s3 + $0x398] ss:$20 sps:$4 sm:$0xff]  }
 0x305   : > { %3444 = vmatprep.mubr.bf16.mxu1 %v7433_v44  ;;  %3663 = vmatprep.mubr.bf16.mxu0 %v7433_v44  ;;  %v6286_v40 = vld [vmem:[%s8832_s3 + $0x3c4] ss:$20 sps:$4 sm:$0xff]   ;;  %v6289_v41 = vld [vmem:[%s8832_s3 + $0x3cc] ss:$20 sps:$4 sm:$0xff]  }
 0x306   : > { %3445 = vmatmul.mubr.bf16.gmra.mrb[68].mxu1 %v7423_v24  ;;  %3664 = vmatmul.mubr.bf16.gmra.mrb[76].mxu0 %v7423_v24 }
 0x307   : > { %3480 = vmatpush1.bf16.msra.mxu1 %v6248_v42  ;;  %3699 = vmatpush1.bf16.msra.mxu0 %v6251_v33  ;;  %v2031_v53 = vpop.f32.mrb[56].mxu0  ;;  %v2104_v55 = vpop.f32.mrb[56].mxu1  ;;  %v6284_v42 = vld [vmem:[%s8832_s3 + $0x3c0] ss:$20 sps:$4 sm:$0xff]   ;;  %v6287_v33 = vld [vmem:[%s8832_s3 + $0x3c8] ss:$20 sps:$4 sm:$0xff]  }
 0x308   : > { %3481 = vmatprep.subr.bf16.mxu1 %v6256_v45  ;;  %3700 = vmatprep.subr.bf16.mxu0 %v6259_v48  ;;  %v2033_v58 = vpop.f32.mrb[57].mxu0  ;;  %v2106_v59 = vpop.f32.mrb[57].mxu1  ;;  %v6292_v45 = vld [vmem:[%s8832_s3 + $0x3ec] ss:$20 sps:$4 sm:$0xff]   ;;  %v6295_v48 = vld [vmem:[%s8832_s3 + $0x3f4] ss:$20 sps:$4 sm:$0xff]  }
 0x309   : > { %v2035_v60 = vpop.f32.mrb[58].mxu0  ;;  %v2108_v61 = vpop.f32.mrb[58].mxu1 }
 0x30a   : > { %v7459_v52 = vpack.c.bf16 %v2035_v60, %v2031_v53  ;;  %v2037_v1 = vpop.f32.mrb[59].mxu0  ;;  %v7461_v2 = vpack.c.bf16 %v2108_v61, %v2104_v55  ;;  %v2110_v3 = vpop.f32.mrb[59].mxu1  ;;  %v6298_v53 = vld [vmem:[%s8832_s3 + $0x414] ss:$20 sps:$4 sm:$0xff]   ;;  %v6301_v55 = vld [vmem:[%s8832_s3 + $0x41c] ss:$20 sps:$4 sm:$0xff]  }
 0x30b   : > { %3482 = vmatpush1.bf16.msra.mxu1 %v6254_v49  ;;  %3701 = vmatpush1.bf16.msra.mxu0 %v6257_v50  ;;  %v7469_v9 = vpack.c.bf16 %v2037_v1, %v2033_v58  ;;  %v7471_v10 = vpack.c.bf16 %v2110_v3, %v2106_v59  ;;  %v6290_v49 = vld [vmem:[%s8832_s3 + $0x3e8] ss:$20 sps:$4 sm:$0xff]   ;;  %v6293_v50 = vld [vmem:[%s8832_s3 + $0x3f0] ss:$20 sps:$4 sm:$0xff]   ;;  %v6302_v60 = vld [vmem:[%s8832_s3 + $0x438] ss:$20 sps:$4 sm:$0xff]  }
 0x30c   : > { %3483 = vmatprep.subr.bf16.mxu1 %v6262_v56  ;;  %3702 = vmatprep.subr.bf16.mxu0 %v6265_v57  ;;  %v6296_v56 = vld [vmem:[%s8832_s3 + $0x410] ss:$20 sps:$4 sm:$0xff]   ;;  %v6299_v57 = vld [vmem:[%s8832_s3 + $0x418] ss:$20 sps:$4 sm:$0xff]   ;;  %v6305_v61 = vld [vmem:[%s8832_s3 + $0x440] ss:$20 sps:$4 sm:$0xff]  }
 0x30d   : > { %3454 = vmatprep.mubr.bf16.mxu1 %v7469_v9  ;;  %3673 = vmatprep.mubr.bf16.mxu0 %v7469_v9  ;;  %v6304_v58 = vld [vmem:[%s8832_s3 + $0x43c] ss:$20 sps:$4 sm:$0xff]   ;;  %v6307_v59 = vld [vmem:[%s8832_s3 + $0x444] ss:$20 sps:$4 sm:$0xff]  }
 0x30e   : > { %3455 = vmatmul.mubr.bf16.gmra.mrb[72].mxu1 %v7459_v52  ;;  %3674 = vmatmul.mubr.bf16.gmra.mrb[80].mxu0 %v7459_v52  ;;  %v6310_v3 = vld [vmem:[%s8832_s3 + $0x464] ss:$20 sps:$4 sm:$0xff]  }
 0x30f   : > { %3484 = vmatpush1.bf16.msra.mxu1 %v6260_v6  ;;  %3703 = vmatpush1.bf16.msra.mxu0 %v6263_v7  ;;  %v2041_v15 = vpop.f32.mrb[60].mxu0  ;;  %v2114_v16 = vpop.f32.mrb[60].mxu1  ;;  %v6313_v6 = vld [vmem:[%s8832_s3 + $0x46c] ss:$20 sps:$4 sm:$0xff]  }
 0x310   : > { %3485 = vmatprep.subr.bf16.mxu1 %v6268_v11  ;;  %3704 = vmatprep.subr.bf16.mxu0 %v6271_v12  ;;  %v2043_v21 = vpop.f32.mrb[61].mxu0  ;;  %v2116_v25 = vpop.f32.mrb[61].mxu1 }
 0x311   : > { %v2045_v28 = vpop.f32.mrb[62].mxu0  ;;  %v2118_v31 = vpop.f32.mrb[62].mxu1 }
 0x312   : > { %v7495_v46 = vpack.c.bf16 %v2045_v28, %v2041_v15  ;;  %v2047_v32 = vpop.f32.mrb[63].mxu0  ;;  %v7497_v27 = vpack.c.bf16 %v2118_v31, %v2114_v16  ;;  %v2120_v51 = vpop.f32.mrb[63].mxu1  ;;  %v6311_v15 = vld [vmem:[%s8832_s3 + $0x468] ss:$20 sps:$4 sm:$0xff]  }
 0x313   : > { %3486 = vmatpush1.bf16.msra.mxu1 %v6266_v13  ;;  %3705 = vmatpush1.bf16.msra.mxu0 %v6269_v14  ;;  %v7505_v36 = vpack.c.bf16 %v2047_v32, %v2043_v21  ;;  %v7507_v37 = vpack.c.bf16 %v2120_v51, %v2116_v25  ;;  %v6308_v14 = vld [vmem:[%s8832_s3 + $0x460] ss:$20 sps:$4 sm:$0xff]   ;;  %v6314_v21 = vld [vmem:[%s8832_s3 + $0x488] ss:$20 sps:$4 sm:$0xff]   ;;  %v6317_v25 = vld [vmem:[%s8832_s3 + $0x490] ss:$20 sps:$4 sm:$0xff]  }
 0x314   : > { %3487 = vmatprep.subr.bf16.mxu1 %v6274_v17  ;;  %3706 = vmatprep.subr.bf16.mxu0 %v6277_v18  ;;  %v6316_v17 = vld [vmem:[%s8832_s3 + $0x48c] ss:$20 sps:$4 sm:$0xff]   ;;  %v6319_v18 = vld [vmem:[%s8832_s3 + $0x494] ss:$20 sps:$4 sm:$0xff]   ;;  %v6325_v32 = vld [vmem:[%s8832_s3 + $0x4bc] ss:$20 sps:$4 sm:$0xff]  }
 0x315   : > { %3464 = vmatprep.mubr.bf16.mxu1 %v7505_v36  ;;  %3683 = vmatprep.mubr.bf16.mxu0 %v7505_v36  ;;  %v6322_v31 = vld [vmem:[%s8832_s3 + $0x4b4] ss:$20 sps:$4 sm:$0xff]  }
 0x316   : > { %3465 = vmatmul.mubr.bf16.gmra.mrb[76].mxu1 %v7495_v46  ;;  %3684 = vmatmul.mubr.bf16.gmra.mrb[84].mxu0 %v7495_v46 }
 0x317   : > { %3488 = vmatpush1.bf16.msra.mxu1 %v6272_v63  ;;  %3707 = vmatpush1.bf16.msra.mxu0 %v6275_v35 }
 0x318   : > { %3489 = vmatprep.subr.bf16.mxu1 %v6280_v38  ;;  %3708 = vmatprep.subr.bf16.mxu0 %v6283_v5  ;;  %v6320_v5 = vld [vmem:[%s8832_s3 + $0x4b0] ss:$20 sps:$4 sm:$0xff]  }
 0x319   : > { %3507 = vmatprep.mubr.bf16.mxu1 %v7399_v62  ;;  %3726 = vmatprep.mubr.bf16.mxu0 %v7399_v62 }
 0x31b   : > { %3490 = vmatpush1.bf16.msra.mxu1 %v6278_v29  ;;  %3709 = vmatpush1.bf16.msra.mxu0 %v6281_v39  ;;  %v6323_v29 = vld [vmem:[%s8832_s3 + $0x4b8] ss:$20 sps:$4 sm:$0xff]  }
 0x31c   : > { %3491 = vmatprep.subr.bf16.mxu1 %v6286_v40  ;;  %3710 = vmatprep.subr.bf16.mxu0 %v6289_v41  ;;  %v6328_v40 = vld [vmem:[%s8832_s3 + $0x4dc] ss:$20 sps:$4 sm:$0xff]   ;;  %v6331_v41 = vld [vmem:[%s8832_s3 + $0x4e4] ss:$20 sps:$4 sm:$0xff]  }
 0x31f   : > { %3492 = vmatpush1.bf16.msra.mxu1 %v6284_v42  ;;  %3711 = vmatpush1.bf16.msra.mxu0 %v6287_v33  ;;  %v6326_v42 = vld [vmem:[%s8832_s3 + $0x4d8] ss:$20 sps:$4 sm:$0xff]   ;;  %v6329_v33 = vld [vmem:[%s8832_s3 + $0x4e0] ss:$20 sps:$4 sm:$0xff]  }
 0x320   : > { %3493 = vmatprep.subr.bf16.mxu1 %v6292_v45  ;;  %3712 = vmatprep.subr.bf16.mxu0 %v6295_v48  ;;  %v6334_v45 = vld [vmem:[%s8832_s3 + $0x504] ss:$20 sps:$4 sm:$0xff]   ;;  %v6340_v48 = vld [vmem:[%s8832_s3 + $0x50c] ss:$20 sps:$4 sm:$0xff]  }
 0x323   : > { %3494 = vmatpush1.bf16.msra.mxu1 %v6290_v49  ;;  %3713 = vmatpush1.bf16.msra.mxu0 %v6293_v50  ;;  %v6332_v49 = vld [vmem:[%s8832_s3 + $0x500] ss:$20 sps:$4 sm:$0xff]  }
 0x324   : > { %3495 = vmatprep.subr.bf16.mxu1 %v6298_v53  ;;  %3714 = vmatprep.subr.bf16.mxu0 %v6301_v55  ;;  %v6337_v50 = vld [vmem:[%s8832_s3 + $0x52c] ss:$20 sps:$4 sm:$0xff]   ;;  %v6338_v53 = vld [vmem:[%s8832_s3 + $0x508] ss:$20 sps:$4 sm:$0xff]  }
 0x325   : > { %v6346_v55 = vld [vmem:[%s8832_s3 + $0x534] ss:$20 sps:$4 sm:$0xff]  }
 0x327   : > { %3496 = vmatpush1.bf16.msra.mxu1 %v6296_v56  ;;  %3715 = vmatpush1.bf16.msra.mxu0 %v6299_v57  ;;  %v5617_v1 = vpop.f32.mrb[64].mxu0  ;;  %v6335_v56 = vld [vmem:[%s8832_s3 + $0x528] ss:$20 sps:$4 sm:$0xff]  }
 0x328   : > { %3497 = vmatprep.subr.bf16.mxu1 %v6304_v58  ;;  %3716 = vmatprep.subr.bf16.mxu0 %v6307_v59  ;;  %v2157_v7 = vpop.f32.mrb[65].mxu0  ;;  %v6343_v57 = vld [vmem:[%s8832_s3 + $0x554] ss:$20 sps:$4 sm:$0xff]   ;;  %v6344_v58 = vld [vmem:[%s8832_s3 + $0x530] ss:$20 sps:$4 sm:$0xff]  }
 0x329   : > { %v5618_v11 = vpop.f32.mrb[66].mxu0  ;;  %v6341_v59 = vld [vmem:[%s8832_s3 + $0x550] ss:$20 sps:$4 sm:$0xff]  }
 0x32a   : > { %v7581_v12 = vpack.c.bf16 %v5618_v11, %v5617_v1  ;;  %v2160_v13 = vpop.f32.mrb[67].mxu0  ;;  %v6352_v1 = vld [vmem:[%s8832_s3 + $0x57c] ss:$20 sps:$4 sm:$0xff]  }
 0x32b   : > { %3498 = vmatpush1.bf16.msra.mxu1 %v6302_v60  ;;  %3717 = vmatpush1.bf16.msra.mxu0 %v6305_v61  ;;  %v7589_v16 = vpack.c.bf16 %v2160_v13, %v2157_v7  ;;  %v6349_v60 = vld [vmem:[%s8832_s3 + $0x55c] ss:$20 sps:$4 sm:$0xff]   ;;  %v6347_v61 = vld [vmem:[%s8832_s3 + $0x558] ss:$20 sps:$4 sm:$0xff]   ;;  %v6353_v7 = vld [vmem:[%s8832_s3 + $0x580] ss:$20 sps:$4 sm:$0xff]  }
 0x32c   : > { %3499 = vmatprep.subr.bf16.mxu1 %v6310_v3  ;;  %3718 = vmatprep.subr.bf16.mxu0 %v6313_v6  ;;  %v6355_v3 = vld [vmem:[%s8832_s3 + $0x584] ss:$20 sps:$4 sm:$0xff]  }
 0x32d   : > { %v6350_v6 = vld [vmem:[%s8832_s3 + $0x578] ss:$20 sps:$4 sm:$0xff]   ;;  %v6356_v11 = vld [vmem:[%s8832_s3 + $0x150] ss:$20 sps:$4 sm:$0xff]  }
 0x32e   : > { %v6357_v13 = vld [vmem:[%s8832_s3 + $0x3d0] ss:$20 sps:$4 sm:$0xff]  }
 0x32f   : > { %3500 = vmatpush1.bf16.msra.mxu1 %v6308_v14  ;;  %3719 = vmatpush1.bf16.msra.mxu0 %v6311_v15  ;;  %v5621_v28 = vpop.f32.mrb[68].mxu0  ;;  %v6358_v14 = vld [vmem:[%s8832_s3 + $0x10] ss:$20 sps:$4 sm:$0xff]  }
 0x330   : > { %3501 = vmatprep.subr.bf16.mxu1 %v6316_v17  ;;  %3720 = vmatprep.subr.bf16.mxu0 %v6319_v18  ;;  %v2173_v51 = vpop.f32.mrb[69].mxu0  ;;  %v6359_v15 = vld [vmem:[%s8832_s3 + $0x290] ss:$20 sps:$4 sm:$0xff]   ;;  %v6360_v17 = vld [vmem:[%s8832_s3 + $0x178] ss:$20 sps:$4 sm:$0xff]  }
 0x331   : > { %v5622_v63 = vpop.f32.mrb[70].mxu0  ;;  %v6361_v18 = vld [vmem:[%s8832_s3 + $0x3f8] ss:$20 sps:$4 sm:$0xff]  }
 0x332   : > { %v7609_v35 = vpack.c.bf16 %v5622_v63, %v5621_v28  ;;  %v2176_v38 = vpop.f32.mrb[71].mxu0  ;;  %v6364_v28 = vld [vmem:[%s8832_s3 + $0x1a0] ss:$20 sps:$4 sm:$0xff]   ;;  %v6368_v63 = vld [vmem:[%s8832_s3 + $0x1c8] ss:$20 sps:$4 sm:$0xff]  }
 0x333   : > { %3502 = vmatpush1.bf16.msra.mxu1 %v6314_v21  ;;  %3721 = vmatpush1.bf16.msra.mxu0 %v6317_v25  ;;  %v7617_v39 = vpack.c.bf16 %v2176_v38, %v2173_v51  ;;  %v6362_v21 = vld [vmem:[%s8832_s3 + $0x38] ss:$20 sps:$4 sm:$0xff]   ;;  %v6367_v51 = vld [vmem:[%s8832_s3 + $0x2e0] ss:$20 sps:$4 sm:$0xff]   ;;  %v6369_v38 = vld [vmem:[%s8832_s3 + $0x448] ss:$20 sps:$4 sm:$0xff]  }
 0x334   : > { %3503 = vmatprep.subr.bf16.mxu1 %v6322_v31  ;;  %3722 = vmatprep.subr.bf16.mxu0 %v6325_v32  ;;  %v6363_v25 = vld [vmem:[%s8832_s3 + $0x2b8] ss:$20 sps:$4 sm:$0xff]   ;;  %v6365_v31 = vld [vmem:[%s8832_s3 + $0x420] ss:$20 sps:$4 sm:$0xff]  }
 0x335   : > { %v6366_v32 = vld [vmem:[%s8832_s3 + $0x60] ss:$20 sps:$4 sm:$0xff]  }
 0x337   : > { %3504 = vmatpush1.bf16.msra.mxu1 %v6320_v5  ;;  %3723 = vmatpush1.bf16.msra.mxu0 %v6323_v29  ;;  %v6370_v5 = vld [vmem:[%s8832_s3 + $0x88] ss:$20 sps:$4 sm:$0xff]  }
 0x338   : > { %3505 = vmatprep.subr.bf16.mxu1 %v6328_v40  ;;  %3724 = vmatprep.subr.bf16.mxu0 %v6331_v41  ;;  %v6371_v29 = vld [vmem:[%s8832_s3 + $0x308] ss:$20 sps:$4 sm:$0xff]   ;;  %v6372_v40 = vld [vmem:[%s8832_s3 + $0x1f0] ss:$20 sps:$4 sm:$0xff]  }
 0x339   : > { %v6373_v41 = vld [vmem:[%s8832_s3 + $0x470] ss:$20 sps:$4 sm:$0xff]  }
 0x33b   : > { %3506 = vmatpush1.bf16.msra.mxu1 %v6326_v42  ;;  %3725 = vmatpush1.bf16.msra.mxu0 %v6329_v33  ;;  %v6374_v42 = vld [vmem:[%s8832_s3 + $0xb0] ss:$20 sps:$4 sm:$0xff]  }
 0x33c   : > { %3548 = vmatprep.subr.bf16.mxu1 %v6334_v45  ;;  %3767 = vmatprep.subr.bf16.mxu0 %v6340_v48  ;;  %v6375_v33 = vld [vmem:[%s8832_s3 + $0x330] ss:$20 sps:$4 sm:$0xff]   ;;  %v6376_v45 = vld [vmem:[%s8832_s3 + $0x218] ss:$20 sps:$4 sm:$0xff]  }
 0x33d   : > { %v6377_v48 = vld [vmem:[%s8832_s3 + $0x498] ss:$20 sps:$4 sm:$0xff]  }
 0x33e   : > { %3508 = vmatmul.mubr.bf16.vlgmr.msra.gmra.mrb[64].mxu1 %v7389_v22  ;;  %3727 = vmatmul.mubr.bf16.vlgmr.msra.gmra.mrb[72].mxu0 %v7389_v22 }
 0x33f   : > { %3549 = vmatpush1.bf16.msra.mxu1 %v6332_v49  ;;  %3517 = vmatprep.mubr.bf16.mxu1 %v7435_v34  ;;  %v6378_v49 = vld [vmem:[%s8832_s3 + $0xd8] ss:$20 sps:$4 sm:$0xff]  }
 0x340   : > { %3736 = vmatprep.mubr.bf16.mxu0 %v7435_v34  ;;  %3550 = vmatprep.subr.bf16.mxu1 %v6337_v50  ;;  %v6379_v50 = vld [vmem:[%s8832_s3 + $0x358] ss:$20 sps:$4 sm:$0xff]  }
 0x341   : > { %3768 = vmatpush1.bf16.msra.mxu0 %v6338_v53  ;;  %v6380_v53 = vld [vmem:[%s8832_s3 + $0x240] ss:$20 sps:$4 sm:$0xff]  }
 0x342   : > { %3769 = vmatprep.subr.bf16.mxu0 %v6346_v55  ;;  %v6381_v55 = vld [vmem:[%s8832_s3 + $0x4c0] ss:$20 sps:$4 sm:$0xff]  }
 0x343   : > { %3551 = vmatpush1.bf16.msra.mxu1 %v6335_v56  ;;  %v6382_v56 = vld [vmem:[%s8832_s3 + $0x100] ss:$20 sps:$4 sm:$0xff]  }
 0x344   : > { %3552 = vmatprep.subr.bf16.mxu1 %v6343_v57  ;;  %v6383_v57 = vld [vmem:[%s8832_s3 + $0x380] ss:$20 sps:$4 sm:$0xff]  }
 0x345   : > { %3770 = vmatpush1.bf16.msra.mxu0 %v6344_v58  ;;  %v6384_v58 = vld [vmem:[%s8832_s3 + $0x268] ss:$20 sps:$4 sm:$0xff]  }
 0x346   : > { %3518 = vmatmul.mubr.bf16.gmra.mrb[68].mxu1 %v7425_v30  ;;  %3737 = vmatmul.mubr.bf16.gmra.mrb[76].mxu0 %v7425_v30 }
 0x347   : > { %3527 = vmatprep.mubr.bf16.mxu1 %v7471_v10  ;;  %3746 = vmatprep.mubr.bf16.mxu0 %v7471_v10 }
 0x348   : > { %3553 = vmatpush1.bf16.msra.mxu1 %v6341_v59  ;;  %3771 = vmatprep.subr.bf16.mxu0 %v6349_v60  ;;  %v6386_v59 = vld [vmem:[%s8832_s3 + $0x128] ss:$20 sps:$4 sm:$0xff]  }
 0x349   : > { %3772 = vmatpush1.bf16.msra.mxu0 %v6347_v61  ;;  %3554 = vmatprep.subr.bf16.mxu1 %v6352_v1  ;;  %v6387_v60 = vld [vmem:[%s8832_s3 + $0x3a8] ss:$20 sps:$4 sm:$0xff]   ;;  %v6388_v61 = vld [vmem:[%s8832_s3 + $0x510] ss:$20 sps:$4 sm:$0xff]  }
 0x34a   : > { %3773 = vmatprep.subr.bf16.mxu0 %v6355_v3  ;;  %v6391_v1 = vld [vmem:[%s8832_s3 + $0x588] ss:$20 sps:$4 sm:$0xff]  }
 0x34b   : > { %v4342_v3 = vld [vmem:[%s8833_s4 + $0x18] sm:$0xff] }
 0x34c   : > { %3555 = vmatpush1.bf16.msra.mxu1 %v6350_v6 }
 0x34d   : > { %3774 = vmatpush1.bf16.msra.mxu0 %v6353_v7  ;;  %5391 = vmatprep.subr.bf16.mxu1 %v6356_v11  ;;  %v4373_v11 = vld [vmem:[%s8833_s4 + $0x110] sm:$0xff] }
 0x34e   : > { %3528 = vmatmul.mubr.bf16.gmra.mrb[72].mxu1 %v7461_v2  ;;  %3747 = vmatmul.mubr.bf16.gmra.mrb[80].mxu0 %v7461_v2 }
 0x34f   : > { %3537 = vmatprep.mubr.bf16.mxu1 %v7507_v37  ;;  %3756 = vmatprep.mubr.bf16.mxu0 %v7507_v37 }
 0x350   : > { %5431 = vmatprep.subr.bf16.mxu0 %v6357_v13  ;;  %v4374_v13 = vld [vmem:[%s8833_s4 + $0x118] sm:$0xff] }
 0x356   : > { %3538 = vmatmul.mubr.bf16.gmra.mrb[76].mxu1 %v7497_v27  ;;  %3757 = vmatmul.mubr.bf16.gmra.mrb[84].mxu0 %v7497_v27 }
 0x357   : > { %3580 = vmatprep.mubr.bf16.mxu1 %v6436_v0  ;;  %3799 = vmatprep.mubr.bf16.mxu0 %v6436_v0 }
 0x35e   : > { %5288 = vmatmul.mubr.msk.bf16.vlgmr.msra.gmra.mrb[64].mxu1 %vm8836_vm0, %v7589_v16  ;;  %5292 = vmatmul.mubr.msk.bf16.vlgmr.msra.gmra.mrb[72].mxu0 %vm8836_vm0, %v7589_v16 }
 0x35f   : > { %5392 = vmatpush3.bf16.msra.mxu1 %v6358_v14  ;;  %5432 = vmatpush3.bf16.msra.mxu0 %v6359_v15  ;;  %v5705_v14 = vpack.c.bf16 %v4374_v13, %v4373_v11  ;;  %v4359_v15 = vld [vmem:[%s8833_s4 + $0xa0] sm:$0xff]  ;;  %v4352_v11 = vld [vmem:[%s8833_s4 + $0x68] sm:$0xff] }
 0x360   : > { %5393 = vmatprep.subr.bf16.mxu1 %v6360_v17  ;;  %5433 = vmatprep.subr.bf16.mxu0 %v6361_v18  ;;  %v4360_v17 = vld [vmem:[%s8833_s4 + $0xa8] sm:$0xff]  ;;  %v4391_v18 = vld [vmem:[%s8833_s4 + $0x1a0] sm:$0xff] }
 0x361   : > { %3590 = vmatprep.mubr.bf16.mxu1 %v6436_v0  ;;  %3809 = vmatprep.mubr.bf16.mxu0 %v6436_v0 }
 0x363   : > { %5394 = vmatpush3.bf16.msra.mxu1 %v6362_v21  ;;  %5434 = vmatpush3.bf16.msra.mxu0 %v6363_v25  ;;  %v5675_v21 = vpack.c.bf16 %v4360_v17, %v4359_v15  ;;  %v4392_v25 = vld [vmem:[%s8833_s4 + $0x1a8] sm:$0xff]  ;;  %v4383_v15 = vld [vmem:[%s8833_s4 + $0x160] sm:$0xff] }
 0x364   : > { %5395 = vmatprep.subr.bf16.mxu1 %v6364_v28  ;;  %5435 = vmatprep.subr.bf16.mxu0 %v6365_v31  ;;  %v4343_v28 = vld [vmem:[%s8833_s4 + $0x20] sm:$0xff]  ;;  %v4344_v31 = vld [vmem:[%s8833_s4 + $0x28] sm:$0xff] }
 0x365   : > { %v4384_v17 = vld [vmem:[%s8833_s4 + $0x168] sm:$0xff] }
 0x366   : > { %5289 = vmatmul.mubr.msk.bf16.gmra.mrb[68].mxu1 %vm8836_vm0, %v7581_v12  ;;  %5293 = vmatmul.mubr.msk.bf16.gmra.mrb[76].mxu0 %vm8836_vm0, %v7581_v12 }
 0x367   : > { %5396 = vmatpush3.bf16.msra.mxu1 %v6366_v32  ;;  %5436 = vmatpush3.bf16.msra.mxu0 %v6367_v51  ;;  %v5707_v32 = vpack.c.bf16 %v4392_v25, %v4391_v18  ;;  %v5677_v51 = vpack.c.bf16 %v4344_v31, %v4343_v28  ;;  %v5725_v18 = vpack.c.bf16 %v4384_v17, %v4383_v15  ;;  %v4370_v25 = vld [vmem:[%s8833_s4 + $0xf8] sm:$0xff]  ;;  %v4401_v28 = vld [vmem:[%s8833_s4 + $0x1f0] sm:$0xff] }
 0x368   : > { %5397 = vmatprep.subr.bf16.mxu1 %v6368_v63  ;;  %5437 = vmatprep.subr.bf16.mxu0 %v6369_v38  ;;  %v4375_v63 = vld [vmem:[%s8833_s4 + $0x120] sm:$0xff]  ;;  %v4376_v38 = vld [vmem:[%s8833_s4 + $0x128] sm:$0xff] }
 0x369   : > { %3600 = vmatprep.mubr.bf16.mxu1 %v6436_v0  ;;  %3819 = vmatprep.mubr.bf16.mxu0 %v6436_v0 }
 0x36b   : > { %5398 = vmatpush3.bf16.msra.mxu1 %v6370_v5  ;;  %5438 = vmatpush3.bf16.msra.mxu0 %v6371_v29  ;;  %v5709_v5 = vpack.c.bf16 %v4376_v38, %v4375_v63  ;;  %v4361_v29 = vld [vmem:[%s8833_s4 + $0xb0] sm:$0xff]  ;;  %v4354_v63 = vld [vmem:[%s8833_s4 + $0x78] sm:$0xff] }
 0x36c   : > { %5399 = vmatprep.subr.bf16.mxu1 %v6372_v40  ;;  %5439 = vmatprep.subr.bf16.mxu0 %v6373_v41  ;;  %v4362_v40 = vld [vmem:[%s8833_s4 + $0xb8] sm:$0xff]  ;;  %v4393_v41 = vld [vmem:[%s8833_s4 + $0x1b0] sm:$0xff] }
 0x36e   : > { %5290 = vmatmul.mubr.msk.bf16.gmra.mrb[72].mxu1 %vm8836_vm0, %v7617_v39  ;;  %5294 = vmatmul.mubr.msk.bf16.gmra.mrb[80].mxu0 %vm8836_vm0, %v7617_v39 }
 0x36f   : > { %5400 = vmatpush3.bf16.msra.mxu1 %v6374_v42  ;;  %5440 = vmatpush3.bf16.msra.mxu0 %v6375_v33  ;;  %v5679_v42 = vpack.c.bf16 %v4362_v40, %v4361_v29  ;;  %v4394_v33 = vld [vmem:[%s8833_s4 + $0x1b8] sm:$0xff]  ;;  %v4385_v29 = vld [vmem:[%s8833_s4 + $0x170] sm:$0xff] }
 0x370   : > { %5401 = vmatprep.subr.bf16.mxu1 %v6376_v45  ;;  %5441 = vmatprep.subr.bf16.mxu0 %v6377_v48  ;;  %v4345_v45 = vld [vmem:[%s8833_s4 + $0x30] sm:$0xff]  ;;  %v4346_v48 = vld [vmem:[%s8833_s4 + $0x38] sm:$0xff] }
 0x371   : > { %3610 = vmatprep.mubr.bf16.mxu1 %v6436_v0  ;;  %3829 = vmatprep.mubr.bf16.mxu0 %v6436_v0  ;;  %v6385_v0 = vld [vmem:[%s8832_s3 + $0x4e8] ss:$20 sps:$4 sm:$0xff]  }
 0x372   : > { %v4386_v40 = vld [vmem:[%s8833_s4 + $0x178] sm:$0xff] }
 0x373   : > { %5402 = vmatpush3.bf16.msra.mxu1 %v6378_v49  ;;  %5442 = vmatpush3.bf16.msra.mxu0 %v6379_v50  ;;  %v5711_v49 = vpack.c.bf16 %v4394_v33, %v4393_v41  ;;  %v5681_v50 = vpack.c.bf16 %v4346_v48, %v4345_v45  ;;  %v5729_v41 = vpack.c.bf16 %v4386_v40, %v4385_v29  ;;  %v4404_v33 = vld [vmem:[%s8833_s4 + $0x208] sm:$0xff] }
 0x374   : > { %5403 = vmatprep.subr.bf16.mxu1 %v6380_v53  ;;  %5443 = vmatprep.subr.bf16.mxu0 %v6381_v55  ;;  %v4377_v53 = vld [vmem:[%s8833_s4 + $0x130] sm:$0xff]  ;;  %v4378_v55 = vld [vmem:[%s8833_s4 + $0x138] sm:$0xff] }
 0x375   : > { %v5106_v48 = vld [vmem:[%s8834_s5 + $0x1] ss:$8 sm:$0xf] }
 0x376   : > { %5291 = vmatmul.mubr.msk.bf16.gmra.mrb[76].mxu1 %vm8836_vm0, %v7609_v35  ;;  %5295 = vmatmul.mubr.msk.bf16.gmra.mrb[84].mxu0 %vm8836_vm0, %v7609_v35 }
 0x377   : > { %5404 = vmatpush3.bf16.msra.mxu1 %v6382_v56  ;;  %3872 = vmatprep.mubr.bf16.mxu1 %v7391_v26  ;;  %v6389_v26 = vld [vmem:[%s8832_s3 + $0x538] ss:$20 sps:$4 sm:$0xff]   ;;  %v5713_v56 = vpack.c.bf16 %v4378_v55, %v4377_v53 }
 0x378   : > { %5444 = vmatpush3.bf16.msra.mxu0 %v6383_v57  ;;  %3937 = vmatprep.mubr.bf16.mxu0 %v7399_v62  ;;  %v6390_v62 = vld [vmem:[%s8832_s3 + $0x560] ss:$20 sps:$4 sm:$0xff]  }
 0x379   : > { %5405 = vmatprep.subr.bf16.mxu1 %v6384_v58  ;;  %5445 = vmatprep.subr.bf16.mxu0 %v6385_v0  ;;  %v4363_v57 = vld [vmem:[%s8833_s4 + $0xc0] sm:$0xff]  ;;  %v4364_v58 = vld [vmem:[%s8833_s4 + $0xc8] sm:$0xff] }
 0x37a   : > { %v4395_v0 = vld [vmem:[%s8833_s4 + $0x1c0] sm:$0xff] }
 0x37b   : > { %5406 = vmatpush3.bf16.msra.mxu1 %v6386_v59  ;;  %v5683_v59 = vpack.c.bf16 %v4364_v58, %v4363_v57 }
 0x37c   : > { %5446 = vmatpush3.bf16.msra.mxu0 %v6387_v60  ;;  %5623 = vmatprep.subr.bf16.mxu1 %v6388_v61  ;;  %v4396_v60 = vld [vmem:[%s8833_s4 + $0x1c8] sm:$0xff] }
 0x37e   : > { %3873 = vmatmul.mubr.bf16.vlgmr.msra.gmra.mrb[80].mxu1 %v7387_v19  ;;  %v4355_v19 = vld [vmem:[%s8833_s4 + $0x80] sm:$0xff] }
 0x37f   : > { %3938 = vmatmul.mubr.bf16.vlgmr.msra.gmra.mrb[88].mxu0 %v7389_v22  ;;  %3880 = vmatprep.mubr.bf16.mxu1 %v7433_v44  ;;  %v4356_v22 = vld [vmem:[%s8833_s4 + $0x88] sm:$0xff] }
 0x380   : > { %3945 = vmatprep.mubr.bf16.mxu0 %v7435_v34  ;;  %5624 = vmatpush3.bf16.msra.mxu1 %v6388_v61  ;;  %v4388_v44 = vld [vmem:[%s8833_s4 + $0x188] sm:$0xff]  ;;  %v4339_v34 = vld [vmem:[%s8833_s4] sm:$0xff] }
 0x381   : > { %5625 = vmatprep.subr.bf16.mxu1 %v6389_v26  ;;  %v4347_v61 = vld [vmem:[%s8833_s4 + $0x40] sm:$0xff] }
 0x384   : > { %5626 = vmatpush3.bf16.msra.mxu1 %v6389_v26  ;;  %v4348_v26 = vld [vmem:[%s8833_s4 + $0x48] sm:$0xff] }
 0x385   : > { %5627 = vmatprep.subr.bf16.mxu1 %v6390_v62 }
 0x386   : > { %3881 = vmatmul.mubr.bf16.gmra.mrb[84].mxu1 %v7423_v24  ;;  %v4387_v24 = vld [vmem:[%s8833_s4 + $0x180] sm:$0xff] }
 0x387   : > { %3946 = vmatmul.mubr.bf16.gmra.mrb[92].mxu0 %v7425_v30  ;;  %3888 = vmatprep.mubr.bf16.mxu1 %v7469_v9  ;;  %v5667_v30 = vpack.c.bf16 %v4356_v22, %v4355_v19  ;;  %v4379_v19 = vld [vmem:[%s8833_s4 + $0x140] sm:$0xff]  ;;  %v4380_v22 = vld [vmem:[%s8833_s4 + $0x148] sm:$0xff] }
 0x388   : > { %3953 = vmatprep.mubr.bf16.mxu0 %v7471_v10  ;;  %5628 = vmatpush3.bf16.msra.mxu1 %v6390_v62  ;;  %v4371_v10 = vld [vmem:[%s8833_s4 + $0x100] sm:$0xff]  ;;  %v5715_v62 = vpack.c.bf16 %v4396_v60, %v4395_v0 }
 0x389   : > { %5629 = vmatprep.subr.bf16.mxu1 %v6391_v1  ;;  %5668 = vmatprep.subr.bf16.mxu0 %v5667_v30  ;;  %v4365_v30 = vld [vmem:[%s8833_s4 + $0xd0] sm:$0xff] }
 0x38c   : > { %5630 = vmatpush3.bf16.msra.mxu1 %v6391_v1  ;;  %v5685_v1 = vpack.c.bf16 %v4348_v26, %v4347_v61 }
 0x38e   : > { %3889 = vmatmul.mubr.bf16.gmra.mrb[88].mxu1 %v7459_v52  ;;  %v4340_v52 = vld [vmem:[%s8833_s4 + $0x8] sm:$0xff] }
 0x38f   : > { %3954 = vmatmul.mubr.bf16.gmra.mrb[96].mxu0 %v7461_v2  ;;  %3896 = vmatprep.mubr.bf16.mxu1 %v7505_v36  ;;  %v5699_v2 = vpack.c.bf16 %v4388_v44, %v4387_v24  ;;  %v5669_v9 = vpack.c.bf16 %v4340_v52, %v4339_v34  ;;  %v4357_v36 = vld [vmem:[%s8833_s4 + $0x90] sm:$0xff]  ;;  %v5717_v24 = vpack.c.bf16 %v4380_v22, %v4379_v19  ;;  %v4366_v44 = vld [vmem:[%s8833_s4 + $0xd8] sm:$0xff] }
 0x390   : > { %3961 = vmatprep.mubr.bf16.mxu0 %v7507_v37  ;;  %v4358_v37 = vld [vmem:[%s8833_s4 + $0x98] sm:$0xff]  ;;  %v4397_v34 = vld [vmem:[%s8833_s4 + $0x1d0] sm:$0xff]  ;;  %v5687_v52 = vpack.c.bf16 %v4366_v44, %v4365_v30 }
 0x391   : > { %5700 = vmatprep.subr.bf16.mxu1 %v5699_v2  ;;  %5670 = vmatpush3.bf16.msra.mxu0 %v5669_v9  ;;  %v4398_v2 = vld [vmem:[%s8833_s4 + $0x1d8] sm:$0xff]  ;;  %v4349_v9 = vld [vmem:[%s8833_s4 + $0x50] sm:$0xff] }
 0x396   : > { %3897 = vmatmul.mubr.bf16.gmra.mrb[92].mxu1 %v7495_v46  ;;  %v4372_v46 = vld [vmem:[%s8833_s4 + $0x108] sm:$0xff] }
 0x397   : > { %3962 = vmatmul.mubr.bf16.gmra.mrb[100].mxu0 %v7497_v27  ;;  %5631 = vmatprep.mubr.msk.bf16.mxu1 %vm8836_vm0, %v7589_v16  ;;  %v5701_v27 = vpack.c.bf16 %v4372_v46, %v4371_v10  ;;  %v5671_v16 = vpack.c.bf16 %v4358_v37, %v4357_v36  ;;  %v4350_v10 = vld [vmem:[%s8833_s4 + $0x58] sm:$0xff]  ;;  %v5719_v46 = vpack.c.bf16 %v4398_v2, %v4397_v34  ;;  %v4381_v36 = vld [vmem:[%s8833_s4 + $0x150] sm:$0xff] }
 0x398   : > { %v4382_v37 = vld [vmem:[%s8833_s4 + $0x158] sm:$0xff] }
 0x399   : > { %5672 = vmatprep.subr.bf16.mxu0 %v5671_v16  ;;  %v4367_v16 = vld [vmem:[%s8833_s4 + $0xe0] sm:$0xff] }
 0x39e   : > { %5632 = vmatmul.mubr.msk.bf16.vlgmr.msra.gmra.mrb[96].mxu1 %vm8836_vm0, %v7581_v12  ;;  %v4389_v12 = vld [vmem:[%s8833_s4 + $0x190] sm:$0xff] }
 0x39f   : > { %5635 = vmatprep.mubr.msk.bf16.mxu1 %vm8836_vm0, %v7617_v39  ;;  %5702 = vmatpush3.bf16.msra.mxu1 %v5701_v27  ;;  %v4341_v39 = vld [vmem:[%s8833_s4 + $0x10] sm:$0xff]  ;;  %v5689_v27 = vpack.c.bf16 %v4350_v10, %v4349_v9 }
 0x3a0   : > { %v5673_v7 = vpack.c.bf16 %v4342_v3, %v4341_v39  ;;  %v4399_v39 = vld [vmem:[%s8833_s4 + $0x1e0] sm:$0xff] }
 0x3a2   : > { %5674 = vmatpush3.bf16.msra.mxu0 %v5673_v7  ;;  %v4351_v7 = vld [vmem:[%s8833_s4 + $0x60] sm:$0xff] }
 0x3a3   : > { %5676 = vmatprep.subr.bf16.mxu0 %v5675_v21  ;;  %v4369_v21 = vld [vmem:[%s8833_s4 + $0xf0] sm:$0xff] }
 0x3a4   : > { %v5695_v31 = vpack.c.bf16 %v4370_v25, %v4369_v21 }
 0x3a6   : > { %5636 = vmatmul.mubr.msk.bf16.gmra.mrb[100].mxu1 %vm8836_vm0, %v7609_v35  ;;  %v4390_v35 = vld [vmem:[%s8833_s4 + $0x198] sm:$0xff]  ;;  %5678 = vmatpush3.bf16.msra.mxu0 %v5677_v51  ;;  %v4353_v51 = vld [vmem:[%s8833_s4 + $0x70] sm:$0xff] }
 0x3a7   : > { %v5703_v6 = vpack.c.bf16 %v4390_v35, %v4389_v12  ;;  %5680 = vmatprep.subr.bf16.mxu0 %v5679_v42  ;;  %v5721_v12 = vpack.c.bf16 %v4382_v37, %v4381_v36  ;;  %v4368_v35 = vld [vmem:[%s8833_s4 + $0xe8] sm:$0xff]  ;;  %v4403_v42 = vld [vmem:[%s8833_s4 + $0x200] sm:$0xff] }
 0x3a8   : > { %v5691_v3 = vpack.c.bf16 %v4368_v35, %v4367_v16  ;;  %v8047_v45 = vpack.c.bf16 %v4404_v33, %v4403_v42 }
 0x3a9   : > { %5704 = vmatprep.subr.bf16.mxu1 %v5703_v6  ;;  %v4400_v6 = vld [vmem:[%s8833_s4 + $0x1e8] sm:$0xff] }
 0x3aa   : > { %5706 = vmatpush3.bf16.msra.mxu1 %v5705_v14  ;;  %5682 = vmatpush3.bf16.msra.mxu0 %v5681_v50  ;;  %v5723_v13 = vpack.c.bf16 %v4400_v6, %v4399_v39  ;;  %v5693_v14 = vpack.c.bf16 %v4352_v11, %v4351_v7 }
 0x3ab   : > { %5708 = vmatprep.subr.bf16.mxu1 %v5707_v32  ;;  %5684 = vmatprep.subr.bf16.mxu0 %v5683_v59  ;;  %v4402_v32 = vld [vmem:[%s8833_s4 + $0x1f8] sm:$0xff] }
 0x3ac   : > { %v5727_v38 = vpack.c.bf16 %v4402_v32, %v4401_v28 }
 0x3ae   : > { %5710 = vmatpush3.bf16.msra.mxu1 %v5709_v5  ;;  %5686 = vmatpush3.bf16.msra.mxu0 %v5685_v1  ;;  %v5697_v5 = vpack.c.bf16 %v4354_v63, %v4353_v51 }
 0x3af   : > { %5712 = vmatprep.subr.bf16.mxu1 %v5711_v49  ;;  %5688 = vmatprep.subr.bf16.mxu0 %v5687_v52  ;;  %v5107_v49 = vld [vmem:[%s8834_s5 + $0x1] ss:$8 sm:$0x10] }
 0x3b0   : > { %v8056_v50 = vor.u32 %v5107_v49, %v5106_v48 }
 0x3b2   : > { %5714 = vmatpush3.bf16.msra.mxu1 %v5713_v56  ;;  %5690 = vmatpush3.bf16.msra.mxu0 %v5689_v27  ;;  %v8061_v53 = vrot.slane %v8056_v50, %v732_v4  ;;  %v8066_v55 = vrot.slane %v8056_v50, %v740_v8  ;;  %v8071_v56 = vrot.slane %v8056_v50, %v736_v20 }
 0x3b3   : > { %5716 = vmatprep.subr.bf16.mxu1 %v5715_v62  ;;  %5692 = vmatprep.subr.bf16.mxu0 %v5691_v3  ;;  %v8076_v57 = vrot.slane %v8056_v50, %v744_v23 }
 0x3b6   : > { %5718 = vmatpush3.bf16.msra.mxu1 %v5717_v24  ;;  %5694 = vmatpush3.bf16.msra.mxu0 %v5693_v14 }
 0x3b7   : > { %5720 = vmatprep.subr.bf16.mxu1 %v5719_v46  ;;  %5696 = vmatprep.subr.bf16.mxu0 %v5695_v31 }
 0x3ba   : > { %5722 = vmatpush3.bf16.msra.mxu1 %v5721_v12  ;;  %5698 = vmatpush3.bf16.msra.mxu0 %v5697_v5 }
 0x3bb   : > { %5724 = vmatprep.subr.bf16.mxu1 %v5723_v13  ;;  %5732 = vmatprep.subr.bf16.mxu0 %v8047_v45 }
 0x3be   : > { %5726 = vmatpush3.bf16.msra.mxu1 %v5725_v18  ;;  %v4150_v18 = vadd.s32 8, %v7059_v47 }
 0x3bf   : > { %5728 = vmatprep.subr.bf16.mxu1 %v5727_v38 }
 0x3c2   : > { %5730 = vmatpush3.bf16.msra.mxu1 %v5729_v41 }
 0x431   : > { %v3582_v58 = vpop.f32.mrb[64].mxu1  ;;  %v3801_v0 = vpop.f32.mrb[72].mxu0 }
 0x432   : > { %v5779_v4 = vadd.f32 %v3582_v58, %v8061_v53  ;;  %v5795_v59 = vadd.f32 %v3801_v0, %v8066_v55  ;;  %v3584_v60 = vpop.f32.mrb[65].mxu1  ;;  %v3803_v61 = vpop.f32.mrb[73].mxu0 }
 0x433   : > { %v5780_v8 = vadd.f32 %v3584_v60, %v8071_v56  ;;  %v5796_v26 = vadd.f32 %v3803_v61, %v8076_v57  ;;  %v3586_v62 = vpop.f32.mrb[66].mxu1  ;;  %v3805_v20 = vpop.f32.mrb[74].mxu0 }
 0x434   : > { %v5781_v1 = vadd.f32 %v3586_v62, %v8061_v53  ;;  %v5797_v19 = vadd.f32 %v3805_v20, %v8066_v55  ;;  %v3588_v23 = vpop.f32.mrb[67].mxu1  ;;  %v3807_v22 = vpop.f32.mrb[75].mxu0  ;;  %v4035_v44 = vmax.f32 %v5779_v4, 0.0  ;;  %v4037_v34 = vmax.f32 %v5795_v59, 0.0 }
 0x435   : > { %v5782_v24 = vadd.f32 %v3588_v23, %v8071_v56  ;;  %v5798_v30 = vadd.f32 %v3807_v22, %v8076_v57  ;;  %v4036_v9 = vmax.f32 %v5780_v8, 0.0  ;;  %v4038_v10 = vmax.f32 %v5796_v26, 0.0 }
 0x436   : > { %v4040_v52 = vmax.f32 %v5781_v1, 0.0  ;;  %v4042_v2 = vmax.f32 %v5797_v19, 0.0  ;;  %v8096_v62 = vand.u32 127, %v730_v43 }
 0x437   : > { %v4041_v46 = vmax.f32 %v5782_v24, 0.0  ;;  %v4043_v27 = vmax.f32 %v5798_v30, 0.0 }
 0x438   : > { %v4075_v36 = vmax.f32 %v4035_v44, %v4040_v52  ;;  %v4101_v37 = vmax.f32 %v4037_v34, %v4042_v2  ;;  %v8103_v34 = vmul.u32 9, %v7059_v47  ;;  %v8105_v52 = vmul.u32 9, %v4150_v18 }
 0x439   : > { %v4088_v12 = vmax.f32 %v4036_v9, %v4041_v46  ;;  %v4114_v16 = vmax.f32 %v4038_v10, %v4043_v27  ;;  %v3592_v35 = vpop.f32.mrb[68].mxu1  ;;  %v3811_v39 = vpop.f32.mrb[76].mxu0  ;;  %v8114_v18 = vrot.slane %v8056_v50, %v748_v54  ;;  %v8128_v54 = vadd.s32 256, %v8096_v62 }
 0x43a   : > { %v5783_v3 = vadd.f32 %v3592_v35, %v8061_v53  ;;  %v5799_v6 = vadd.f32 %v3811_v39, %v8066_v55  ;;  %v3594_v7 = vpop.f32.mrb[69].mxu1  ;;  %v3813_v11 = vpop.f32.mrb[77].mxu0  ;;  %vm4171_vm5 = vcmp.ge.s32.totalorder %v8096_v62, %v8103_v34 }
 0x43b   : > { %v5784_v13 = vadd.f32 %v3594_v7, %v8071_v56  ;;  %v5800_v14 = vadd.f32 %v3813_v11, %v8076_v57  ;;  %v3596_v15 = vpop.f32.mrb[70].mxu1  ;;  %v3815_v17 = vpop.f32.mrb[78].mxu0  ;;  %vm4173_vm7 = vcmp.ge.s32.totalorder %v8128_v54, %v8103_v34 }
 0x43c   : > { %v4045_v21 = vmax.f32 %v5783_v3, 0.0  ;;  %v4047_v25 = vmax.f32 %v5799_v6, 0.0  ;;  %v5785_v28 = vadd.f32 %v3596_v15, %v8061_v53  ;;  %v5801_v31 = vadd.f32 %v3815_v17, %v8066_v55  ;;  %v3598_v32 = vpop.f32.mrb[71].mxu1  ;;  %v3817_v51 = vpop.f32.mrb[79].mxu0 }
 0x43d   : > { %v4046_v63 = vmax.f32 %v5784_v13, 0.0  ;;  %v4048_v38 = vmax.f32 %v5800_v14, 0.0  ;;  %v5786_v5 = vadd.f32 %v3598_v32, %v8071_v56  ;;  %v5802_v29 = vadd.f32 %v3817_v51, %v8076_v57 }
 0x43e   : > { %v4076_v40 = vmax.f32 %v4075_v36, %v4045_v21  ;;  %v4102_v41 = vmax.f32 %v4101_v37, %v4047_v25  ;;  %v4050_v42 = vmax.f32 %v5785_v28, 0.0  ;;  %v4052_v33 = vmax.f32 %v5801_v31, 0.0 }
 0x43f   : > { %v4089_v48 = vmax.f32 %v4088_v12, %v4046_v63  ;;  %v4115_v49 = vmax.f32 %v4114_v16, %v4048_v38  ;;  %v4051_v58 = vmax.f32 %v5786_v5, 0.0  ;;  %v4053_v0 = vmax.f32 %v5802_v29, 0.0 }
 0x440   : > { %v4077_v4 = vmax.f32 %v4076_v40, %v4050_v42  ;;  %v4103_v59 = vmax.f32 %v4102_v41, %v4052_v33  ;;  %v8117_v32 = vadd.s32 128, %v8096_v62  ;;  %v8120_v51 = vadd.s32 9, %v8103_v34 }
 0x441   : > { %v4090_v60 = vmax.f32 %v4089_v48, %v4051_v58  ;;  %v4116_v61 = vmax.f32 %v4115_v49, %v4053_v0  ;;  %v3602_v8 = vpop.f32.mrb[72].mxu1  ;;  %v3821_v26 = vpop.f32.mrb[80].mxu0  ;;  %v8125_v40 = vadd.s32 384, %v8096_v62  ;;  %v8133_v48 = vadd.s32 9, %v8105_v52 }
 0x442   : > { %v5787_v20 = vadd.f32 %v3602_v8, %v8061_v53  ;;  %v5803_v1 = vadd.f32 %v3821_v26, %v8066_v55  ;;  %v3604_v19 = vpop.f32.mrb[73].mxu1  ;;  %v3823_v23 = vpop.f32.mrb[81].mxu0  ;;  %v4151_v49 = vadd.s32 16, %v7059_v47  ;;  %vm4172_vm1 = vcmp.ge.s32.totalorder %v8117_v32, %v8103_v34 }
 0x443   : > { %v5788_v22 = vadd.f32 %v3604_v19, %v8071_v56  ;;  %v5804_v24 = vadd.f32 %v3823_v23, %v8076_v57  ;;  %v3606_v30 = vpop.f32.mrb[74].mxu1  ;;  %v3825_v44 = vpop.f32.mrb[82].mxu0  ;;  %vm4220_vm2 = vcmp.lt.s32.totalorder %v8117_v32, %v8120_v51  ;;  %vm4174_vm3 = vcmp.ge.s32.totalorder %v8125_v40, %v8103_v34 }
 0x444   : > { %v4055_v2 = vmax.f32 %v5787_v20, 0.0  ;;  %v4057_v43 = vmax.f32 %v5803_v1, 0.0  ;;  %v5789_v9 = vadd.f32 %v3606_v30, %v8061_v53  ;;  %v5805_v10 = vadd.f32 %v3825_v44, %v8066_v55  ;;  %v3608_v46 = vpop.f32.mrb[75].mxu1  ;;  %v3827_v27 = vpop.f32.mrb[83].mxu0  ;;  %vm8195_vm13 = vmand %vm4172_vm1, %vm4220_vm2 }
 0x445   : > { %v4056_v36 = vmax.f32 %v5788_v22, 0.0  ;;  %v4058_v37 = vmax.f32 %v5804_v24, 0.0  ;;  %v5790_v12 = vadd.f32 %v3608_v46, %v8071_v56  ;;  %v5806_v16 = vadd.f32 %v3827_v27, %v8076_v57 }
 0x446   : > { %v4078_v35 = vmax.f32 %v4077_v4, %v4055_v2  ;;  %v4104_v39 = vmax.f32 %v4103_v59, %v4057_v43  ;;  %v4060_v3 = vmax.f32 %v5789_v9, 0.0  ;;  %v4062_v6 = vmax.f32 %v5805_v10, 0.0 }
 0x447   : > { %v4091_v7 = vmax.f32 %v4090_v60, %v4056_v36  ;;  %v4117_v11 = vmax.f32 %v4116_v61, %v4058_v37  ;;  %v4061_v13 = vmax.f32 %v5790_v12, 0.0  ;;  %v4063_v14 = vmax.f32 %v5806_v16, 0.0 }
 0x448   : > { %v4079_v15 = vmax.f32 %v4078_v35, %v4060_v3  ;;  %v4105_v17 = vmax.f32 %v4104_v39, %v4062_v6  ;;  %vm4222_vm4 = vcmp.lt.s32.totalorder %v8125_v40, %v8120_v51  ;;  %vm4219_vm6 = vcmp.lt.s32.totalorder %v8096_v62, %v8120_v51 }
 0x449   : > { %v4092_v21 = vmax.f32 %v4091_v7, %v4061_v13  ;;  %v4118_v25 = vmax.f32 %v4117_v11, %v4063_v14  ;;  %v3612_v28 = vpop.f32.mrb[76].mxu1  ;;  %v3831_v31 = vpop.f32.mrb[84].mxu0  ;;  %v8152_v2 = vmul.u32 9, %v4151_v49  ;;  %vm4221_vm8 = vcmp.lt.s32.totalorder %v8128_v54, %v8120_v51  ;;  %vm8209_vm15 = vmand %vm4174_vm3, %vm4222_vm4 }
 0x44a   : > { %v5791_v63 = vadd.f32 %v3612_v28, %v8061_v53  ;;  %v5807_v38 = vadd.f32 %v3831_v31, %v8066_v55  ;;  %v3614_v5 = vpop.f32.mrb[77].mxu1  ;;  %v3833_v29 = vpop.f32.mrb[85].mxu0  ;;  %vm4177_vm9 = vcmp.ge.s32.totalorder %v8117_v32, %v8105_v52  ;;  %vm4225_vm10 = vcmp.lt.s32.totalorder %v8117_v32, %v8133_v48  ;;  %vm8224_vm2 = vmand %vm4171_vm5, %vm4219_vm6 }
 0x44b   : > { %v5792_v50 = vadd.f32 %v3614_v5, %v8071_v56  ;;  %v5808_v41 = vadd.f32 %v3833_v29, %v8076_v57  ;;  %v3616_v42 = vpop.f32.mrb[78].mxu1  ;;  %v3835_v33 = vpop.f32.mrb[86].mxu0  ;;  %v4152_v12 = vadd.s32 24, %v7059_v47  ;;  %vm4179_vm11 = vcmp.ge.s32.totalorder %v8125_v40, %v8105_v52  ;;  %vm8236_vm4 = vmand %vm4173_vm7, %vm4221_vm8 }
 0x44c   : > { %v4065_v58 = vmax.f32 %v5791_v63, 0.0  ;;  %v4067_v0 = vmax.f32 %v5807_v38, 0.0  ;;  %v5793_v4 = vadd.f32 %v3616_v42, %v8061_v53  ;;  %v5809_v59 = vadd.f32 %v3835_v33, %v8066_v55  ;;  %v3618_v60 = vpop.f32.mrb[79].mxu1  ;;  %v3837_v61 = vpop.f32.mrb[87].mxu0  ;;  %vm8263_vm7 = vmand %vm4177_vm9, %vm4225_vm10 }
 0x44d   : > { %v4066_v8 = vmax.f32 %v5792_v50, 0.0  ;;  %v4068_v26 = vmax.f32 %v5808_v41, 0.0  ;;  %v5794_v20 = vadd.f32 %v3618_v60, %v8071_v56  ;;  %v5810_v1 = vadd.f32 %v3837_v61, %v8076_v57 }
 0x44e   : > { %v4080_v19 = vmax.f32 %v4079_v15, %v4065_v58  ;;  %v4106_v23 = vmax.f32 %v4105_v17, %v4067_v0  ;;  %v4070_v22 = vmax.f32 %v5793_v4, 0.0  ;;  %v4072_v24 = vmax.f32 %v5809_v59, 0.0 }
 0x44f   : > { %v4093_v53 = vmax.f32 %v4092_v21, %v4066_v8  ;;  %v4119_v55 = vmax.f32 %v4118_v25, %v4068_v26  ;;  %v4071_v30 = vmax.f32 %v5794_v20, 0.0  ;;  %v4073_v44 = vmax.f32 %v5810_v1, 0.0 }
 0x450   : > { %v4081_v56 = vmax.f32 %v4080_v19, %v4070_v22  ;;  %v4107_v57 = vmax.f32 %v4106_v23, %v4072_v24  ;;  %vm4227_vm12 = vcmp.lt.s32.totalorder %v8125_v40, %v8133_v48  ;;  %vm4224_vm14 = vcmp.lt.s32.totalorder %v8096_v62, %v8133_v48 }
 0x451   : > { %v4094_v43 = vmax.f32 %v4093_v53, %v4071_v30  ;;  %v4120_v9 = vmax.f32 %v4119_v55, %v4073_v44  ;;  %v5407_v10 = vpop.f32.mrb[80].mxu1  ;;  %v8172_v17 = vadd.s32 9, %v8152_v2  ;;  %v8181_v50 = vmul.u32 9, %v4152_v12  ;;  %vm8277_vm8 = vmand %vm4179_vm11, %vm4227_vm12 }
 0x452   : > { %v4082_v46 = vrot.slane %v4081_v56, 4  ;;  %v4108_v27 = vrot.slane %v4107_v57, 4  ;;  %v5447_v36 = vpop.f32.mrb[88].mxu0  ;;  %v5408_v37 = vpop.f32.mrb[81].mxu1  ;;  %v4153_v4 = vadd.s32 32, %v7059_v47  ;;  %vm4181_vm3 = vcmp.ge.s32.totalorder %v8096_v62, %v8152_v2 }
 0x453   : > { %v4095_v16 = vrot.slane %v4094_v43, 4  ;;  %v4121_v35 = vrot.slane %v4120_v9, 4  ;;  %v5409_v39 = vadd.f32 %v5408_v37, %v5407_v10  ;;  %v5448_v3 = vpop.f32.mrb[89].mxu0  ;;  %v5410_v6 = vpop.f32.mrb[82].mxu1  ;;  %vm4230_vm0 = vcmp.lt.s32.totalorder %v8117_v32, %v8172_v17  ;;  %v4406_v37 = vld [vmem:[%s8833_s4 + $0x218] sm:$0xff] }
 0x454   : > { %v4083_v7 = vmax.f32 %v4081_v56, %v4082_v46  ;;  %v4109_v11 = vmax.f32 %v4107_v57, %v4108_v27  ;;  %v5449_v13 = vadd.f32 %v5448_v3, %v5447_v36  ;;  %v5450_v14 = vpop.f32.mrb[90].mxu0  ;;  %v5411_v15 = vpop.f32.mrb[83].mxu1  ;;  %vm4232_vm1 = vcmp.lt.s32.totalorder %v8125_v40, %v8172_v17  ;;  %v4405_v36 = vld [vmem:[%s8833_s4 + $0x210] sm:$0xff] }
 0x455   : > { %v4096_v21 = vmax.f32 %v4094_v43, %v4095_v16  ;;  %v4122_v25 = vmax.f32 %v4120_v9, %v4121_v35  ;;  %v3875_v28 = vadd.f32 %v5409_v39, %v8114_v18  ;;  %v5412_v31 = vadd.f32 %v5411_v15, %v5410_v6  ;;  %v5451_v63 = vpop.f32.mrb[91].mxu0 }
 0x456   : > { %v4084_v38 = vrot.slane %v4083_v7, 2  ;;  %v4110_v5 = vrot.slane %v4109_v11, 2  ;;  %v5452_v29 = vadd.f32 %v5451_v63, %v5450_v14  ;;  %v8216_v24 = vadd.s32 9, %v8181_v50 }
 0x457   : > { %v4097_v41 = vrot.slane %v4096_v21, 2  ;;  %v4123_v42 = vrot.slane %v4122_v25, 2  ;;  %v3878_v33 = vadd.f32 %v5412_v31, %v8114_v18  ;;  %v8184_v49 = vadd.f32 %v5449_v13, %v3875_v28 }
 0x458   : > { %v4085_v58 = vmax.f32 %v4083_v7, %v4084_v38  ;;  %v4111_v0 = vmax.f32 %v4109_v11, %v4110_v5  ;;  %vm4229_vm5 = vcmp.lt.s32.totalorder %v8096_v62, %v8172_v17  ;;  %vm4183_vm6 = vcmp.ge.s32.totalorder %v8128_v54, %v8152_v2  ;;  %v4407_v38 = vld [vmem:[%s8833_s4 + $0x220] sm:$0xff]  ;;  %v4408_v5 = vld [vmem:[%s8833_s4 + $0x228] sm:$0xff] }
 0x459   : > { %v4098_v59 = vmax.f32 %v4096_v21, %v4097_v41  ;;  %v4124_v60 = vmax.f32 %v4122_v25, %v4123_v42  ;;  %v5413_v61 = vpop.f32.mrb[84].mxu1  ;;  %v8201_v26 = vadd.f32 %v5452_v29, %v3878_v33  ;;  %v8244_v27 = vmul.u32 9, %v4153_v4 }
 0x45a   : > { %v4086_v20 = vrot.slane %v4085_v58, 1  ;;  %v4112_v1 = vrot.slane %v4111_v0, 1  ;;  %v5453_v19 = vpop.f32.mrb[92].mxu0  ;;  %v5414_v23 = vpop.f32.mrb[85].mxu1  ;;  %v4154_v15 = vadd.s32 40, %v7059_v47  ;;  %vm8849_vm9 = vcmp.ge.s32.totalorder %v8096_v62, %v8105_v52 }
 0x45b   : > { %v4099_v53 = vrot.slane %v4098_v59, 1  ;;  %v4125_v55 = vrot.slane %v4124_v60, 1  ;;  %v5415_v30 = vadd.f32 %v5414_v23, %v5413_v61  ;;  %v5454_v44 = vpop.f32.mrb[93].mxu0  ;;  %v5416_v56 = vpop.f32.mrb[86].mxu1  ;;  %vm8295_vm10 = vmand %vm8849_vm9, %vm4224_vm14  ;;  %v5735_v31 = vpack.c.bf16 %v4406_v37, %v4405_v36 }
 0x45c   : > { %v5455_v43 = vadd.f32 %v5454_v44, %v5453_v19  ;;  %v5456_v9 = vpop.f32.mrb[94].mxu0  ;;  %v5417_v10 = vpop.f32.mrb[87].mxu1  ;;  %v8267_v7 = vmax.f32 %v4085_v58, %v4086_v20  ;;  %v8269_v11 = vmax.f32 %v4111_v0, %v4112_v1  ;;  %vm8852_vm11 = vcmp.lt.s32.totalorder %v8128_v54, %v8133_v48 }
 0x45d   : > { %v8252_v12 = vmax.f32 %v4098_v59, %v4099_v53  ;;  %v8254_v16 = vmax.f32 %v4124_v60, %v4125_v55  ;;  %v3883_v35 = vadd.f32 %v5415_v30, %v8114_v18  ;;  %v5418_v39 = vadd.f32 %v5417_v10, %v5416_v56  ;;  %v5457_v3 = vpop.f32.mrb[95].mxu0  ;;  %v4409_v55 = vld [vmem:[%s8833_s4 + $0x230] sm:$0xff]  ;;  %v4410_v30 = vld [vmem:[%s8833_s4 + $0x238] sm:$0xff] }
 0x45e   : > { %v5458_v13 = vadd.f32 %v5457_v3, %v5456_v9  ;;  %vm8853_vm12 = vcmp.ge.s32.totalorder %v8128_v54, %v8105_v52  ;;  %vm4231_vm14 = vcmp.lt.s32.totalorder %v8128_v54, %v8172_v17  ;;  %v8350_v42 = vadd.s32 9, %v8244_v27 }
 0x45f   : > { %v3886_v21 = vadd.f32 %v5418_v39, %v8114_v18  ;;  %5300 = vmatprep.mubr.msk.f32.mxu0 %vm8195_vm13, %v8252_v12  ;;  %5316 = vmatprep.mubr.msk.f32.mxu1 %vm8209_vm15, %v8254_v16  ;;  %v8299_v28 = vadd.f32 %v5455_v43, %v3883_v35  ;;  %vm8313_vm13 = vmand %vm8853_vm12, %vm8852_vm11  ;;  %vm4187_vm15 = vcmp.ge.s32.totalorder %v8117_v32, %v8181_v50  ;;  %v8368_v59 = vmul.u32 9, %v4154_v15 }
 0x460   : > { %5301 = vmatmul.mubr.msk.f32.vlgmr.msra.gmra.mrb[104].mxu0 %vm8224_vm2, %v8267_v7  ;;  %5317 = vmatmul.mubr.msk.f32.vlgmr.msra.gmra.mrb[104].mxu1 %vm8236_vm4, %v8269_v11  ;;  %vm4235_vm2 = vcmp.lt.s32.totalorder %v8117_v32, %v8216_v24  ;;  %vm8856_vm4 = vcmp.ge.s32.totalorder %v8117_v32, %v8152_v2  ;;  %vm4189_vm11 = vcmp.ge.s32.totalorder %v8125_v40, %v8181_v50  ;;  %v4155_v60 = vadd.s32 48, %v7059_v47 }
 0x461   : > { %v5419_v29 = vpop.f32.mrb[88].mxu1  ;;  %5302 = vmatprep.mubr.msk.f32.mxu0 %vm8263_vm7, %v8252_v12  ;;  %5318 = vmatprep.mubr.msk.f32.mxu1 %vm8277_vm8, %v8254_v16  ;;  %vm8341_vm9 = vmand %vm8856_vm4, %vm4230_vm0  ;;  %vm4237_vm7 = vcmp.lt.s32.totalorder %v8125_v40, %v8216_v24  ;;  %v8352_v33 = vadd.f32 %v5458_v13, %v3886_v21  ;;  %vm8859_vm0 = vcmp.ge.s32.totalorder %v8125_v40, %v8152_v2  ;;  %v8442_v46 = vadd.s32 9, %v8368_v59 }
 0x462   : > { %v5459_v58 = vpop.f32.mrb[96].mxu0  ;;  %v5420_v0 = vpop.f32.mrb[89].mxu1  ;;  %vm8360_vm8 = vmand %vm8859_vm0, %vm4232_vm1  ;;  %vm4234_vm4 = vcmp.lt.s32.totalorder %v8096_v62, %v8216_v24  ;;  %5734 = vmatpush3.bf16.msra.mxu0 %v8047_v45  ;;  %vm4188_vm0 = vcmp.ge.s32.totalorder %v8128_v54, %v8181_v50  ;;  %vm4236_vm12 = vcmp.lt.s32.totalorder %v8128_v54, %v8216_v24  ;;  %v5739_v45 = vpack.c.bf16 %v4408_v5, %v4407_v38 }
 0x463   : > { %v5421_v61 = vadd.f32 %v5420_v0, %v5419_v29  ;;  %v5460_v8 = vpop.f32.mrb[97].mxu0  ;;  %v5422_v20 = vpop.f32.mrb[90].mxu1  ;;  %vm8378_vm1 = vmand %vm4181_vm3, %vm4229_vm5  ;;  %5736 = vmatprep.subr.bf16.mxu0 %v5735_v31  ;;  %vm4192_vm5 = vcmp.ge.s32.totalorder %v8117_v32, %v8244_v27  ;;  %v8444_v36 = vmul.u32 9, %v4155_v60  ;;  %v4156_v37 = vadd.s32 56, %v7059_v47 }
 0x464   : > { %v5461_v19 = vadd.f32 %v5460_v8, %v5459_v58  ;;  %v5462_v23 = vpop.f32.mrb[98].mxu0  ;;  %v5423_v22 = vpop.f32.mrb[91].mxu1  ;;  %5303 = vmatmul.mubr.msk.f32.gmra.mrb[106].mxu0 %vm8295_vm10, %v8267_v7  ;;  %5319 = vmatmul.mubr.msk.f32.gmra.mrb[106].mxu1 %vm8313_vm13, %v8269_v11  ;;  %vm8398_vm3 = vmand %vm4183_vm6, %vm4231_vm14  ;;  %vm4194_vm10 = vcmp.ge.s32.totalorder %v8125_v40, %v8244_v27  ;;  %vm4240_vm13 = vcmp.lt.s32.totalorder %v8117_v32, %v8350_v42 }
 0x465   : > { %v3891_v44 = vadd.f32 %v5421_v61, %v8114_v18  ;;  %v5424_v56 = vadd.f32 %v5423_v22, %v5422_v20  ;;  %v5463_v57 = vpop.f32.mrb[99].mxu0  ;;  %5304 = vmatprep.mubr.msk.f32.mxu0 %vm8341_vm9, %v8252_v12  ;;  %5320 = vmatprep.mubr.msk.f32.mxu1 %vm8360_vm8, %v8254_v16  ;;  %vm8425_vm6 = vmand %vm4187_vm15, %vm4235_vm2  ;;  %vm8870_vm15 = vcmp.ge.s32.totalorder %v8096_v62, %v8181_v50  ;;  %v8519_v63 = vadd.s32 9, %v8444_v36 }
 0x466   : > { %v5464_v9 = vadd.f32 %v5463_v57, %v5462_v23  ;;  %vm8437_vm14 = vmand %vm4189_vm11, %vm4237_vm7  ;;  %5738 = vmatpush3.bf16.msra.mxu0 %v5735_v31  ;;  %vm4242_vm9 = vcmp.lt.s32.totalorder %v8125_v40, %v8350_v42  ;;  %v5743_v47 = vpack.c.bf16 %v4410_v30, %v4409_v55  ;;  %vm4191_vm7 = vcmp.ge.s32.totalorder %v8096_v62, %v8244_v27 }
 0x467   : > { %v3894_v35 = vadd.f32 %v5424_v56, %v8114_v18  ;;  %vm8454_vm2 = vmand %vm8870_vm15, %vm4234_vm4  ;;  %v8460_v3 = vadd.f32 %v5461_v19, %v3891_v44  ;;  %5740 = vmatprep.subr.bf16.mxu0 %v5739_v45  ;;  %vm4239_vm8 = vcmp.lt.s32.totalorder %v8096_v62, %v8350_v42  ;;  %vm4193_vm4 = vcmp.ge.s32.totalorder %v8128_v54, %v8244_v27 }
 0x468   : > { %5305 = vmatmul.mubr.msk.f32.gmra.mrb[108].mxu0 %vm8378_vm1, %v8267_v7  ;;  %5321 = vmatmul.mubr.msk.f32.gmra.mrb[108].mxu1 %vm8398_vm3, %v8269_v11  ;;  %vm8474_vm11 = vmand %vm4188_vm0, %vm4236_vm12  ;;  %vm4241_vm1 = vcmp.lt.s32.totalorder %v8128_v54, %v8350_v42  ;;  %vm4197_vm3 = vcmp.ge.s32.totalorder %v8117_v32, %v8368_v59  ;;  %v8521_v38 = vmul.u32 9, %v4156_v37 }
 0x469   : > { %v5425_v13 = vpop.f32.mrb[92].mxu1  ;;  %5306 = vmatprep.mubr.msk.f32.mxu0 %vm8425_vm6, %v8252_v12  ;;  %5322 = vmatprep.mubr.msk.f32.mxu1 %vm8437_vm14, %v8254_v16  ;;  %vm8494_vm12 = vmand %vm4192_vm5, %vm4240_vm13  ;;  %v8502_v15 = vadd.f32 %v5464_v9, %v3894_v35  ;;  %vm4245_vm5 = vcmp.lt.s32.totalorder %v8117_v32, %v8442_v46  ;;  %vm4199_vm6 = vcmp.ge.s32.totalorder %v8125_v40, %v8368_v59 }
 0x46a   : > { %v5465_v21 = vpop.f32.mrb[100].mxu0  ;;  %v5426_v25 = vpop.f32.mrb[93].mxu1  ;;  %vm8510_vm0 = vmand %vm4194_vm10, %vm4242_vm9  ;;  %5742 = vmatpush3.bf16.msra.mxu0 %v5739_v45  ;;  %vm4247_vm13 = vcmp.lt.s32.totalorder %v8125_v40, %v8442_v46  ;;  %vm4196_vm14 = vcmp.ge.s32.totalorder %v8096_v62, %v8368_v59  ;;  %vm4244_vm9 = vcmp.lt.s32.totalorder %v8096_v62, %v8442_v46  ;;  %v8593_v22 = vadd.s32 9, %v8521_v38 }
 0x46b   : > { %v5427_v5 = vadd.f32 %v5426_v25, %v5425_v13  ;;  %v5466_v29 = vpop.f32.mrb[101].mxu0  ;;  %v5428_v41 = vpop.f32.mrb[94].mxu1  ;;  %vm8529_vm10 = vmand %vm4191_vm7, %vm4239_vm8  ;;  %5744 = vmatprep.subr.bf16.mxu0 %v5743_v47  ;;  %vm4246_vm7 = vcmp.lt.s32.totalorder %v8128_v54, %v8442_v46 }
 0x46c   : > { %v5467_v0 = vadd.f32 %v5466_v29, %v5465_v21  ;;  %v5468_v4 = vpop.f32.mrb[102].mxu0  ;;  %v5429_v60 = vpop.f32.mrb[95].mxu1  ;;  %5307 = vmatmul.mubr.msk.f32.gmra.mrb[110].mxu0 %vm8454_vm2, %v8267_v7  ;;  %5323 = vmatmul.mubr.msk.f32.gmra.mrb[110].mxu1 %vm8474_vm11, %v8269_v11  ;;  %vm8551_vm15 = vmand %vm4193_vm4, %vm4241_vm1  ;;  %vm4198_vm2 = vcmp.ge.s32.totalorder %v8128_v54, %v8368_v59  ;;  %vm4250_vm4 = vcmp.lt.s32.totalorder %v8117_v32, %v8519_v63 }
 0x46d   : > { %v3899_v8 = vadd.f32 %v5427_v5, %v8114_v18  ;;  %v5430_v20 = vadd.f32 %v5429_v60, %v5428_v41  ;;  %v5469_v1 = vpop.f32.mrb[103].mxu0  ;;  %5308 = vmatprep.mubr.msk.f32.mxu0 %vm8494_vm12, %v8252_v12  ;;  %5324 = vmatprep.mubr.msk.f32.mxu1 %vm8510_vm0, %v8254_v16  ;;  %vm8572_vm11 = vmand %vm4197_vm3, %vm4245_vm5  ;;  %vm4202_vm12 = vcmp.ge.s32.totalorder %v8117_v32, %v8444_v36 }
 0x46e   : > { %v5470_v19 = vadd.f32 %v5469_v1, %v5468_v4  ;;  %vm8584_vm8 = vmand %vm4199_vm6, %vm4247_vm13  ;;  %5746 = vmatpush3.bf16.msra.mxu0 %v5743_v47  ;;  %vm4204_vm0 = vcmp.ge.s32.totalorder %v8125_v40, %v8444_v36  ;;  %vm4252_vm3 = vcmp.lt.s32.totalorder %v8125_v40, %v8519_v63  ;;  %vm4201_vm6 = vcmp.ge.s32.totalorder %v8096_v62, %v8444_v36 }
 0x46f   : > { %v3902_v53 = vadd.f32 %v5430_v20, %v8114_v18  ;;  %vm8602_vm1 = vmand %vm4196_vm14, %vm4244_vm9  ;;  %v3964_v30 = vadd.f32 %v5467_v0, %v3899_v8  ;;  %vm4249_vm13 = vcmp.lt.s32.totalorder %v8096_v62, %v8519_v63  ;;  %vm4203_vm14 = vcmp.ge.s32.totalorder %v8128_v54, %v8444_v36 }
 0x470   : > { %5309 = vmatmul.mubr.msk.f32.gmra.mrb[112].mxu0 %vm8529_vm10, %v8267_v7  ;;  %5325 = vmatmul.mubr.msk.f32.gmra.mrb[112].mxu1 %vm8551_vm15, %v8269_v11  ;;  %vm8619_vm5 = vmand %vm4198_vm2, %vm4246_vm7  ;;  %vm4251_vm15 = vcmp.lt.s32.totalorder %v8128_v54, %v8519_v63  ;;  %vm4207_vm2 = vcmp.ge.s32.totalorder %v8117_v32, %v8521_v38  ;;  %v4162_v18 = vadd.s32 512, %v8096_v62 }
 0x471   : > { %v5633_v44 = vpop.f32.mrb[96].mxu1  ;;  %5310 = vmatprep.mubr.msk.f32.mxu0 %vm8572_vm11, %v8252_v12  ;;  %5326 = vmatprep.mubr.msk.f32.mxu1 %vm8584_vm8, %v8254_v16  ;;  %vm8639_vm10 = vmand %vm4202_vm12, %vm4250_vm4  ;;  %v3967_v57 = vadd.f32 %v5470_v19, %v3902_v53  ;;  %vm4255_vm11 = vcmp.lt.s32.totalorder %v8117_v32, %v8593_v22  ;;  %vm4209_vm8 = vcmp.ge.s32.totalorder %v8125_v40, %v8521_v38 }
 0x472   : > { %v4013_v43 = vadd.f32 %v5633_v44, %v8299_v28  ;;  %v4004_v9 = vpop.f32.mrb[97].mxu1  ;;  %vm8654_vm9 = vmand %vm4204_vm0, %vm4252_vm3  ;;  %vm4257_vm12 = vcmp.lt.s32.totalorder %v8125_v40, %v8593_v22  ;;  %vm4206_vm0 = vcmp.ge.s32.totalorder %v8096_v62, %v8521_v38  ;;  %vm4254_vm3 = vcmp.lt.s32.totalorder %v8096_v62, %v8593_v22 }
 0x473   : > { %v4005_v37 = vadd.f32 %v4004_v9, %v8184_v49  ;;  %v5634_v28 = vpop.f32.mrb[98].mxu1  ;;  %vm8669_vm7 = vmand %vm4201_vm6, %vm4249_vm13  ;;  %vm4208_vm6 = vcmp.ge.s32.totalorder %v8128_v54, %v8521_v38  ;;  %vm4256_vm13 = vcmp.lt.s32.totalorder %v8128_v54, %v8593_v22 }
 0x474   : > { %v4016_v39 = vadd.f32 %v5634_v28, %v8352_v33  ;;  %v4007_v49 = vpop.f32.mrb[99].mxu1  ;;  %5311 = vmatmul.mubr.msk.f32.gmra.mrb[114].mxu0 %vm8602_vm1, %v8267_v7  ;;  %5327 = vmatmul.mubr.msk.f32.gmra.mrb[114].mxu1 %vm8619_vm5, %v8269_v11  ;;  %vm4291_vm4 = vmand %vm4203_vm14, %vm4251_vm15  ;;  %vm8899_vm14 = vcmask 523264  }
 0x475   : > { %v4039_v47 = vmax.f32 %v4005_v37, 0.0  ;;  %v4008_v40 = vadd.f32 %v4007_v49, %v8201_v26  ;;  %5312 = vmatprep.mubr.msk.f32.mxu0 %vm8639_vm10, %v8252_v12  ;;  %5328 = vmatprep.mubr.msk.f32.mxu1 %vm8654_vm9, %v8254_v16  ;;  %vm4295_vm1 = vmand %vm4207_vm2, %vm4255_vm11  ;;  %v4049_v26 = vmax.f32 %v4013_v43, 0.0 }
 0x476   : > { %vm4297_vm5 = vmand %vm4209_vm8, %vm4257_vm12  ;;  %v4054_v13 = vmax.f32 %v4016_v39, 0.0 }
 0x477   : > { %v4044_v33 = vmax.f32 %v4008_v40, 0.0  ;;  %vm8715_vm10 = vmand %vm4206_vm0, %vm4254_vm3  ;;  %v4127_v6 = vsel %vm8899_vm14, %v4039_v47, -inf  ;;  %vm4223_vm0 = vcmp.lt.s32.totalorder %v4162_v18, %v8120_v51  ;;  %vm4180_vm3 = vcmp.ge.s32.totalorder %v4162_v18, %v8105_v52 }
 0x478   : > { %5313 = vmatmul.mubr.msk.f32.gmra.mrb[116].mxu0 %vm8669_vm7, %v8267_v7  ;;  %5329 = vmatmul.mubr.msk.f32.gmra.mrb[116].mxu1 %vm4291_vm4, %v8269_v11  ;;  %vm8900_vm15 = vmmov %vm8899_vm14 }
 0x479   : > { %v4128_v14 = vsel %vm8900_vm15, %v4044_v33, -inf  ;;  %v5637_v21 = vpop.f32.mrb[100].mxu1  ;;  %5314 = vmatprep.mubr.msk.f32.mxu0 %vm4295_vm1, %v8252_v12  ;;  %5330 = vmatprep.mubr.msk.f32.mxu1 %vm4297_vm5, %v8254_v16  ;;  %vm4296_vm9 = vmand %vm4208_vm6, %vm4256_vm13  ;;  %vm4175_vm1 = vcmp.ge.s32.totalorder %v4162_v18, %v8103_v34  ;;  %vm4228_vm5 = vcmp.lt.s32.totalorder %v4162_v18, %v8133_v48  ;;  %vm4185_vm13 = vcmp.ge.s32.totalorder %v4162_v18, %v8152_v2 }
 0x47a   : > { %v4129_v54 = vmax.f32 %v4127_v6, %v4128_v14  ;;  %v4029_v25 = vadd.f32 %v5637_v21, %v3964_v30  ;;  %v4020_v31 = vpop.f32.mrb[101].mxu1  ;;  %vm8901_vm2 = vmmov %vm8899_vm14 }
 0x47b   : > { %v4130_v5 = vsel %vm8901_vm2, %v4049_v26, -inf  ;;  %v4021_v29 = vadd.f32 %v4020_v31, %v8460_v3  ;;  %v5638_v41 = vpop.f32.mrb[102].mxu1  ;;  %vm8902_vm11 = vmmov %vm8901_vm2 }
 0x47c   : > { %v4131_v58 = vmax.f32 %v4129_v54, %v4130_v5  ;;  %v4032_v0 = vadd.f32 %v5638_v41, %v3967_v57  ;;  %v4023_v4 = vpop.f32.mrb[103].mxu1  ;;  %5315 = vmatmul.mubr.msk.f32.gmra.mrb[118].mxu0 %vm8715_vm10, %v8267_v7  ;;  %5331 = vmatmul.mubr.msk.f32.gmra.mrb[118].mxu1 %vm4296_vm9, %v8269_v11  ;;  %v4132_v12 = vsel %vm8902_vm11, %v4054_v13, -inf  ;;  %v4069_v8 = vmax.f32 %v4029_v25, 0.0  ;;  %vm8903_vm7 = vmmov %vm8901_vm2 }
 0x47d   : > { %v4059_v16 = vmax.f32 %v4021_v29, 0.0  ;;  %v4024_v60 = vadd.f32 %v4023_v4, %v8502_v15  ;;  %vm8904_vm8 = vmmov %vm8901_vm2  ;;  %vm4233_vm10 = vcmp.lt.s32.totalorder %v4162_v18, %v8172_v17  ;;  %vm4190_vm9 = vcmp.ge.s32.totalorder %v4162_v18, %v8181_v50 }
 0x47e   : > { %v4133_v61 = vmax.f32 %v4131_v58, %v4132_v12  ;;  %v4074_v45 = vmax.f32 %v4032_v0, 0.0  ;;  %vm8905_vm12 = vmmov %vm8901_vm2  ;;  %vm4195_vm11 = vcmp.ge.s32.totalorder %v4162_v18, %v8244_v27 }
 0x47f   : > { %v4134_v20 = vsel %vm8903_vm7, %v4059_v16, -inf  ;;  %v4064_v3 = vmax.f32 %v4024_v60, 0.0  ;;  %v4138_v53 = vsel %vm8905_vm12, %v4069_v8, -inf  ;;  %vm8906_vm4 = vmmov %vm8901_vm2  ;;  %vm4238_vm2 = vcmp.lt.s32.totalorder %v4162_v18, %v8216_v24 }
 0x480   : > { %v4135_v1 = vmax.f32 %v4133_v61, %v4134_v20  ;;  %v4140_v11 = vsel %vm8906_vm4, %v4074_v45, -inf  ;;  %vm4263_vm6 = vmand %vm4175_vm1, %vm4223_vm0  ;;  %vm4243_vm7 = vcmp.lt.s32.totalorder %v4162_v18, %v8350_v42 }
 0x481   : > { %v4136_v19 = vsel %vm8904_vm8, %v4064_v3, -inf  ;;  %vm4268_vm14 = vmand %vm4180_vm3, %vm4228_vm5  ;;  %vm4200_vm3 = vcmp.ge.s32.totalorder %v4162_v18, %v8368_v59  ;;  %vm4248_vm5 = vcmp.lt.s32.totalorder %v4162_v18, %v8442_v46  ;;  %v4411_v59 = vld [vmem:[%s8834_s5 + $0x2] ss:$0 sm:$0xff] }
 0x482   : > { %v4137_v23 = vmax.f32 %v4135_v1, %v4136_v19  ;;  %vm4273_vm15 = vmand %vm4185_vm13, %vm4233_vm10  ;;  %vm4253_vm13 = vcmp.lt.s32.totalorder %v4162_v18, %v8519_v63 }
 0x483   : > { %vm8907_vm8 = vmmov %vm8906_vm4 }
 0x484   : > { %v4139_v7 = vmax.f32 %v4137_v23, %v4138_v53  ;;  %vm8908_vm12 = vmmov %vm8906_vm4 }
 0x485   : > { %vm4278_vm4 = vmand %vm4190_vm9, %vm4238_vm2  ;;  %vm4210_vm9 = vcmp.ge.s32.totalorder %v4162_v18, %v8521_v38  ;;  %vm4258_vm2 = vcmp.lt.s32.totalorder %v4162_v18, %v8593_v22 }
 0x486   : > { %v4141_v55 = vmax.f32 %v4139_v7, %v4140_v11  ;;  %vm8909_vm1 = vmmov %vm8907_vm8 }
 0x487   : > { %vm4283_vm0 = vmand %vm4195_vm11, %vm4243_vm7 }
 0x488   : > { %v4142_v30 = vrot.slane %v4141_v55, 4  ;;  %vm8910_vm10 = vmmov %vm8909_vm1 }
 0x489   : > { %vm8912_vm11 = vmmov %vm8909_vm1 }
 0x48a   : > { %v4143_v15 = vmax.f32 %v4141_v55, %v4142_v30  ;;  %vm4298_vm7 = vmand %vm4210_vm9, %vm4258_vm2 }
 0x48c   : > { %v4144_v44 = vrot.slane %v4143_v15, 2 }
 0x48e   : > { %v4145_v56 = vmax.f32 %v4143_v15, %v4144_v44 }
 0x490   : > { %v4146_v57 = vrot.slane %v4145_v56, 1 }
 0x492   : > { %v4147_v43 = vmax.f32 %v4145_v56, %v4146_v57 }
 0x494   : > { %v4303_v34 = vsel %vm4263_vm6, %v4147_v43, 0.0  ;;  %v4308_v51 = vsel %vm4268_vm14, %v4147_v43, 0.0  ;;  %v4313_v52 = vsel %vm4273_vm15, %v4147_v43, 0.0  ;;  %vm4205_vm6 = vcmp.ge.s32.totalorder %v4162_v18, %v8444_v36  ;;  %vm4288_vm14 = vmand %vm4200_vm3, %vm4248_vm5 }
 0x495   : > { %5655 = vmatprep.mubr.msk.f32.mxu0 %vm8907_vm8, %v4303_v34  ;;  %v4318_v48 = vsel %vm4278_vm4, %v4147_v43, 0.0  ;;  %v4323_v2 = vsel %vm4283_vm0, %v4147_v43, 0.0  ;;  %vm8911_vm8 = vmmov %vm8909_vm1  ;;  %v4328_v17 = vsel %vm4288_vm14, %v4147_v43, 0.0  ;;  %v4338_v24 = vsel %vm4298_vm7, %v4147_v43, 0.0 }
 0x496   : > { %5656 = vmatmul.mubr.msk.f32.vlgmr.msra.gmra.mrb[120].mxu0 %vm8908_vm12, %v4308_v51  ;;  %vm4293_vm15 = vmand %vm4205_vm6, %vm4253_vm13 }
 0x497   : > { %5658 = vmatprep.mubr.msk.f32.mxu0 %vm8909_vm1, %v4313_v52  ;;  %v4333_v50 = vsel %vm4293_vm15, %v4147_v43, 0.0  ;;  %vm8913_vm12 = vmmov %vm8909_vm1 }
 0x498   : > { %vm8914_vm4 = vmmov %vm8909_vm1  ;;  %vm4751_vm1 = vcmp.lt.s32.totalorder %v8096_v62, 5 }
 0x49a   : > { %5659 = vmatmul.mubr.msk.f32.gmra.mrb[122].mxu0 %vm8910_vm10, %v4318_v48 }
 0x49b   : > { %5661 = vmatprep.mubr.msk.f32.mxu0 %vm8911_vm8, %v4323_v2 }
 0x49e   : > { %5662 = vmatmul.mubr.msk.f32.gmra.mrb[124].mxu0 %vm8912_vm11, %v4328_v17 }
 0x49f   : > { %5664 = vmatprep.mubr.msk.f32.mxu0 %vm8913_vm12, %v4333_v50 }
 0x4a2   : > { %5665 = vmatmul.mubr.msk.f32.gmra.mrb[126].mxu0 %vm8914_vm4, %v4338_v24 }
 0x533   : > { %v5511_v27 = vpop.f32.mrb[104].mxu0  ;;  %v5567_v42 = vpop.f32.mrb[104].mxu1 }
 0x534   : > { %v5512_v46 = vpop.f32.mrb[105].mxu0  ;;  %v5568_v36 = vpop.f32.mrb[105].mxu1 }
 0x535   : > { %v5513_v63 = vadd.f32 %v5512_v46, %v5511_v27  ;;  %v5569_v38 = vadd.f32 %v5568_v36, %v5567_v42 }
 0x537   : > { %v4503_v22 = vadd.f32 %v5513_v63, %v4411_v59  ;;  %v5514_v9 = vpop.f32.mrb[106].mxu0  ;;  %v5570_v10 = vpop.f32.mrb[106].mxu1 }
 0x538   : > { %v5515_v37 = vpop.f32.mrb[107].mxu0  ;;  %v5571_v28 = vpop.f32.mrb[107].mxu1 }
 0x539   : > { %v5516_v35 = vadd.f32 %v5515_v37, %v5514_v9  ;;  %v5572_v39 = vadd.f32 %v5571_v28, %v5570_v10  ;;  %v4608_v49 = vadd.f32 %v5569_v38, %v4503_v22 }
 0x53b   : > { %v4508_v47 = vadd.f32 %v5516_v35, %v4411_v59  ;;  %v5517_v40 = vpop.f32.mrb[108].mxu0  ;;  %v5573_v26 = vpop.f32.mrb[108].mxu1 }
 0x53c   : > { %v5518_v33 = vpop.f32.mrb[109].mxu0  ;;  %v5574_v32 = vpop.f32.mrb[109].mxu1 }
 0x53d   : > { %v5519_v6 = vadd.f32 %v5518_v33, %v5517_v40  ;;  %v5575_v13 = vadd.f32 %v5574_v32, %v5573_v26  ;;  %v4613_v14 = vadd.f32 %v5572_v39, %v4508_v47 }
 0x53f   : > { %v4513_v21 = vadd.f32 %v5519_v6, %v4411_v59  ;;  %v5520_v54 = vpop.f32.mrb[110].mxu0  ;;  %v5576_v25 = vpop.f32.mrb[110].mxu1 }
 0x540   : > { %v5521_v31 = vpop.f32.mrb[111].mxu0  ;;  %v5577_v5 = vpop.f32.mrb[111].mxu1 }
 0x541   : > { %v5522_v29 = vadd.f32 %v5521_v31, %v5520_v54  ;;  %v5578_v41 = vadd.f32 %v5577_v5, %v5576_v25  ;;  %v4618_v58 = vadd.f32 %v5575_v13, %v4513_v21 }
 0x543   : > { %v4518_v0 = vadd.f32 %v5522_v29, %v4411_v59  ;;  %v5523_v4 = vpop.f32.mrb[112].mxu0  ;;  %v5579_v12 = vpop.f32.mrb[112].mxu1 }
 0x544   : > { %v5524_v16 = vpop.f32.mrb[113].mxu0  ;;  %v5580_v60 = vpop.f32.mrb[113].mxu1 }
 0x545   : > { %v5525_v61 = vadd.f32 %v5524_v16, %v5523_v4  ;;  %v5581_v8 = vadd.f32 %v5580_v60, %v5579_v12  ;;  %v4623_v20 = vadd.f32 %v5578_v41, %v4518_v0 }
 0x547   : > { %v4523_v3 = vadd.f32 %v5525_v61, %v4411_v59  ;;  %v5526_v1 = vpop.f32.mrb[114].mxu0  ;;  %v5582_v45 = vpop.f32.mrb[114].mxu1 }
 0x548   : > { %v5527_v19 = vpop.f32.mrb[115].mxu0  ;;  %v5583_v23 = vpop.f32.mrb[115].mxu1 }
 0x549   : > { %v5528_v53 = vadd.f32 %v5527_v19, %v5526_v1  ;;  %v5584_v7 = vadd.f32 %v5583_v23, %v5582_v45  ;;  %v4628_v11 = vadd.f32 %v5581_v8, %v4523_v3 }
 0x54b   : > { %v4528_v55 = vadd.f32 %v5528_v53, %v4411_v59  ;;  %v5529_v30 = vpop.f32.mrb[116].mxu0  ;;  %v5585_v18 = vpop.f32.mrb[116].mxu1 }
 0x54c   : > { %v5530_v15 = vpop.f32.mrb[117].mxu0  ;;  %v5586_v44 = vpop.f32.mrb[117].mxu1 }
 0x54d   : > { %v5531_v56 = vadd.f32 %v5530_v15, %v5529_v30  ;;  %v5587_v57 = vadd.f32 %v5586_v44, %v5585_v18  ;;  %v4633_v43 = vadd.f32 %v5584_v7, %v4528_v55 }
 0x54f   : > { %v4533_v34 = vadd.f32 %v5531_v56, %v4411_v59  ;;  %v5532_v51 = vpop.f32.mrb[118].mxu0  ;;  %v5588_v52 = vpop.f32.mrb[118].mxu1 }
 0x550   : > { %v5533_v48 = vpop.f32.mrb[119].mxu0  ;;  %v5589_v2 = vpop.f32.mrb[119].mxu1 }
 0x551   : > { %v5534_v17 = vadd.f32 %v5533_v48, %v5532_v51  ;;  %v5590_v50 = vadd.f32 %v5589_v2, %v5588_v52  ;;  %v4638_v24 = vadd.f32 %v5587_v57, %v4533_v34 }
 0x553   : > { %v4538_v27 = vadd.f32 %v5534_v17, %v4411_v59 }
 0x555   : > { %v4643_v42 = vadd.f32 %v5590_v50, %v4538_v27 }
 0x569   : > { %v5657_v46 = vpop.f32.mrb[120].mxu0 }
 0x56a   : > { %v4718_v36 = vadd.f32 %v5657_v46, %v4613_v14  ;;  %v4712_v63 = vpop.f32.mrb[121].mxu0 }
 0x56b   : > { %v4713_v38 = vadd.f32 %v4712_v63, %v4608_v49 }
 0x56c   : > { %v4753_v22 = vsel %vm4751_vm1, %v4718_v36, -1e+30 }
 0x56d   : > { %v5660_v9 = vpop.f32.mrb[122].mxu0  ;;  %4762 = vmax.xlane.f32.xlu0 %v4753_v22  ;;  %v4752_v59 = vsel %vm4751_vm1, %v4713_v38, -1e+30 }
 0x56e   : > { %v4728_v10 = vadd.f32 %v5660_v9, %v4623_v20  ;;  %v4722_v37 = vpop.f32.mrb[123].mxu0 }
 0x56f   : > { %v4723_v28 = vadd.f32 %v4722_v37, %v4618_v58 }
 0x570   : > { %v4755_v35 = vsel %vm4751_vm1, %v4728_v10, -1e+30 }
 0x571   : > { %v5663_v39 = vpop.f32.mrb[124].mxu0  ;;  %4766 = vmax.xlane.f32.xlu1 %v4755_v35  ;;  %4760 = vmax.xlane.f32.xlu0 %v4752_v59  ;;  %v4754_v26 = vsel %vm4751_vm1, %v4723_v28, -1e+30 }
 0x572   : > { %v4738_v47 = vadd.f32 %v5663_v39, %v4633_v43  ;;  %v4732_v40 = vpop.f32.mrb[125].mxu0 }
 0x573   : > { %v4733_v49 = vadd.f32 %v4732_v40, %v4628_v11 }
 0x574   : > { %v4757_v21 = vsel %vm4751_vm1, %v4738_v47, -1e+30 }
 0x575   : > { %v5666_v33 = vpop.f32.mrb[126].mxu0  ;;  %4764 = vmax.xlane.f32.xlu1 %v4754_v26  ;;  %v4756_v32 = vsel %vm4751_vm1, %v4733_v49, -1e+30 }
 0x576   : > { %v4748_v6 = vadd.f32 %v5666_v33, %v4643_v42  ;;  %v4742_v13 = vpop.f32.mrb[127].mxu0  ;;  %4768 = vmax.xlane.f32.xlu0 %v4756_v32 }
 0x577   : > { %v4743_v14 = vadd.f32 %v4742_v13, %v4638_v24 }
 0x578   : > { %v4759_v25 = vsel %vm4751_vm1, %v4748_v6, -1e+30 }
 0x579   : > { %4770 = vmax.xlane.f32.xlu1 %v4757_v21  ;;  %v4758_v54 = vsel %vm4751_vm1, %v4743_v14, -1e+30 }
 0x57a   : > { %4772 = vmax.xlane.f32.xlu0 %v4758_v54 }
 0x57d   : > { %4774 = vmax.xlane.f32.xlu1 %v4759_v25 }
 0x5fa   : > { %v4763_v31 = vpop.xlane.xlu0 %4762 }
 0x5fb   : > { %v8780_v5 = vsub.f32 %v4753_v22, %v4763_v31 }
 0x5fd   : > { %v4786_v29 = vmul.f32 1.442695, %v8780_v5 }
 0x5fe   : > { %v4767_v41 = vpop.xlane.xlu1 %4766  ;;  %v4761_v58 = vpop.xlane.xlu0 %4760 }
 0x5ff   : > { %6392 = vpow2.f32 %v4786_v29  ;;  %v8783_v0 = vsub.f32 %v4755_v35, %v4767_v41  ;;  %v8785_v4 = vsub.f32 %v4752_v59, %v4761_v58 }
 0x601   : > { %v4790_v12 = vmul.f32 1.442695, %v8783_v0  ;;  %v4784_v16 = vmul.f32 1.442695, %v8785_v4 }
 0x602   : > { %v4765_v60 = vpop.xlane.xlu1 %4764 }
 0x603   : > { %6394 = vpow2.f32 %v4790_v12  ;;  %v8789_v62 = vsub.f32 %v4754_v26, %v4765_v60  ;;  %v4769_v61 = vpop.xlane.xlu0 %4768 }
 0x604   : > { %6396 = vpow2.f32 %v4784_v16  ;;  %v8791_v8 = vsub.f32 %v4756_v32, %v4769_v61 }
 0x605   : > { %v4788_v20 = vmul.f32 1.442695, %v8789_v62 }
 0x606   : > { %v4771_v3 = vpop.xlane.xlu1 %4770  ;;  %v4792_v19 = vmul.f32 1.442695, %v8791_v8 }
 0x607   : > { %6398 = vpow2.f32 %v4788_v20  ;;  %v8794_v1 = vsub.f32 %v4757_v21, %v4771_v3  ;;  %v4773_v45 = vpop.xlane.xlu0 %4772 }
 0x608   : > { %v8797_v23 = vsub.f32 %v4758_v54, %v4773_v45 }
 0x609   : > { %v6393_v53 = vpop.eup %6392  ;;  %v4794_v7 = vmul.f32 1.442695, %v8794_v1 }
 0x60a   : > { %v4775_v11 = vpop.xlane.xlu1 %4774  ;;  %4802 = vadd.xlane.f32.xlu1 %v6393_v53  ;;  %v4796_v30 = vmul.f32 1.442695, %v8797_v23 }
 0x60b   : > { %6400 = vpow2.f32 %v4794_v7  ;;  %v8800_v55 = vsub.f32 %v4759_v25, %v4775_v11 }
 0x60c   : > { %6402 = vpow2.f32 %v4792_v19 }
 0x60d   : > { %v6395_v18 = vpop.eup %6394  ;;  %v4798_v15 = vmul.f32 1.442695, %v8800_v55 }
 0x60e   : > { %v6397_v44 = vpop.eup %6396  ;;  %4806 = vadd.xlane.f32.xlu1 %v6395_v18 }
 0x60f   : > { %6404 = vpow2.f32 %v4798_v15  ;;  %4800 = vadd.xlane.f32.xlu0 %v6397_v44 }
 0x610   : > { %6406 = vpow2.f32 %v4796_v30 }
 0x611   : > { %v6399_v56 = vpop.eup %6398 }
 0x613   : > { %4804 = vadd.xlane.f32.xlu0 %v6399_v56 }
 0x615   : > { %v6401_v57 = vpop.eup %6400 }
 0x616   : > { %v6403_v43 = vpop.eup %6402  ;;  %4810 = vadd.xlane.f32.xlu1 %v6401_v57 }
 0x617   : > { %4808 = vadd.xlane.f32.xlu0 %v6403_v43 }
 0x619   : > { %v6405_v34 = vpop.eup %6404 }
 0x61a   : > { %v6407_v51 = vpop.eup %6406  ;;  %4814 = vadd.xlane.f32.xlu1 %v6405_v34 }
 0x61b   : > { %4812 = vadd.xlane.f32.xlu0 %v6407_v51 }
 0x697   : > { %v4803_v52 = vpop.xlane.xlu1 %4802 }
 0x698   : > { %6408 = vlog2.f32 %v4803_v52 }
 0x69b   : > { %v4807_v48 = vpop.xlane.xlu1 %4806 }
 0x69c   : > { %6410 = vlog2.f32 %v4807_v48  ;;  %v4801_v2 = vpop.xlane.xlu0 %4800 }
 0x69d   : > { %6412 = vlog2.f32 %v4801_v2 }
 0x6a0   : > { %v4805_v17 = vpop.xlane.xlu0 %4804 }
 0x6a1   : > { %6414 = vlog2.f32 %v4805_v17 }
 0x6a2   : > { %v6409_v50 = vpop.eup %6408 }
 0x6a3   : > { %v4819_v24 = vmul.f32 0.6931472, %v6409_v50  ;;  %v4811_v27 = vpop.xlane.xlu1 %4810 }
 0x6a4   : > { %6416 = vlog2.f32 %v4811_v27  ;;  %v4809_v42 = vpop.xlane.xlu0 %4808 }
 0x6a5   : > { %v4833_v46 = vsub.f32 %v8780_v5, %v4819_v24  ;;  %6418 = vlog2.f32 %v4809_v42 }
 0x6a6   : > { %v6411_v36 = vpop.eup %6410 }
 0x6a7   : > { %v6413_v63 = vpop.eup %6412  ;;  %4841 = vst [vmem:[%s8808_s27 + $0x8] sm:$0xff] %v4833_v46  ;;  %v4823_v38 = vmul.f32 0.6931472, %v6411_v36  ;;  %v4815_v22 = vpop.xlane.xlu1 %4814 }
 0x6a8   : > { %v4817_v9 = vmul.f32 0.6931472, %v6413_v63  ;;  %6420 = vlog2.f32 %v4815_v22  ;;  %v4813_v10 = vpop.xlane.xlu0 %4812 }
 0x6a9   : > { %v4835_v37 = vsub.f32 %v8783_v0, %v4823_v38  ;;  %6422 = vlog2.f32 %v4813_v10 }
 0x6aa   : > { %v4832_v28 = vsub.f32 %v8785_v4, %v4817_v9 }
 0x6ab   : > { %v6415_v35 = vpop.eup %6414  ;;  %4843 = vst [vmem:[%s8808_s27 + $0x18] sm:$0xff] %v4835_v37 }
 0x6ac   : > { %4840 = vst [vmem:[%s8808_s27] sm:$0xff] %v4832_v28  ;;  %v4821_v59 = vmul.f32 0.6931472, %v6415_v35 }
 0x6ae   : > { %v6417_v39 = vpop.eup %6416  ;;  %v4834_v47 = vsub.f32 %v8789_v62, %v4821_v59 }
 0x6af   : > { %v6419_v40 = vpop.eup %6418  ;;  %v4827_v49 = vmul.f32 0.6931472, %v6417_v39 }
 0x6b0   : > { %4842 = vst [vmem:[%s8808_s27 + $0x10] sm:$0xff] %v4834_v47  ;;  %v4825_v26 = vmul.f32 0.6931472, %v6419_v40 }
 0x6b1   : > { %v4837_v33 = vsub.f32 %v8794_v1, %v4827_v49 }
 0x6b2   : > { %v6421_v32 = vpop.eup %6420  ;;  %v4836_v6 = vsub.f32 %v8791_v8, %v4825_v26 }
 0x6b3   : > { %v6423_v13 = vpop.eup %6422  ;;  %4845 = vst [vmem:[%s8808_s27 + $0x28] sm:$0xff] %v4837_v33  ;;  %v4831_v14 = vmul.f32 0.6931472, %v6421_v32 }
 0x6b4   : > { %4844 = vst [vmem:[%s8808_s27 + $0x20] sm:$0xff] %v4836_v6  ;;  %v4829_v21 = vmul.f32 0.6931472, %v6423_v13 }
 0x6b5   : > { %v4839_v54 = vsub.f32 %v8800_v55, %v4831_v14 }
 0x6b6   : > { %v4838_v25 = vsub.f32 %v8797_v23, %v4829_v21 }
 0x6b7   : > { %4847 = vst [vmem:[%s8808_s27 + $0x38] sm:$0xff] %v4839_v54 }
 0x6b8   : > { %4846 = vst [vmem:[%s8808_s27 + $0x30] sm:$0xff] %v4838_v25 }
 0x6b9 PF: > { %s16_s21 = sadd.s32 1, %s6434_s21  }
 0x6ba   : > { %p13_p4 = scmp.ge.s32.totalorder %s16_s21, 6  }
 0x6bc   :  { %15 = sbr.rel (!%p13_p4) target bundleno = 1 (0x1), region = 75 }

</bundles_post_ra>
